<compile_context>
chip_gen: v7x
topology: tpu7x:2x2x1
jax: 0.10.0
libtpu: 0.0.40
codegen_flags: <defaults>
</compile_context>

<pallas_src>
from functools import partial

import jax
import jax.numpy as jnp
from jax.experimental import pallas as pl
from jax.experimental.pallas import tpu as pltpu


# ----------------------------- Pallas kernel ------------------------------- #

def _basic_block_kernel(x_ref, xt_ref, xb_ref, w1_ref, b1_ref, w2_ref, b2_ref,
                        out_ref, xw_ref, o1_ref, *, TH, W, fused):
    """One output row tile of the fused BasicBlock.

    x_ref : (1, TH, W, Cin)  bf16  tile rows of the input (also the residual)
    xt_ref: (1, 2,  W, Cin)  bf16  2 rows above the tile (index clamped at t==0)
    xb_ref: (1, 2,  W, Cin)  bf16  2 rows below the tile (index clamped at t==last)
    w1_ref: (9*Cin, Cout)    bf16  conv1 weight, BN1 scale folded, (kh,kw,ci) row order
    w2_ref: (9*Cout, Cout)   bf16  conv2 weight, BN2 scale folded
    b1_ref, b2_ref: (1, Cout) f32  folded BN biases
    out_ref: (1, TH, W, Cout)
    xw_ref : (TH+4, W+2, Cin)  VMEM  zero-padded input window
    o1_ref : (TH+2, W+2, Cout) VMEM  zero-padded conv1-output window
    """
    t = pl.program_id(1)
    nt = pl.num_programs(1)
    Cin = x_ref.shape[-1]
    Cout = out_ref.shape[-1]
    cdt = xw_ref.dtype

    # ---- assemble the zero-padded (TH+4, W+2, Cin) input window in VMEM -------
    # Pad columns and halo rows are (re)written every tile: the scratches carry no
    # state across grid steps, so both grid axes can be 'parallel' (megacore-safe).
    xw_ref[:, 0:1, :] = jnp.zeros((TH + 4, 1, Cin), cdt)
    xw_ref[:, W + 1:W + 2, :] = jnp.zeros((TH + 4, 1, Cin), cdt)
    xw_ref[0:2, 1:W + 1, :] = xt_ref[0]
    xw_ref[2:TH + 2, 1:W + 1, :] = x_ref[0]
    xw_ref[TH + 2:TH + 4, 1:W + 1, :] = xb_ref[0]

    @pl.when(t == 0)          # image rows -2, -1  -> conv1 zero padding
    def _():
        xw_ref[0:2, :, :] = jnp.zeros((2, W + 2, Cin), cdt)

    @pl.when(t == nt - 1)     # image rows H, H+1  -> conv1 zero padding
    def _():
        xw_ref[TH + 2:TH + 4, :, :] = jnp.zeros((2, W + 2, Cin), cdt)

    # ---- conv1 + BN bias + ReLU over TH+2 rows (1-row out1 halo recomputed) ---
    if fused:
        # small-C path: one K=9*Cin matmul (per-matmul K=Cin would underfeed MXU)
        p1 = jnp.concatenate(
            [xw_ref[kh:kh + TH + 2, kw:kw + W, :]
             for kh in range(3) for kw in range(3)],
            axis=-1).reshape((TH + 2) * W, 9 * Cin)
        y1 = jnp.dot(p1, w1_ref[...], preferred_element_type=jnp.float32)
    else:
        # large-C path: 9 shifted matmuls with K=Cin accumulated in f32
        y1 = jnp.zeros(((TH + 2) * W, Cout), jnp.float32)
        for kh in range(3):
            for kw in range(3):
                patch = xw_ref[kh:kh + TH + 2, kw:kw + W, :].reshape(
                    (TH + 2) * W, Cin)
                wk = w1_ref[(kh * 3 + kw) * Cin:(kh * 3 + kw + 1) * Cin, :]
                y1 = y1 + jnp.dot(patch, wk, preferred_element_type=jnp.float32)
    y1 = jnp.maximum(y1 + b1_ref[...], 0.0).reshape(TH + 2, W, Cout)

    # ---- stage out1 (zero column padding) in VMEM for conv2 -------------------
    o1_ref[:, 0:1, :] = jnp.zeros((TH + 2, 1, Cout), cdt)
    o1_ref[:, W + 1:W + 2, :] = jnp.zeros((TH + 2, 1, Cout), cdt)
    o1_ref[:, 1:W + 1, :] = y1.astype(cdt)

    @pl.when(t == 0)          # out1 row -1 -> conv2 zero padding
    def _():
        o1_ref[0:1, :, :] = jnp.zeros((1, W + 2, Cout), cdt)

    @pl.when(t == nt - 1)     # out1 row H  -> conv2 zero padding
    def _():
        o1_ref[TH + 1:TH + 2, :, :] = jnp.zeros((1, W + 2, Cout), cdt)

    # ---- conv2 + BN bias + residual + ReLU over the TH interior rows ----------
    if fused:
        p2 = jnp.concatenate(
            [o1_ref[kh:kh + TH, kw:kw + W, :]
             for kh in range(3) for kw in range(3)],
            axis=-1).reshape(TH * W, 9 * Cout)
        y2 = jnp.dot(p2, w2_ref[...], preferred_element_type=jnp.float32)
    else:
        y2 = jnp.zeros((TH * W, Cout), jnp.float32)
        for kh in range(3):
            for kw in range(3):
                patch = o1_ref[kh:kh + TH, kw:kw + W, :].reshape(TH * W, Cout)
                wk = w2_ref[(kh * 3 + kw) * Cout:(kh * 3 + kw + 1) * Cout, :]
                y2 = y2 + jnp.dot(patch, wk, preferred_element_type=jnp.float32)
    y2 = (y2 + b2_ref[...]).reshape(TH, W, Cout)
    y2 = y2 + x_ref[0].astype(jnp.float32)        # identity residual (bf16-rounded x)
    out_ref[0] = jnp.maximum(y2, 0.0).astype(out_ref.dtype)


# ------------------------------ JAX wrapper -------------------------------- #

def _fold_bn(gamma, beta, mean, var, eps=1e-5):
    scale = gamma / jnp.sqrt(var + eps)
    bias = beta - mean * scale
    return scale, bias


def _vmem_estimate(TH, W, Cin, Cout, cbytes, obytes, fused):
    """Rough per-tile VMEM footprint (double-buffered blocks + scratch + temps)."""
    xin = 2 * TH * W * Cin * cbytes                      # main x block
    halo = 2 * 2 * (2 * W * Cin * cbytes)                # two 2-row halo blocks
    out = 2 * TH * W * Cout * obytes                     # output block
    wts = 2 * (9 * Cin * Cout + 9 * Cout * Cout) * cbytes + 4 * Cout * 4
    scr = (TH + 4) * (W + 2) * Cin * cbytes + (TH + 2) * (W + 2) * Cout * cbytes
    acc = ((TH + 2) * W + TH * W) * Cout * 4             # f32 accumulators
    tmp = (TH + 2) * W * (9 if fused else 1) * max(Cin, Cout) * cbytes
    return xin + halo + out + wts + scr + acc + tmp


def _pick_row_tile(H, W, Cin, Cout, cbytes, obytes, fused, budget=28 << 20):
    """Largest even divisor of H whose per-tile footprint fits the VMEM budget."""
    divs = [d for d in range(2, H + 1, 2) if H % d == 0]
    if not divs:
        return H
    fitting = [d for d in divs
               if _vmem_estimate(d, W, Cin, Cout, cbytes, obytes, fused) <= budget]
    return max(fitting) if fitting else min(divs)


def basic_block_forward(x_nchw, params, *, row_tile=None,
                        compute_dtype=jnp.bfloat16, out_dtype=jnp.float32,
                        fused_im2col=None):
    """BasicBlock forward (stride=1, inplanes==planes, no downsample).

    x_nchw: (N, C, H, W) float32. Returns (N, C, H, W) in out_dtype.
    """
    w1, bn1, w2, bn2 = params["w1"], params["bn1"], params["w2"], params["bn2"]

    # TODO(synk): layout transposes could be dropped if the caller provides NHWC.
    x = jnp.transpose(x_nchw, (0, 2, 3, 1)).astype(compute_dtype)  # NCHW->NHWC bf16
    N, H, W, Cin = x.shape
    Cout = w1.shape[-1]
    assert Cin == w1.shape[2] and Cout == w2.shape[2] == w2.shape[3]
    assert Cin == Cout, "identity residual requires inplanes == planes (no downsample)"
    assert H % 2 == 0, "even H required by the 2-row halo blocking"

    fused = fused_im2col if fused_im2col is not None else (Cin < 64)
    cbytes = jnp.dtype(compute_dtype).itemsize
    obytes = jnp.dtype(out_dtype).itemsize
    TH = row_tile if row_tile is not None else _pick_row_tile(
        H, W, Cin, Cout, cbytes, obytes, fused)
    assert H % TH == 0 and TH % 2 == 0, "row_tile must be even and divide H"

    s1, b1 = _fold_bn(*bn1)
    s2, b2 = _fold_bn(*bn2)
    # Fold BN scale into conv weights (tiny, one-time); (kh, kw, ci) im2col row order.
    w1m = (w1 * s1[None, None, None, :]).reshape(9 * Cin, Cout).astype(compute_dtype)
    w2m = (w2 * s2[None, None, None, :]).reshape(9 * Cout, Cout).astype(compute_dtype)
    b1m = b1.reshape(1, Cout).astype(jnp.float32)
    b2m = b2.reshape(1, Cout).astype(jnp.float32)

    hb = TH // 2                       # halo block-index stride (2-row blocks)
    last_blk = H // 2 - 1
    top_map = lambda n, t: (n, jnp.maximum(t * hb - 1, 0), 0, 0)
    bot_map = lambda n, t: (n, jnp.minimum((t + 1) * hb, last_blk), 0, 0)

    est = _vmem_estimate(TH, W, Cin, Cout, cbytes, obytes, fused)
    vmem_limit = int(min(64 << 20, max(32 << 20, 2 * est)))

    grid = (N, H // TH)
    out = pl.pallas_call(
        partial(_basic_block_kernel, TH=TH, W=W, fused=fused),
        grid=grid,
        in_specs=[
            pl.BlockSpec((1, TH, W, Cin), lambda n, t: (n, t, 0, 0)),  # tile / residual
            pl.BlockSpec((1, 2, W, Cin), top_map),                     # top halo rows
            pl.BlockSpec((1, 2, W, Cin), bot_map),                     # bottom halo rows
            pl.BlockSpec((9 * Cin, Cout), lambda n, t: (0, 0)),        # folded conv1 w
            pl.BlockSpec((1, Cout), lambda n, t: (0, 0)),              # bn1 bias
            pl.BlockSpec((9 * Cout, Cout), lambda n, t: (0, 0)),       # folded conv2 w
            pl.BlockSpec((1, Cout), lambda n, t: (0, 0)),              # bn2 bias
        ],
        out_specs=pl.BlockSpec((1, TH, W, Cout), lambda n, t: (n, t, 0, 0)),
        out_shape=jax.ShapeDtypeStruct((N, H, W, Cout), out_dtype),
        scratch_shapes=[
            pltpu.VMEM((TH + 4, W + 2, Cin), compute_dtype),   # padded input window
            pltpu.VMEM((TH + 2, W + 2, Cout), compute_dtype),  # padded out1 window
        ],
        compiler_params=pltpu.CompilerParams(
            dimension_semantics=("parallel", "parallel"),
            vmem_limit_bytes=vmem_limit),
    )(x, x, x, w1m, b1m, w2m, b2m)

    return jnp.transpose(out, (0, 3, 1, 2))                    # NHWC -> NCHW


# --------------------------- reference (plain JAX) -------------------------- #

def _ref_conv_bn(x_nchw, w_hwio, bn, relu, *, round_to=None):
    gamma, beta, mean, var = bn
    scale = gamma / jnp.sqrt(var + 1e-5)
    bias = beta - mean * scale
    w = w_hwio * scale[None, None, None, :]       # BN scale folded (same as kernel)
    xin = x_nchw
    if round_to is not None:                      # emulate the kernel's bf16 operands
        w = w.astype(round_to).astype(jnp.float32)
        xin = xin.astype(round_to).astype(jnp.float32)
    w_oihw = jnp.transpose(w, (3, 2, 0, 1))
    y = jax.lax.conv_general_dilated(
        xin, w_oihw, window_strides=(1, 1), padding=((1, 1), (1, 1)),
        dimension_numbers=("NCHW", "OIHW", "NCHW"),
        precision=jax.lax.Precision.HIGHEST)
    y = y + bias[None, :, None, None]
    return jnp.maximum(y, 0.0) if relu else y


def basic_block_ref(x_nchw, params, *, round_to=None):
    """Plain-JAX reference. round_to=jnp.bfloat16 emulates the kernel's bf16
    operands (f32 accumulation), including the bf16-rounded residual."""
    if round_to is not None:
        identity = x_nchw.astype(round_to).astype(jnp.float32)
    else:
        identity = x_nchw
    out = _ref_conv_bn(x_nchw, params["w1"], params["bn1"], relu=True, round_to=round_to)
    out = _ref_conv_bn(out, params["w2"], params["bn2"], relu=False, round_to=round_to)
    return jnp.maximum(out + identity, 0.0)


# ---------------------------------- main ----------------------------------- #

def make_params(key, inplanes, planes):
    ks = jax.random.split(key, 10)
    def bn(k0, k1, k2, k3, c):
        gamma = 0.5 + jax.random.uniform(k0, (c,), jnp.float32)
        beta = 0.1 * jax.random.normal(k1, (c,), jnp.float32)
        mean = 0.1 * jax.random.normal(k2, (c,), jnp.float32)
        var = 0.5 + jax.random.uniform(k3, (c,), jnp.float32)
        return (gamma, beta, mean, var)
    return {
        # HWIO conv weights
        "w1": 0.2 * jax.random.normal(ks[0], (3, 3, inplanes, planes), jnp.float32),
        "bn1": bn(ks[1], ks[2], ks[3], ks[4], planes),
        "w2": 0.2 * jax.random.normal(ks[5], (3, 3, planes, planes), jnp.float32),
        "bn2": bn(ks[6], ks[7], ks[8], ks[9], planes),
    }


if __name__ == "__main__":
    key = jax.random.PRNGKey(0)
    kx, kp = jax.random.split(key)

    N, C, H, W = 2, 4, 16, 16            # inplanes = planes = 4, stride = 1
    x = jax.random.normal(kx, (N, C, H, W), jnp.float32)
    params = make_params(kp, C, C)

    ref16 = basic_block_ref(x, params, round_to=jnp.bfloat16)
    ref32 = basic_block_ref(x, params)

    # (a) small-C fused-im2col path, 2 row tiles -> exercises halo blocks + edge masks.
    out_a = jax.block_until_ready(basic_block_forward(x, params, row_tile=8))
    assert out_a.shape == (N, C, H, W)
    # Tolerance note: kernel and reference round identically to bf16, but differing
    # f32 accumulation orders can flip the bf16 rounding of the intermediate at ties.
    assert jnp.allclose(out_a, ref16, atol=2e-2, rtol=2e-2), \
        float(jnp.max(jnp.abs(out_a - ref16)))
    assert jnp.allclose(out_a, ref32, atol=2e-1, rtol=1e-1), \
        float(jnp.max(jnp.abs(out_a - ref32)))

    # (b) auto row tile (single tile -> both edge masks fire in the same grid step).
    out_b = jax.block_until_ready(basic_block_forward(x, params))
    assert jnp.allclose(out_b, ref16, atol=2e-2, rtol=2e-2), \
        float(jnp.max(jnp.abs(out_b - ref16)))

    # (c) shifted-accumulation path (the large-channel code path), validated at C=8.
    x2 = jax.random.normal(jax.random.PRNGKey(1), (1, 8, H, W), jnp.float32)
    params2 = make_params(jax.random.PRNGKey(2), 8, 8)
    out_c = jax.block_until_ready(
        basic_block_forward(x2, params2, row_tile=8, fused_im2col=False))
    ref2 = basic_block_ref(x2, params2, round_to=jnp.bfloat16)
    assert jnp.allclose(out_c, ref2, atol=2e-2, rtol=2e-2), \
        float(jnp.max(jnp.abs(out_c - ref2)))

    print("KERNEL_OK")
</pallas_src>

<mosaic_0001>
module attributes {stable_mosaic.version = 11 : i64} {
  func.func @_basic_block_kernel(%arg0: i32, %arg1: i32, %arg2: memref<1x8x16x4xbf16, #tpu.memory_space<vmem>>, %arg3: memref<1x2x16x4xbf16, #tpu.memory_space<vmem>>, %arg4: memref<1x2x16x4xbf16, #tpu.memory_space<vmem>>, %arg5: memref<36x4xbf16, #tpu.memory_space<vmem>>, %arg6: memref<1x4xf32, #tpu.memory_space<vmem>>, %arg7: memref<36x4xbf16, #tpu.memory_space<vmem>>, %arg8: memref<1x4xf32, #tpu.memory_space<vmem>>, %arg9: memref<1x8x16x4xf32, #tpu.memory_space<vmem>>, %arg10: memref<12x18x4xbf16, #tpu.memory_space<vmem>>, %arg11: memref<10x18x4xbf16, #tpu.memory_space<vmem>>) attributes {dimension_semantics = [#tpu.dimension_semantics<parallel>, #tpu.dimension_semantics<parallel>], iteration_bounds = array<i64: 2, 2>, scalar_prefetch = 0 : i64, scratch_operands = 2 : i64, tpu.core_type = #tpu.core_type<tc>, window_params = [{transform_indices = @transform_0, window_bounds = array<i64: 1, 8, 16, 4>}, {transform_indices = @transform_1, window_bounds = array<i64: 1, 2, 16, 4>}, {transform_indices = @transform_2, window_bounds = array<i64: 1, 2, 16, 4>}, {pipeline_mode = #tpu.pipeline_mode<synchronous>, transform_indices = @transform_3, window_bounds = array<i64: 36, 4>}, {pipeline_mode = #tpu.pipeline_mode<synchronous>, transform_indices = @transform_4, window_bounds = array<i64: 1, 4>}, {pipeline_mode = #tpu.pipeline_mode<synchronous>, transform_indices = @transform_5, window_bounds = array<i64: 36, 4>}, {pipeline_mode = #tpu.pipeline_mode<synchronous>, transform_indices = @transform_6, window_bounds = array<i64: 1, 4>}, {transform_indices = @transform_7, window_bounds = array<i64: 1, 8, 16, 4>}]} {
    %cst = arith.constant 0.000000e+00 : bf16
    %0 = vector.broadcast %cst : bf16 to vector<12x1x4xbf16>
    %c0 = arith.constant 0 : index
    %c0_0 = arith.constant 0 : index
    %c0_1 = arith.constant 0 : index
    %1 = vector.load %arg10[%c0, %c0_0, %c0_1] : memref<12x18x4xbf16, #tpu.memory_space<vmem>>, vector<12x1x4xbf16>
    tpu.vector_store %arg10[%c0, %c0_0, %c0_1], %0 {strides = array<i32>} : memref<12x18x4xbf16, #tpu.memory_space<vmem>>, vector<12x1x4xbf16>,
    %cst_2 = arith.constant 0.000000e+00 : bf16
    %2 = vector.broadcast %cst_2 : bf16 to vector<12x1x4xbf16>
    %c0_3 = arith.constant 0 : index
    %c17 = arith.constant 17 : index
    %c0_4 = arith.constant 0 : index
    %3 = vector.load %arg10[%c0_3, %c17, %c0_4] : memref<12x18x4xbf16, #tpu.memory_space<vmem>>, vector<12x1x4xbf16>
    tpu.vector_store %arg10[%c0_3, %c17, %c0_4], %2 {strides = array<i32>} : memref<12x18x4xbf16, #tpu.memory_space<vmem>>, vector<12x1x4xbf16>,
    %c0_5 = arith.constant 0 : index
    %c0_6 = arith.constant 0 : index
    %c0_7 = arith.constant 0 : index
    %c0_8 = arith.constant 0 : index
    %4 = vector.load %arg3[%c0_5, %c0_6, %c0_7, %c0_8] : memref<1x2x16x4xbf16, #tpu.memory_space<vmem>>, vector<1x2x16x4xbf16>
    %5 = vector.shape_cast %4 : vector<1x2x16x4xbf16> to vector<2x16x4xbf16>
    %c0_9 = arith.constant 0 : index
    %c1 = arith.constant 1 : index
    %c0_10 = arith.constant 0 : index
    %6 = vector.load %arg10[%c0_9, %c1, %c0_10] : memref<12x18x4xbf16, #tpu.memory_space<vmem>>, vector<2x16x4xbf16>
    tpu.vector_store %arg10[%c0_9, %c1, %c0_10], %5 {strides = array<i32>} : memref<12x18x4xbf16, #tpu.memory_space<vmem>>, vector<2x16x4xbf16>,
    %c0_11 = arith.constant 0 : index
    %c0_12 = arith.constant 0 : index
    %c0_13 = arith.constant 0 : index
    %c0_14 = arith.constant 0 : index
    %7 = vector.load %arg2[%c0_11, %c0_12, %c0_13, %c0_14] : memref<1x8x16x4xbf16, #tpu.memory_space<vmem>>, vector<1x8x16x4xbf16>
    %8 = vector.shape_cast %7 : vector<1x8x16x4xbf16> to vector<8x16x4xbf16>
    %c2 = arith.constant 2 : index
    %c1_15 = arith.constant 1 : index
    %c0_16 = arith.constant 0 : index
    %9 = vector.load %arg10[%c2, %c1_15, %c0_16] : memref<12x18x4xbf16, #tpu.memory_space<vmem>>, vector<8x16x4xbf16>
    tpu.vector_store %arg10[%c2, %c1_15, %c0_16], %8 {strides = array<i32>} : memref<12x18x4xbf16, #tpu.memory_space<vmem>>, vector<8x16x4xbf16>,
    %c0_17 = arith.constant 0 : index
    %c0_18 = arith.constant 0 : index
    %c0_19 = arith.constant 0 : index
    %c0_20 = arith.constant 0 : index
    %10 = vector.load %arg4[%c0_17, %c0_18, %c0_19, %c0_20] : memref<1x2x16x4xbf16, #tpu.memory_space<vmem>>, vector<1x2x16x4xbf16>
    %11 = vector.shape_cast %10 : vector<1x2x16x4xbf16> to vector<2x16x4xbf16>
    %c10 = arith.constant 10 : index
    %c1_21 = arith.constant 1 : index
    %c0_22 = arith.constant 0 : index
    %12 = vector.load %arg10[%c10, %c1_21, %c0_22] : memref<12x18x4xbf16, #tpu.memory_space<vmem>>, vector<2x16x4xbf16>
    tpu.vector_store %arg10[%c10, %c1_21, %c0_22], %11 {strides = array<i32>} : memref<12x18x4xbf16, #tpu.memory_space<vmem>>, vector<2x16x4xbf16>,
    %c0_i32 = arith.constant 0 : i32
    %13 = arith.cmpi eq, %arg1, %c0_i32 : i32
    %14 = arith.extui %13 : i1 to i32
    %c0_i32_23 = arith.constant 0 : i32
    %15 = arith.cmpi ne, %14, %c0_i32_23 : i32
    scf.if %15 {
      %cst_114 = arith.constant 0.000000e+00 : bf16
      %76 = vector.broadcast %cst_114 : bf16 to vector<2x18x4xbf16>
      %c0_115 = arith.constant 0 : index
      %c0_116 = arith.constant 0 : index
      %c0_117 = arith.constant 0 : index
      %77 = vector.load %arg10[%c0_115, %c0_116, %c0_117] : memref<12x18x4xbf16, #tpu.memory_space<vmem>>, vector<2x18x4xbf16>
      tpu.vector_store %arg10[%c0_115, %c0_116, %c0_117], %76 {strides = array<i32>} : memref<12x18x4xbf16, #tpu.memory_space<vmem>>, vector<2x18x4xbf16>,
    } else {
    }
    %c1_i32 = arith.constant 1 : i32
    %16 = arith.cmpi eq, %arg1, %c1_i32 : i32
    %17 = arith.extui %16 : i1 to i32
    %c0_i32_24 = arith.constant 0 : i32
    %18 = arith.cmpi ne, %17, %c0_i32_24 : i32
    scf.if %18 {
      %cst_114 = arith.constant 0.000000e+00 : bf16
      %76 = vector.broadcast %cst_114 : bf16 to vector<2x18x4xbf16>
      %c10_115 = arith.constant 10 : index
      %c0_116 = arith.constant 0 : index
      %c0_117 = arith.constant 0 : index
      %77 = vector.load %arg10[%c10_115, %c0_116, %c0_117] : memref<12x18x4xbf16, #tpu.memory_space<vmem>>, vector<2x18x4xbf16>
      tpu.vector_store %arg10[%c10_115, %c0_116, %c0_117], %76 {strides = array<i32>} : memref<12x18x4xbf16, #tpu.memory_space<vmem>>, vector<2x18x4xbf16>,
    } else {
    }
    %c0_25 = arith.constant 0 : index
    %c0_26 = arith.constant 0 : index
    %c0_27 = arith.constant 0 : index
    %19 = vector.load %arg10[%c0_25, %c0_26, %c0_27] : memref<12x18x4xbf16, #tpu.memory_space<vmem>>, vector<10x16x4xbf16>
    %c0_28 = arith.constant 0 : index
    %c1_29 = arith.constant 1 : index
    %c0_30 = arith.constant 0 : index
    %20 = vector.load %arg10[%c0_28, %c1_29, %c0_30] : memref<12x18x4xbf16, #tpu.memory_space<vmem>>, vector<10x16x4xbf16>
    %c0_31 = arith.constant 0 : index
    %c2_32 = arith.constant 2 : index
    %c0_33 = arith.constant 0 : index
    %21 = vector.load %arg10[%c0_31, %c2_32, %c0_33] : memref<12x18x4xbf16, #tpu.memory_space<vmem>>, vector<10x16x4xbf16>
    %c1_34 = arith.constant 1 : index
    %c0_35 = arith.constant 0 : index
    %c0_36 = arith.constant 0 : index
    %22 = vector.load %arg10[%c1_34, %c0_35, %c0_36] : memref<12x18x4xbf16, #tpu.memory_space<vmem>>, vector<10x16x4xbf16>
    %c1_37 = arith.constant 1 : index
    %c1_38 = arith.constant 1 : index
    %c0_39 = arith.constant 0 : index
    %23 = vector.load %arg10[%c1_37, %c1_38, %c0_39] : memref<12x18x4xbf16, #tpu.memory_space<vmem>>, vector<10x16x4xbf16>
    %c1_40 = arith.constant 1 : index
    %c2_41 = arith.constant 2 : index
    %c0_42 = arith.constant 0 : index
    %24 = vector.load %arg10[%c1_40, %c2_41, %c0_42] : memref<12x18x4xbf16, #tpu.memory_space<vmem>>, vector<10x16x4xbf16>
    %c2_43 = arith.constant 2 : index
    %c0_44 = arith.constant 0 : index
    %c0_45 = arith.constant 0 : index
    %25 = vector.load %arg10[%c2_43, %c0_44, %c0_45] : memref<12x18x4xbf16, #tpu.memory_space<vmem>>, vector<10x16x4xbf16>
    %c2_46 = arith.constant 2 : index
    %c1_47 = arith.constant 1 : index
    %c0_48 = arith.constant 0 : index
    %26 = vector.load %arg10[%c2_46, %c1_47, %c0_48] : memref<12x18x4xbf16, #tpu.memory_space<vmem>>, vector<10x16x4xbf16>
    %c2_49 = arith.constant 2 : index
    %c2_50 = arith.constant 2 : index
    %c0_51 = arith.constant 0 : index
    %27 = vector.load %arg10[%c2_49, %c2_50, %c0_51] : memref<12x18x4xbf16, #tpu.memory_space<vmem>>, vector<10x16x4xbf16>
    %28 = tpu.concatenate %19, %20, %21, %22, %23, %24, %25, %26, %27 in 2 : vector<10x16x4xbf16>, vector<10x16x4xbf16>, vector<10x16x4xbf16>, vector<10x16x4xbf16>, vector<10x16x4xbf16>, vector<10x16x4xbf16>, vector<10x16x4xbf16>, vector<10x16x4xbf16>, vector<10x16x4xbf16> -> vector<10x16x36xbf16>
    %29 = vector.shape_cast %28 : vector<10x16x36xbf16> to vector<160x36xbf16>
    %c0_52 = arith.constant 0 : index
    %c0_53 = arith.constant 0 : index
    %30 = vector.load %arg5[%c0_52, %c0_53] : memref<36x4xbf16, #tpu.memory_space<vmem>>, vector<36x4xbf16>
    %cst_54 = arith.constant dense<0.000000e+00> : vector<160x4xf32>
    %31 = tpu.matmul %29, %30, %cst_54 {dimension_numbers = #tpu.dot_dimension_numbers<[1], [0], [0], [1], [0, 0, 1, 1], [], []>} : vector<160x36xbf16>, vector<36x4xbf16>, vector<160x4xf32> -> vector<160x4xf32>
    %c0_55 = arith.constant 0 : index
    %c0_56 = arith.constant 0 : index
    %32 = vector.load %arg6[%c0_55, %c0_56] : memref<1x4xf32, #tpu.memory_space<vmem>>, vector<1x4xf32>
    %33 = vector.broadcast %32 : vector<1x4xf32> to vector<160x4xf32>
    %34 = arith.addf %31, %33 : vector<160x4xf32>
    %cst_57 = arith.constant 0.000000e+00 : f32
    %35 = vector.broadcast %cst_57 : f32 to vector<160x4xf32>
    %36 = arith.maximumf %34, %35 : vector<160x4xf32>
    %37 = vector.shape_cast %36 : vector<160x4xf32> to vector<10x16x4xf32>
    %cst_58 = arith.constant 0.000000e+00 : bf16
    %38 = vector.broadcast %cst_58 : bf16 to vector<10x1x4xbf16>
    %c0_59 = arith.constant 0 : index
    %c0_60 = arith.constant 0 : index
    %c0_61 = arith.constant 0 : index
    %39 = vector.load %arg11[%c0_59, %c0_60, %c0_61] : memref<10x18x4xbf16, #tpu.memory_space<vmem>>, vector<10x1x4xbf16>
    tpu.vector_store %arg11[%c0_59, %c0_60, %c0_61], %38 {strides = array<i32>} : memref<10x18x4xbf16, #tpu.memory_space<vmem>>, vector<10x1x4xbf16>,
    %cst_62 = arith.constant 0.000000e+00 : bf16
    %40 = vector.broadcast %cst_62 : bf16 to vector<10x1x4xbf16>
    %c0_63 = arith.constant 0 : index
    %c17_64 = arith.constant 17 : index
    %c0_65 = arith.constant 0 : index
    %41 = vector.load %arg11[%c0_63, %c17_64, %c0_65] : memref<10x18x4xbf16, #tpu.memory_space<vmem>>, vector<10x1x4xbf16>
    tpu.vector_store %arg11[%c0_63, %c17_64, %c0_65], %40 {strides = array<i32>} : memref<10x18x4xbf16, #tpu.memory_space<vmem>>, vector<10x1x4xbf16>,
    %42 = arith.truncf %37 : vector<10x16x4xf32> to vector<10x16x4xbf16>
    %c0_66 = arith.constant 0 : index
    %c1_67 = arith.constant 1 : index
    %c0_68 = arith.constant 0 : index
    %43 = vector.load %arg11[%c0_66, %c1_67, %c0_68] : memref<10x18x4xbf16, #tpu.memory_space<vmem>>, vector<10x16x4xbf16>
    tpu.vector_store %arg11[%c0_66, %c1_67, %c0_68], %42 {strides = array<i32>} : memref<10x18x4xbf16, #tpu.memory_space<vmem>>, vector<10x16x4xbf16>,
    %c0_i32_69 = arith.constant 0 : i32
    %44 = arith.cmpi eq, %arg1, %c0_i32_69 : i32
    %45 = arith.extui %44 : i1 to i32
    %c0_i32_70 = arith.constant 0 : i32
    %46 = arith.cmpi ne, %45, %c0_i32_70 : i32
    scf.if %46 {
      %cst_114 = arith.constant 0.000000e+00 : bf16
      %76 = vector.broadcast %cst_114 : bf16 to vector<1x18x4xbf16>
      %c0_115 = arith.constant 0 : index
      %c0_116 = arith.constant 0 : index
      %c0_117 = arith.constant 0 : index
      %77 = vector.load %arg11[%c0_115, %c0_116, %c0_117] : memref<10x18x4xbf16, #tpu.memory_space<vmem>>, vector<1x18x4xbf16>
      tpu.vector_store %arg11[%c0_115, %c0_116, %c0_117], %76 {strides = array<i32>} : memref<10x18x4xbf16, #tpu.memory_space<vmem>>, vector<1x18x4xbf16>,
    } else {
    }
    %c1_i32_71 = arith.constant 1 : i32
    %47 = arith.cmpi eq, %arg1, %c1_i32_71 : i32
    %48 = arith.extui %47 : i1 to i32
    %c0_i32_72 = arith.constant 0 : i32
    %49 = arith.cmpi ne, %48, %c0_i32_72 : i32
    scf.if %49 {
      %cst_114 = arith.constant 0.000000e+00 : bf16
      %76 = vector.broadcast %cst_114 : bf16 to vector<1x18x4xbf16>
      %c9 = arith.constant 9 : index
      %c0_115 = arith.constant 0 : index
      %c0_116 = arith.constant 0 : index
      %77 = vector.load %arg11[%c9, %c0_115, %c0_116] : memref<10x18x4xbf16, #tpu.memory_space<vmem>>, vector<1x18x4xbf16>
      tpu.vector_store %arg11[%c9, %c0_115, %c0_116], %76 {strides = array<i32>} : memref<10x18x4xbf16, #tpu.memory_space<vmem>>, vector<1x18x4xbf16>,
    } else {
    }
    %c0_73 = arith.constant 0 : index
    %c0_74 = arith.constant 0 : index
    %c0_75 = arith.constant 0 : index
    %50 = vector.load %arg11[%c0_73, %c0_74, %c0_75] : memref<10x18x4xbf16, #tpu.memory_space<vmem>>, vector<8x16x4xbf16>
    %c0_76 = arith.constant 0 : index
    %c1_77 = arith.constant 1 : index
    %c0_78 = arith.constant 0 : index
    %51 = vector.load %arg11[%c0_76, %c1_77, %c0_78] : memref<10x18x4xbf16, #tpu.memory_space<vmem>>, vector<8x16x4xbf16>
    %c0_79 = arith.constant 0 : index
    %c2_80 = arith.constant 2 : index
    %c0_81 = arith.constant 0 : index
    %52 = vector.load %arg11[%c0_79, %c2_80, %c0_81] : memref<10x18x4xbf16, #tpu.memory_space<vmem>>, vector<8x16x4xbf16>
    %c1_82 = arith.constant 1 : index
    %c0_83 = arith.constant 0 : index
    %c0_84 = arith.constant 0 : index
    %53 = vector.load %arg11[%c1_82, %c0_83, %c0_84] : memref<10x18x4xbf16, #tpu.memory_space<vmem>>, vector<8x16x4xbf16>
    %c1_85 = arith.constant 1 : index
    %c1_86 = arith.constant 1 : index
    %c0_87 = arith.constant 0 : index
    %54 = vector.load %arg11[%c1_85, %c1_86, %c0_87] : memref<10x18x4xbf16, #tpu.memory_space<vmem>>, vector<8x16x4xbf16>
    %c1_88 = arith.constant 1 : index
    %c2_89 = arith.constant 2 : index
    %c0_90 = arith.constant 0 : index
    %55 = vector.load %arg11[%c1_88, %c2_89, %c0_90] : memref<10x18x4xbf16, #tpu.memory_space<vmem>>, vector<8x16x4xbf16>
    %c2_91 = arith.constant 2 : index
    %c0_92 = arith.constant 0 : index
    %c0_93 = arith.constant 0 : index
    %56 = vector.load %arg11[%c2_91, %c0_92, %c0_93] : memref<10x18x4xbf16, #tpu.memory_space<vmem>>, vector<8x16x4xbf16>
    %c2_94 = arith.constant 2 : index
    %c1_95 = arith.constant 1 : index
    %c0_96 = arith.constant 0 : index
    %57 = vector.load %arg11[%c2_94, %c1_95, %c0_96] : memref<10x18x4xbf16, #tpu.memory_space<vmem>>, vector<8x16x4xbf16>
    %c2_97 = arith.constant 2 : index
    %c2_98 = arith.constant 2 : index
    %c0_99 = arith.constant 0 : index
    %58 = vector.load %arg11[%c2_97, %c2_98, %c0_99] : memref<10x18x4xbf16, #tpu.memory_space<vmem>>, vector<8x16x4xbf16>
    %59 = tpu.concatenate %50, %51, %52, %53, %54, %55, %56, %57, %58 in 2 : vector<8x16x4xbf16>, vector<8x16x4xbf16>, vector<8x16x4xbf16>, vector<8x16x4xbf16>, vector<8x16x4xbf16>, vector<8x16x4xbf16>, vector<8x16x4xbf16>, vector<8x16x4xbf16>, vector<8x16x4xbf16> -> vector<8x16x36xbf16>
    %60 = vector.shape_cast %59 : vector<8x16x36xbf16> to vector<128x36xbf16>
    %c0_100 = arith.constant 0 : index
    %c0_101 = arith.constant 0 : index
    %61 = vector.load %arg7[%c0_100, %c0_101] : memref<36x4xbf16, #tpu.memory_space<vmem>>, vector<36x4xbf16>
    %cst_102 = arith.constant dense<0.000000e+00> : vector<128x4xf32>
    %62 = tpu.matmul %60, %61, %cst_102 {dimension_numbers = #tpu.dot_dimension_numbers<[1], [0], [0], [1], [0, 0, 1, 1], [], []>} : vector<128x36xbf16>, vector<36x4xbf16>, vector<128x4xf32> -> vector<128x4xf32>
    %c0_103 = arith.constant 0 : index
    %c0_104 = arith.constant 0 : index
    %63 = vector.load %arg8[%c0_103, %c0_104] : memref<1x4xf32, #tpu.memory_space<vmem>>, vector<1x4xf32>
    %64 = vector.broadcast %63 : vector<1x4xf32> to vector<128x4xf32>
    %65 = arith.addf %62, %64 : vector<128x4xf32>
    %66 = vector.shape_cast %65 : vector<128x4xf32> to vector<8x16x4xf32>
    %c0_105 = arith.constant 0 : index
    %c0_106 = arith.constant 0 : index
    %c0_107 = arith.constant 0 : index
    %c0_108 = arith.constant 0 : index
    %67 = vector.load %arg2[%c0_105, %c0_106, %c0_107, %c0_108] : memref<1x8x16x4xbf16, #tpu.memory_space<vmem>>, vector<1x8x16x4xbf16>
    %68 = vector.shape_cast %67 : vector<1x8x16x4xbf16> to vector<8x16x4xbf16>
    %69 = arith.extf %68 : vector<8x16x4xbf16> to vector<8x16x4xf32>
    %70 = arith.addf %66, %69 : vector<8x16x4xf32>
    %cst_109 = arith.constant 0.000000e+00 : f32
    %71 = vector.broadcast %cst_109 : f32 to vector<8x16x4xf32>
    %72 = arith.maximumf %70, %71 : vector<8x16x4xf32>
    %c0_110 = arith.constant 0 : index
    %c0_111 = arith.constant 0 : index
    %c0_112 = arith.constant 0 : index
    %c0_113 = arith.constant 0 : index
    %73 = vector.load %arg9[%c0_110, %c0_111, %c0_112, %c0_113] : memref<1x8x16x4xf32, #tpu.memory_space<vmem>>, vector<1x8x16x4xf32>
    %74 = vector.shape_cast %73 : vector<1x8x16x4xf32> to vector<8x16x4xf32>
    %75 = vector.shape_cast %72 : vector<8x16x4xf32> to vector<1x8x16x4xf32>
    tpu.vector_store %arg9[%c0_110, %c0_111, %c0_112, %c0_113], %75 {strides = array<i32>} : memref<1x8x16x4xf32, #tpu.memory_space<vmem>>, vector<1x8x16x4xf32>,
    return
  }
  func.func @transform_0(%arg0: i32, %arg1: i32) -> (i32, i32, i32, i32) {
    %c0_i32 = arith.constant 0 : i32
    %c0_i32_0 = arith.constant 0 : i32
    %c0_i32_1 = arith.constant 0 : i32
    return %arg0, %arg1, %c0_i32, %c0_i32_0 : i32, i32, i32, i32
  }
  func.func @transform_1(%arg0: i32, %arg1: i32) -> (i32, i32, i32, i32) {
    %c4_i32 = arith.constant 4 : i32
    %0 = arith.muli %arg1, %c4_i32 : i32
    %c1_i32 = arith.constant 1 : i32
    %1 = arith.subi %0, %c1_i32 : i32
    %c0_i32 = arith.constant 0 : i32
    %2 = arith.maxsi %1, %c0_i32 : i32
    %c0_i32_0 = arith.constant 0 : i32
    %c0_i32_1 = arith.constant 0 : i32
    %c0_i32_2 = arith.constant 0 : i32
    return %arg0, %2, %c0_i32_0, %c0_i32_1 : i32, i32, i32, i32
  }
  func.func @transform_2(%arg0: i32, %arg1: i32) -> (i32, i32, i32, i32) {
    %c1_i32 = arith.constant 1 : i32
    %0 = arith.addi %arg1, %c1_i32 : i32
    %c4_i32 = arith.constant 4 : i32
    %1 = arith.muli %0, %c4_i32 : i32
    %c7_i32 = arith.constant 7 : i32
    %2 = arith.minsi %1, %c7_i32 : i32
    %c0_i32 = arith.constant 0 : i32
    %c0_i32_0 = arith.constant 0 : i32
    %c0_i32_1 = arith.constant 0 : i32
    return %arg0, %2, %c0_i32, %c0_i32_0 : i32, i32, i32, i32
  }
  func.func @transform_3(%arg0: i32, %arg1: i32) -> (i32, i32) {
    %c0_i32 = arith.constant 0 : i32
    %c0_i32_0 = arith.constant 0 : i32
    %c0_i32_1 = arith.constant 0 : i32
    return %c0_i32, %c0_i32_0 : i32, i32
  }
  func.func @transform_4(%arg0: i32, %arg1: i32) -> (i32, i32) {
    %c0_i32 = arith.constant 0 : i32
    %c0_i32_0 = arith.constant 0 : i32
    %c0_i32_1 = arith.constant 0 : i32
    return %c0_i32, %c0_i32_0 : i32, i32
  }
  func.func @transform_5(%arg0: i32, %arg1: i32) -> (i32, i32) {
    %c0_i32 = arith.constant 0 : i32
    %c0_i32_0 = arith.constant 0 : i32
    %c0_i32_1 = arith.constant 0 : i32
    return %c0_i32, %c0_i32_0 : i32, i32
  }
  func.func @transform_6(%arg0: i32, %arg1: i32) -> (i32, i32) {
    %c0_i32 = arith.constant 0 : i32
    %c0_i32_0 = arith.constant 0 : i32
    %c0_i32_1 = arith.constant 0 : i32
    return %c0_i32, %c0_i32_0 : i32, i32
  }
  func.func @transform_7(%arg0: i32, %arg1: i32) -> (i32, i32, i32, i32) {
    %c0_i32 = arith.constant 0 : i32
    %c0_i32_0 = arith.constant 0 : i32
    %c0_i32_1 = arith.constant 0 : i32
    return %arg0, %arg1, %c0_i32, %c0_i32_0 : i32, i32, i32, i32
  }
}

</mosaic_0001>

<bundles_post_ra>
// kernel: tpu_custom_call.1
= control target key start
LH: loop header
LB: loop body
LE: loop exit
PB: predicated region body
PF: predicated region fallthrough
CT: control target
= control target key end

     0   :  { %s4770_s24 = smov 0   ;;  %s4772_s25 = smov 0   ;;  %s6062_s0 = inlined_call_operand.vmem [shape: bf16[2,16,16,4], index: 0, kind: input, shape index: {}]   ;;  %s6063_s1 = inlined_call_operand.vmem [shape: bf16[2,16,16,4], index: 1, kind: input, shape index: {}]   ;;  %s6064_s2 = inlined_call_operand.vmem [shape: bf16[2,16,16,4], index: 2, kind: input, shape index: {}]   ;;  %s6065_s3 = inlined_call_operand.vmem [shape: bf16[36,4], index: 3, kind: input, shape index: {}]   ;;  %s6066_s4 = inlined_call_operand.vmem [shape: f32[1,4], index: 4, kind: input, shape index: {}]   ;;  %s6067_s5 = inlined_call_operand.vmem [shape: bf16[36,4], index: 5, kind: input, shape index: {}]   ;;  %s6068_s6 = inlined_call_operand.vmem [shape: f32[1,4], index: 6, kind: input, shape index: {}]   ;;  %s6069_s7 = inlined_call_operand.vmem [shape: f32[2,16,16,4], index: 7, kind: output, shape index: {}]  }
   0x1   :  { %s4774_s26 = smov 0   ;;  %s4776_s27 = smov 0  }
   0x2   :  { %s4778_s28 = smov 0  }
   0x3 LB: > { %s26_s29 = sadd.s32 1, %s4708_s26  ;;  %s29_s30 = sadd.s32 1, %s4712_s27  ;;  %s4716_s28 = sphi %s4778_s28, %s17_s28   ;;  %s4712_s27 = sphi %s4776_s27, %s6088_s27   ;;  %s4708_s26 = sphi %s4774_s26, %s6087_s26   ;;  %s4704_s25 = sphi %s4772_s25, %s6086_s25   ;;  %s4700_s24 = sphi %s4770_s24, %s6085_s24  }
   0x4   : > { %p27_p0 = scmp.ge.s32.totalorder %s26_s29, 2  ;;  %p4085_p1 = scmp.ge.s32.totalorder %s4716_s28, 1 }
   0x5   : > { %p327_p2 = scmp.lt.s32.totalorder %s4716_s28, 5 }
   0x6   : > { %s6090_s29 = smov (%p27_p0, %s26_s29), 0  ;;  %s6092_s30 = smov (!%p27_p0, %s29_s30), %s4712_s27 }
   0x7   : > { %p328_p3 = pnand %p4085_p1, %p327_p2  ;;  %p31_p4 = scmp.ge.s32.totalorder %s6092_s30, 2 }
   0x8   : > { %vm6071_vm0 = vcmask (!%p328_p3), 24576   ;;  %vm459_vm1 = vsmask.f32 (!%p328_p3), 256  ;;  %v461_v0 = vld [vmem:[#allocation2] sm:$0x1] (!%p328_p3)  ;;  %s4086_s8 = sshll.u32 (!%p328_p3), %s4700_s24, 3 }
   0x9   : > { %s6094_s30 = smov (%p31_p4, %s6092_s30), 0  ;;  %331 = sbr.rel (%p328_p3) target bundleno = 1084 (0x43c), region = 48 }
   0xa   : > { %vm4806_vm2 = vmand (!%p328_p3), %vm6071_vm0, %vm459_vm1  ;;  %v464_v2 = vld [vmem:[#allocation2 + $0xc] sm:$0x1] (!%p328_p3)  ;;  %v467_v3 = vld [vmem:[#allocation2 + $0x18] sm:$0x1] (!%p328_p3)  ;;  %vm497_vm3 = vsmask.f32 (!%p328_p3), 7938 }
   0xb   : > { %v462_v4 = vsel (!%p328_p3), %vm4806_vm2, 0, %v461_v0  ;;  %v465_v5 = vsel (!%p328_p3), %vm4806_vm2, 0, %v464_v2  ;;  %v468_v6 = vsel (!%p328_p3), %vm4806_vm2, 0, %v467_v3  ;;  %v470_v7 = vld [vmem:[#allocation2 + $0x24] sm:$0x1] (!%p328_p3)  ;;  %p398_p5 = scmp.lt.s32.totalorder (!%p328_p3), %s4704_s25, 1  ;;  %vm4830_vm4 = vmand (!%p328_p3), %vm6071_vm0, %vm497_vm3 }
   0xc   : > { %463 = vst [vmem:[#allocation2] sm:$0x1] (!%p328_p3), %v462_v4  ;;  %466 = vst [vmem:[#allocation2 + $0xc] sm:$0x1] (!%p328_p3), %v465_v5  ;;  %v471_v8 = vsel (!%p328_p3), %vm4806_vm2, 0, %v470_v7  ;;  %p400_p6 = scmp.lt.s32.totalorder (!%p328_p3), %s4086_s8, 15 }
   0xd   : > { %469 = vst [vmem:[#allocation2 + $0x18] sm:$0x1] (!%p328_p3), %v468_v6  ;;  %v473_v9 = vld [vmem:[#allocation2 + $0x30] sm:$0x1] (!%p328_p3)  ;;  %v476_v10 = vld [vmem:[#allocation2 + $0x3c] sm:$0x1] (!%p328_p3) }
   0xe   : > { %472 = vst [vmem:[#allocation2 + $0x24] sm:$0x1] (!%p328_p3), %v471_v8  ;;  %v474_v11 = vsel (!%p328_p3), %vm4806_vm2, 0, %v473_v9  ;;  %v477_v12 = vsel (!%p328_p3), %vm4806_vm2, 0, %v476_v10  ;;  %v479_v13 = vld [vmem:[#allocation2 + $0x48] sm:$0x1] (!%p328_p3) }
   0xf   : > { %v482_v14 = vld [vmem:[#allocation2 + $0x54] sm:$0x1] (!%p328_p3)  ;;  %475 = vst [vmem:[#allocation2 + $0x30] sm:$0x1] (!%p328_p3), %v474_v11  ;;  %478 = vst [vmem:[#allocation2 + $0x3c] sm:$0x1] (!%p328_p3), %v477_v12 }
  0x10   : > { %v480_v15 = vsel %vm4806_vm2, 0, %v479_v13  ;;  %v483_v16 = vsel %vm4806_vm2, 0, %v482_v14  ;;  %v485_v17 = vld [vmem:[#allocation2 + $0x60] sm:$0x1]  ;;  %v488_v18 = vld [vmem:[#allocation2 + $0x6c] sm:$0x1] }
  0x11   : > { %481 = vst [vmem:[#allocation2 + $0x48] sm:$0x1] %v480_v15  ;;  %484 = vst [vmem:[#allocation2 + $0x54] sm:$0x1] %v483_v16  ;;  %v486_v20 = vsel %vm4806_vm2, 0, %v485_v17  ;;  %v489_v21 = vsel %vm4806_vm2, 0, %v488_v18 }
  0x12   : > { %v491_v22 = vld [vmem:[#allocation2 + $0x78] sm:$0x1]  ;;  %v494_v23 = vld [vmem:[#allocation2 + $0x84] sm:$0x1]  ;;  %487 = vst [vmem:[#allocation2 + $0x60] sm:$0x1] %v486_v20 }
  0x13   : > { %490 = vst [vmem:[#allocation2 + $0x6c] sm:$0x1] %v489_v21  ;;  %v492_v24 = vsel %vm4806_vm2, 0, %v491_v22  ;;  %v495_v25 = vsel %vm4806_vm2, 0, %v494_v23  ;;  %v499_v26 = vld [vmem:[#allocation2 + $0x8] sm:$0x1] }
  0x14   : > { %v502_v27 = vld [vmem:[#allocation2 + $0x14] sm:$0x1]  ;;  %493 = vst [vmem:[#allocation2 + $0x78] sm:$0x1] %v492_v24  ;;  %496 = vst [vmem:[#allocation2 + $0x84] sm:$0x1] %v495_v25 }
  0x15   : > { %v500_v28 = vsel %vm4830_vm4, 0, %v499_v26  ;;  %v503_v29 = vsel %vm4830_vm4, 0, %v502_v27  ;;  %v505_v30 = vld [vmem:[#allocation2 + $0x20] sm:$0x1]  ;;  %v508_v31 = vld [vmem:[#allocation2 + $0x2c] sm:$0x1] }
  0x16   : > { %501 = vst [vmem:[#allocation2 + $0x8] sm:$0x1] %v500_v28  ;;  %504 = vst [vmem:[#allocation2 + $0x14] sm:$0x1] %v503_v29  ;;  %v506_v32 = vsel %vm4830_vm4, 0, %v505_v30  ;;  %v509_v33 = vsel %vm4830_vm4, 0, %v508_v31 }
  0x17   : > { %v511_v34 = vld [vmem:[#allocation2 + $0x38] sm:$0x1]  ;;  %v514_v35 = vld [vmem:[#allocation2 + $0x44] sm:$0x1]  ;;  %507 = vst [vmem:[#allocation2 + $0x20] sm:$0x1] %v506_v32 }
  0x18   : > { %510 = vst [vmem:[#allocation2 + $0x2c] sm:$0x1] %v509_v33  ;;  %v512_v36 = vsel %vm4830_vm4, 0, %v511_v34  ;;  %v515_v37 = vsel %vm4830_vm4, 0, %v514_v35  ;;  %v517_v38 = vld [vmem:[#allocation2 + $0x50] sm:$0x1] }
  0x19   : > { %v520_v39 = vld [vmem:[#allocation2 + $0x5c] sm:$0x1]  ;;  %513 = vst [vmem:[#allocation2 + $0x38] sm:$0x1] %v512_v36  ;;  %516 = vst [vmem:[#allocation2 + $0x44] sm:$0x1] %v515_v37 }
  0x1a   : > { %v518_v40 = vsel %vm4830_vm4, 0, %v517_v38  ;;  %v521_v41 = vsel %vm4830_vm4, 0, %v520_v39  ;;  %v523_v42 = vld [vmem:[#allocation2 + $0x68] sm:$0x1]  ;;  %v526_v43 = vld [vmem:[#allocation2 + $0x74] sm:$0x1] }
  0x1b   : > { %519 = vst [vmem:[#allocation2 + $0x50] sm:$0x1] %v518_v40  ;;  %522 = vst [vmem:[#allocation2 + $0x5c] sm:$0x1] %v521_v41  ;;  %v524_v44 = vsel %vm4830_vm4, 0, %v523_v42  ;;  %v527_v45 = vsel %vm4830_vm4, 0, %v526_v43 }
  0x1c   : > { %v529_v46 = vld [vmem:[#allocation2 + $0x80] sm:$0x1]  ;;  %v532_v47 = vld [vmem:[#allocation2 + $0x8c] sm:$0x1]  ;;  %525 = vst [vmem:[#allocation2 + $0x68] sm:$0x1] %v524_v44 }
  0x1d   : > { %528 = vst [vmem:[#allocation2 + $0x74] sm:$0x1] %v527_v45  ;;  %v530_v48 = vsel %vm4830_vm4, 0, %v529_v46  ;;  %v533_v49 = vsel %vm4830_vm4, 0, %v532_v47  ;;  %s6096_s25 = smov (!%p398_p5, %s4704_s25), 1  ;;  %s4090_s9 = sshll.u32 %s4700_s24, 2 }
  0x1e   : > { %531 = vst [vmem:[#allocation2 + $0x80] sm:$0x1] %v530_v48  ;;  %534 = vst [vmem:[#allocation2 + $0x8c] sm:$0x1] %v533_v49  ;;  %s4872_s10 = sshll.u32 %s6096_s25, 5  ;;  %s4091_s11 = sadd.s32 4294967295, %s4090_s9 }
  0x1f   : > { %s6098_s8 = smov (!%p400_p6, %s4086_s8), 15  ;;  %s4876_s12 = sadd.s32 4, %s4090_s9  ;;  %vm539_vm5 = vsmask.f32 4368  ;;  %vm581_vm6 = vcmask 27648  }
  0x20   : > { %s4087_s13 = sshll.u32 %s6098_s8, 1  ;;  %p410_p7 = scmp.gt.s32.totalorder %s4091_s11, 0  ;;  %v775_v57 = vld [vmem:[#allocation2 + $0x18] sm:$0xf]  ;;  %vm4896_vm7 = vmand %vm581_vm6, %vm497_vm3  ;;  %v779_v0 = vld [vmem:[#allocation2 + $0x20] sm:$0x1] }
  0x21   : > { %s404_s14 = sadd.s32 %s4872_s10, %s4087_s13  ;;  %p429_p8 = scmp.lt.s32.totalorder %s4876_s12, 7  ;;  %v782_v2 = vld [vmem:[#allocation2 + $0x24] sm:$0xf]  ;;  %vm4902_vm8 = vmor %vm459_vm1, %vm539_vm5  ;;  %v786_v22 = vld [vmem:[#allocation2 + $0x2c] sm:$0x1] }
  0x22   : > { %s4089_s15 = sshll.u32 %s404_s14, 2  ;;  %s4104_s16 = sshll.u32 %s404_s14, 3  ;;  %v789_v35 = vld [vmem:[#allocation2 + $0x30] sm:$0xf] }
  0x23   : > { %s4883_s19 = scalar_lea.vmem %s6062_s0, %s4089_s15  ;;  %s4888_s22 = scalar_lea.vmem %s6069_s7, %s4104_s16 }
  0x24   : > { %s6100_s11 = smov (!%p410_p7, %s4091_s11), 0  ;;  %v598_v50 = vld [vmem:[%s4883_s19] sm:$0xf]  ;;  %v599_v51 = vld [vmem:[%s4883_s19 + $0x4] sm:$0xf]  ;;  %s6102_s12 = smov (!%p429_p8, %s4876_s12), 7 }
  0x25   : > { %v615_v52 = vshrl.u32 %v598_v50, 16  ;;  %v618_v53 = vshll.u32 %v598_v50, 16  ;;  %v623_v54 = vshrl.u32 %v599_v51, 16  ;;  %v626_v55 = vshll.u32 %v599_v51, 16  ;;  %v600_v56 = vld [vmem:[%s4883_s19 + $0x8] sm:$0xf] }
  0x26   : > { %s4092_s23 = sshll.u32 %s6100_s11, 1  ;;  %v632_v58 = vshrl.u32 %v600_v56, 16  ;;  %v635_v59 = vshll.u32 %v600_v56, 16  ;;  %v601_v60 = vld [vmem:[%s4883_s19 + $0xc] sm:$0xf]  ;;  %s4097_s8 = sshll.u32 %s6102_s12, 1 }
  0x27   : > { %p415_p9 = scmp.lt.s32.totalorder %s4092_s23, 15  ;;  %v617_v62 = vrot.slane %v615_v52, 7  ;;  %v625_v63 = vrot.slane %v623_v54, 7  ;;  %v640_v3 = vshrl.u32 %v601_v60, 16  ;;  %v643_v6 = vshll.u32 %v601_v60, 16  ;;  %p4949_p10 = scmp.lt.s32.totalorder %s4097_s8, 15 }
  0x28   : > { %v634_v5 = vrot.slane %v632_v58, 7  ;;  %v602_v7 = vld [vmem:[%s4883_s19 + $0x10] sm:$0xf]  ;;  %v4913_v12 = vld [vmem:[%s4883_s19 + $0x14] sm:$0xf]  ;;  %p4105_p11 = scmp.ne.s32.totalorder %s4700_s24, 0 }
  0x29   : > { %s6104_s23 = smov (!%p415_p9, %s4092_s23), 15  ;;  %v620_v8 = vor.u32 %v618_v53, %v617_v62  ;;  %v621_v9 = vrot.slane %v617_v62, 4  ;;  %v628_v10 = vor.u32 %v626_v55, %v625_v63  ;;  %v630_v11 = vrot.slane %v625_v63, 4  ;;  %v4916_v17 = vld [vmem:[%s4883_s19 + $0x18] sm:$0xf]  ;;  %s6106_s8 = smov (!%p4949_p10, %s4097_s8), 15 }
  0x2a   : > { %v637_v13 = vor.u32 %v635_v59, %v634_v5  ;;  %v638_v14 = vrot.slane %v634_v5, 4  ;;  %v642_v15 = vrot.slane %v640_v3, 7  ;;  %v649_v16 = vshrl.u32 %v602_v7, 16  ;;  %s4093_s25 = sshll.u32 %s6104_s23, 1  ;;  %v4945_v37 = vld [vmem:[%s4883_s19 + $0x1c] sm:$0xf] }
  0x2b   : > { %v776_v18 = vsel %vm4896_vm7, %v620_v8, %v775_v57  ;;  %v629_v20 = vsel %vm4902_vm8, %v621_v9, %v628_v10  ;;  %v780_v21 = vsel %vm4806_vm2, %v630_v11, %v779_v0  ;;  %v652_v23 = vshll.u32 %v602_v7, 16  ;;  %s419_s9 = sadd.s32 %s4093_s25, %s4872_s10  ;;  %v583_v51 = vld [vmem:[#allocation2] sm:$0xf]  ;;  %v588_v55 = vld [vmem:[#allocation2 + $0x8] sm:$0x1]  ;;  %s4098_s12 = sshll.u32 %s6106_s8, 1 }
  0x2c   : > { %777 = vst [vmem:[#allocation2 + $0x18] sm:$0xf] %v776_v18  ;;  %778 = vst.msk [vmem:[#allocation2 + $0x1c] sm:$0xf] %vm581_vm6, %v629_v20  ;;  %v783_v24 = vsel %vm4896_vm7, %v637_v13, %v782_v2  ;;  %v645_v25 = vor.u32 %v643_v6, %v642_v15  ;;  %v647_v26 = vrot.slane %v642_v15, 4  ;;  %v4929_v27 = vrot.slane %v649_v16, 7  ;;  %s4990_s17 = sadd.s32 %s4098_s12, %s4872_s10 }
  0x2d   : > { %781 = vst [vmem:[#allocation2 + $0x20] sm:$0x1] %v780_v21  ;;  %s4095_s11 = sshll.u32 %s419_s9, 2  ;;  %784 = vst [vmem:[#allocation2 + $0x24] sm:$0xf] %v783_v24  ;;  %v657_v28 = vshrl.u32 %v4913_v12, 16 }
  0x2e   : > { %v660_v29 = vshll.u32 %v4913_v12, 16  ;;  %v666_v30 = vshrl.u32 %v4916_v17, 16  ;;  %v669_v31 = vshll.u32 %v4916_v17, 16  ;;  %s421_s15 = scalar_lea.vmem %s6063_s1, %s4095_s11  ;;  %v646_v32 = vsel %vm4902_vm8, %v638_v14, %v645_v25  ;;  %v591_v2 = vld [vmem:[#allocation2 + $0xc] sm:$0xf]  ;;  %s4100_s10 = sshll.u32 %s4990_s17, 2 }
  0x2f   : > { %v787_v33 = vsel %vm4806_vm2, %v647_v26, %v786_v22  ;;  %v654_v34 = vor.u32 %v652_v23, %v4929_v27  ;;  %v655_v36 = vrot.slane %v4929_v27, 4  ;;  %v535_v38 = vld [vmem:[%s421_s15] sm:$0xf]  ;;  %v536_v39 = vld [vmem:[%s421_s15 + $0x4] sm:$0xf]  ;;  %v659_v54 = vrot.slane %v657_v28, 7  ;;  %s5010_s21 = scalar_lea.vmem %s6064_s2, %s4100_s10 }
  0x30   : > { %v537_v40 = vld [vmem:[%s421_s15 + $0x8] sm:$0xf]  ;;  %785 = vst.msk [vmem:[#allocation2 + $0x28] sm:$0xf] %vm581_vm6, %v646_v32  ;;  %788 = vst [vmem:[#allocation2 + $0x2c] sm:$0x1] %v787_v33 }
  0x31   : > { %v542_v41 = vshrl.u32 %v535_v38, 16  ;;  %v545_v42 = vshll.u32 %v535_v38, 16  ;;  %v550_v43 = vshrl.u32 %v536_v39, 16  ;;  %v553_v44 = vshll.u32 %v536_v39, 16  ;;  %v538_v45 = vld [vmem:[%s421_s15 + $0xc] sm:$0xf] }
  0x32   : > { %v559_v46 = vshrl.u32 %v537_v40, 16  ;;  %v562_v47 = vshll.u32 %v537_v40, 16  ;;  %v567_v48 = vshrl.u32 %v538_v45, 16  ;;  %v570_v49 = vshll.u32 %v538_v45, 16  ;;  %v595_v3 = vld [vmem:[#allocation2 + $0x14] sm:$0x1] }
  0x33   : > { %v544_v50 = vrot.slane %v542_v41, 7  ;;  %v552_v52 = vrot.slane %v550_v43, 7  ;;  %v790_v53 = vsel %vm4896_vm7, %v654_v34, %v789_v35  ;;  %v4962_v58 = vrot.slane %v666_v30, 7  ;;  %v793_v13 = vld [vmem:[#allocation2 + $0x38] sm:$0x1] }
  0x34   : > { %v561_v56 = vrot.slane %v559_v46, 7  ;;  %v569_v57 = vrot.slane %v567_v48, 7  ;;  %791 = vst [vmem:[#allocation2 + $0x30] sm:$0xf] %v790_v53  ;;  %v674_v59 = vshrl.u32 %v4945_v37, 16  ;;  %v662_v12 = vor.u32 %v660_v29, %v659_v54 }
  0x35   : > { %v547_v60 = vor.u32 %v545_v42, %v544_v50  ;;  %v548_v62 = vrot.slane %v544_v50, 4  ;;  %v555_v63 = vor.u32 %v553_v44, %v552_v52  ;;  %v557_v0 = vrot.slane %v552_v52, 4  ;;  %v606_v14 = vld [vmem:[%s4883_s19 + $0x20] sm:$0xf]  ;;  %v796_v21 = vld [vmem:[#allocation2 + $0x3c] sm:$0xf] }
  0x36   : > { %v564_v5 = vor.u32 %v562_v47, %v561_v56  ;;  %v565_v6 = vrot.slane %v561_v56, 4  ;;  %v572_v7 = vor.u32 %v570_v49, %v569_v57  ;;  %v574_v8 = vrot.slane %v569_v57, 4  ;;  %v607_v22 = vld [vmem:[%s4883_s19 + $0x24] sm:$0xf]  ;;  %v608_v28 = vld [vmem:[%s4883_s19 + $0x28] sm:$0xf] }
  0x37   : > { %v584_v9 = vsel %vm4896_vm7, %v547_v60, %v583_v51  ;;  %v556_v10 = vsel %vm4902_vm8, %v548_v62, %v555_v63  ;;  %v589_v11 = vsel %vm4806_vm2, %v557_v0, %v588_v55  ;;  %v664_v20 = vrot.slane %v659_v54, 4  ;;  %v800_v27 = vld [vmem:[#allocation2 + $0x44] sm:$0x1]  ;;  %v609_v17 = vld [vmem:[%s4883_s19 + $0x2c] sm:$0xf] }
  0x38   : > { %585 = vst [vmem:[#allocation2] sm:$0xf] %v584_v9  ;;  %587 = vst.msk [vmem:[#allocation2 + $0x4] sm:$0xf] %vm581_vm6, %v556_v10  ;;  %v592_v15 = vsel %vm4896_vm7, %v564_v5, %v591_v2  ;;  %v573_v16 = vsel %vm4902_vm8, %v565_v6, %v572_v7  ;;  %v596_v18 = vsel %vm4806_vm2, %v574_v8, %v595_v3  ;;  %v672_v25 = vrot.slane %v4962_v58, 4 }
  0x39   : > { %590 = vst [vmem:[#allocation2 + $0x8] sm:$0x1] %v589_v11  ;;  %593 = vst [vmem:[#allocation2 + $0xc] sm:$0xf] %v592_v15  ;;  %v663_v23 = vsel %vm4902_vm8, %v655_v36, %v662_v12  ;;  %v671_v24 = vor.u32 %v669_v31, %v4962_v58  ;;  %v676_v26 = vrot.slane %v674_v59, 7  ;;  %v794_v29 = vsel %vm4806_vm2, %v664_v20, %v793_v13 }
  0x3a   : > { %594 = vst.msk [vmem:[#allocation2 + $0x10] sm:$0xf] %vm581_vm6, %v573_v16  ;;  %597 = vst [vmem:[#allocation2 + $0x14] sm:$0x1] %v596_v18  ;;  %v677_v30 = vshll.u32 %v4945_v37, 16  ;;  %v683_v32 = vshrl.u32 %v606_v14, 16 }
  0x3b   : > { %792 = vst.msk [vmem:[#allocation2 + $0x34] sm:$0xf] %vm581_vm6, %v663_v23  ;;  %v686_v33 = vshll.u32 %v606_v14, 16  ;;  %795 = vst [vmem:[#allocation2 + $0x38] sm:$0x1] %v794_v29  ;;  %v797_v31 = vsel %vm4896_vm7, %v671_v24, %v796_v21  ;;  %v681_v34 = vrot.slane %v676_v26, 4 }
  0x3c   : > { %v691_v35 = vshrl.u32 %v607_v22, 16  ;;  %v694_v36 = vshll.u32 %v607_v22, 16  ;;  %798 = vst [vmem:[#allocation2 + $0x3c] sm:$0xf] %v797_v31  ;;  %v679_v38 = vor.u32 %v677_v30, %v676_v26  ;;  %v685_v39 = vrot.slane %v683_v32, 7 }
  0x3d   : > { %v700_v40 = vshrl.u32 %v608_v28, 16  ;;  %v703_v41 = vshll.u32 %v608_v28, 16  ;;  %v610_v42 = vld [vmem:[%s4883_s19 + $0x30] sm:$0xf]  ;;  %v801_v37 = vsel %vm4806_vm2, %v681_v34, %v800_v27  ;;  %v803_v43 = vld [vmem:[#allocation2 + $0x48] sm:$0xf] }
  0x3e   : > { %v693_v44 = vrot.slane %v691_v35, 7  ;;  %v708_v45 = vshrl.u32 %v609_v17, 16  ;;  %v711_v46 = vshll.u32 %v609_v17, 16  ;;  %v680_v47 = vsel %vm4902_vm8, %v672_v25, %v679_v38  ;;  %802 = vst [vmem:[#allocation2 + $0x44] sm:$0x1] %v801_v37 }
  0x3f   : > { %v688_v48 = vor.u32 %v686_v33, %v685_v39  ;;  %v689_v49 = vrot.slane %v685_v39, 4  ;;  %v807_v50 = vld [vmem:[#allocation2 + $0x50] sm:$0x1]  ;;  %v702_v51 = vrot.slane %v700_v40, 7  ;;  %v810_v52 = vld [vmem:[#allocation2 + $0x54] sm:$0xf] }
  0x40   : > { %799 = vst.msk [vmem:[#allocation2 + $0x40] sm:$0xf] %vm581_vm6, %v680_v47  ;;  %v696_v53 = vor.u32 %v694_v36, %v693_v44  ;;  %v698_v54 = vrot.slane %v693_v44, 4  ;;  %v710_v55 = vrot.slane %v708_v45, 7  ;;  %v717_v56 = vshrl.u32 %v610_v42, 16 }
  0x41   : > { %v611_v57 = vld [vmem:[%s4883_s19 + $0x34] sm:$0xf]  ;;  %v804_v58 = vsel %vm4896_vm7, %v688_v48, %v803_v43  ;;  %v705_v59 = vor.u32 %v703_v41, %v702_v51  ;;  %v706_v60 = vrot.slane %v702_v51, 4  ;;  %v814_v62 = vld [vmem:[#allocation2 + $0x5c] sm:$0x1]  ;;  %v720_v63 = vshll.u32 %v610_v42, 16 }
  0x42   : > { %v612_v0 = vld [vmem:[%s4883_s19 + $0x38] sm:$0xf]  ;;  %805 = vst [vmem:[#allocation2 + $0x48] sm:$0xf] %v804_v58  ;;  %v697_v2 = vsel %vm4902_vm8, %v689_v49, %v696_v53  ;;  %v808_v3 = vsel %vm4806_vm2, %v698_v54, %v807_v50  ;;  %v713_v5 = vor.u32 %v711_v46, %v710_v55  ;;  %v715_v6 = vrot.slane %v710_v55, 4 }
  0x43   : > { %v613_v7 = vld [vmem:[%s4883_s19 + $0x3c] sm:$0xf]  ;;  %806 = vst.msk [vmem:[#allocation2 + $0x4c] sm:$0xf] %vm581_vm6, %v697_v2  ;;  %809 = vst [vmem:[#allocation2 + $0x50] sm:$0x1] %v808_v3  ;;  %v811_v8 = vsel %vm4896_vm7, %v705_v59, %v810_v52 }
  0x44   : > { %v719_v9 = vrot.slane %v717_v56, 7  ;;  %v725_v10 = vshrl.u32 %v611_v57, 16  ;;  %v728_v11 = vshll.u32 %v611_v57, 16  ;;  %v831_v12 = vld [vmem:[%s5010_s21] sm:$0xf]  ;;  %v714_v13 = vsel %vm4902_vm8, %v706_v60, %v713_v5 }
  0x45   : > { %812 = vst [vmem:[#allocation2 + $0x54] sm:$0xf] %v811_v8  ;;  %v815_v14 = vsel %vm4806_vm2, %v715_v6, %v814_v62  ;;  %v817_v15 = vld [vmem:[#allocation2 + $0x60] sm:$0xf]  ;;  %v734_v16 = vshrl.u32 %v612_v0, 16  ;;  %v737_v18 = vshll.u32 %v612_v0, 16 }
  0x46   : > { %813 = vst.msk [vmem:[#allocation2 + $0x58] sm:$0xf] %vm581_vm6, %v714_v13  ;;  %816 = vst [vmem:[#allocation2 + $0x5c] sm:$0x1] %v815_v14  ;;  %v722_v20 = vor.u32 %v720_v63, %v719_v9  ;;  %v723_v21 = vrot.slane %v719_v9, 4  ;;  %v727_v22 = vrot.slane %v725_v10, 7 }
  0x47   : > { %v742_v23 = vshrl.u32 %v613_v7, 16  ;;  %v832_v24 = vld [vmem:[%s5010_s21 + $0x4] sm:$0xf]  ;;  %v821_v25 = vld [vmem:[#allocation2 + $0x68] sm:$0x1]  ;;  %v736_v26 = vrot.slane %v734_v16, 7 }
  0x48   : > { %v745_v27 = vshll.u32 %v613_v7, 16  ;;  %v836_v28 = vshrl.u32 %v831_v12, 16  ;;  %v839_v29 = vshll.u32 %v831_v12, 16  ;;  %v818_v30 = vsel %vm4896_vm7, %v722_v20, %v817_v15  ;;  %v824_v17 = vld [vmem:[#allocation2 + $0x6c] sm:$0xf] }
  0x49   : > { %v730_v32 = vor.u32 %v728_v11, %v727_v22  ;;  %v732_v33 = vrot.slane %v727_v22, 4  ;;  %v744_v31 = vrot.slane %v742_v23, 7  ;;  %v828_v34 = vld [vmem:[#allocation2 + $0x74] sm:$0x1]  ;;  %819 = vst [vmem:[#allocation2 + $0x60] sm:$0xf] %v818_v30  ;;  %v739_v35 = vor.u32 %v737_v18, %v736_v26 }
  0x4a   : > { %v740_v36 = vrot.slane %v736_v26, 4  ;;  %v838_v38 = vrot.slane %v836_v28, 7  ;;  %v844_v39 = vshrl.u32 %v832_v24, 16  ;;  %v833_v40 = vld [vmem:[%s5010_s21 + $0x8] sm:$0xf]  ;;  %v847_v52 = vshll.u32 %v832_v24, 16 }
  0x4b   : > { %v731_v41 = vsel %vm4902_vm8, %v723_v21, %v730_v32  ;;  %v822_v42 = vsel %vm4806_vm2, %v732_v33, %v821_v25  ;;  %v747_v37 = vor.u32 %v745_v27, %v744_v31  ;;  %v749_v43 = vrot.slane %v744_v31, 4  ;;  %v876_v44 = vld [vmem:[#allocation2 + $0x78] sm:$0xf]  ;;  %v834_v45 = vld [vmem:[%s5010_s21 + $0xc] sm:$0xf] }
  0x4c   : > { %820 = vst.msk [vmem:[#allocation2 + $0x64] sm:$0xf] %vm581_vm6, %v731_v41  ;;  %823 = vst [vmem:[#allocation2 + $0x68] sm:$0x1] %v822_v42  ;;  %v825_v46 = vsel %vm4896_vm7, %v739_v35, %v824_v17  ;;  %v841_v47 = vor.u32 %v839_v29, %v838_v38  ;;  %v842_v48 = vrot.slane %v838_v38, 4  ;;  %v846_v49 = vrot.slane %v844_v39, 7 }
  0x4d   : > { %826 = vst [vmem:[#allocation2 + $0x6c] sm:$0xf] %v825_v46  ;;  %v748_v50 = vsel %vm4902_vm8, %v740_v36, %v747_v37  ;;  %v829_v51 = vsel %vm4806_vm2, %v749_v43, %v828_v34  ;;  %v880_v53 = vld [vmem:[#allocation2 + $0x80] sm:$0x1]  ;;  %v853_v54 = vshrl.u32 %v833_v40, 16  ;;  %v856_v57 = vshll.u32 %v833_v40, 16 }
  0x4e   : > { %827 = vst.msk [vmem:[#allocation2 + $0x70] sm:$0xf] %vm581_vm6, %v748_v50  ;;  %830 = vst [vmem:[#allocation2 + $0x74] sm:$0x1] %v829_v51  ;;  %v877_v55 = vsel %vm4896_vm7, %v841_v47, %v876_v44  ;;  %v851_v56 = vrot.slane %v846_v49, 4  ;;  %v861_v58 = vshrl.u32 %v834_v45, 16  ;;  %v849_v59 = vor.u32 %v847_v52, %v846_v49 }
  0x4f   : > { %878 = vst [vmem:[#allocation2 + $0x78] sm:$0xf] %v877_v55  ;;  %v855_v60 = vrot.slane %v853_v54, 7  ;;  %v864_v62 = vshll.u32 %v834_v45, 16  ;;  %v883_v0 = vld [vmem:[#allocation2 + $0x84] sm:$0xf] }
  0x50   : > { %v881_v63 = vsel %vm4806_vm2, %v851_v56, %v880_v53  ;;  %v863_v2 = vrot.slane %v861_v58, 7  ;;  %v850_v3 = vsel %vm4902_vm8, %v842_v48, %v849_v59  ;;  %v887_v7 = vld [vmem:[#allocation2 + $0x8c] sm:$0x1]  ;;  %893 = sbr.rel (%p4105_p11) target bundleno = 87 (0x57), region = 52  ;;  %v4718_v13 = vmov (!%p4105_p11), 0  }
  0x51   : > { %882 = vst [vmem:[#allocation2 + $0x80] sm:$0x1] %v881_v63  ;;  %v858_v5 = vor.u32 %v856_v57, %v855_v60  ;;  %v859_v6 = vrot.slane %v855_v60, 4  ;;  %879 = vst.msk [vmem:[#allocation2 + $0x7c] sm:$0xf] %vm581_vm6, %v850_v3 }
  0x52   : > { %v866_v8 = vor.u32 %v864_v62, %v863_v2  ;;  %v868_v9 = vrot.slane %v863_v2, 4  ;;  %894 = vst.msk [vmem:[#allocation2] sm:$0xf] (!%p4105_p11), %vm581_vm6, %v4718_v13  ;;  %895 = vst.msk [vmem:[#allocation2 + $0x4] sm:$0xf] (!%p4105_p11), %vm581_vm6, %v4718_v13 }
  0x53   : > { %v884_v10 = vsel %vm4896_vm7, %v858_v5, %v883_v0  ;;  %897 = vst.msk [vmem:[#allocation2 + $0x8] sm:$0x1] (!%p4105_p11), %vm6071_vm0, %v4718_v13  ;;  %900 = vst.msk [vmem:[#allocation2 + $0x14] sm:$0x1] (!%p4105_p11), %vm6071_vm0, %v4718_v13 }
  0x54   : > { %885 = vst [vmem:[#allocation2 + $0x84] sm:$0xf] %v884_v10  ;;  %v867_v11 = vsel %vm4902_vm8, %v859_v6, %v866_v8  ;;  %v888_v12 = vsel %vm4806_vm2, %v868_v9, %v887_v7  ;;  %898 = vst.msk [vmem:[#allocation2 + $0xc] sm:$0xf] (!%p4105_p11), %vm581_vm6, %v4718_v13 }
  0x55   : > { %886 = vst.msk [vmem:[#allocation2 + $0x88] sm:$0xf] %vm581_vm6, %v867_v11  ;;  %889 = vst [vmem:[#allocation2 + $0x8c] sm:$0x1] %v888_v12 }
  0x56   : > { %899 = vst.msk [vmem:[#allocation2 + $0x10] sm:$0xf] (!%p4105_p11), %vm581_vm6, %v4718_v13 }
  0x57 PF: > { %p4106_p12 = scmp.ne.s32.totalorder %s4700_s24, 1 }
  0x58   : > { %v4719_v14 = vmov (!%p4106_p12), 0  }
  0x59   : > { %904 = sbr.rel (%p4106_p12) target bundleno = 96 (0x60), region = 56  ;;  %905 = vst.msk [vmem:[#allocation2 + $0x78] sm:$0xf] (!%p4106_p12), %vm581_vm6, %v4719_v14  ;;  %906 = vst.msk [vmem:[#allocation2 + $0x7c] sm:$0xf] (!%p4106_p12), %vm581_vm6, %v4719_v14 }
  0x5a   : > { %908 = vst.msk [vmem:[#allocation2 + $0x80] sm:$0x1] (!%p4106_p12), %vm6071_vm0, %v4719_v14  ;;  %911 = vst.msk [vmem:[#allocation2 + $0x8c] sm:$0x1] (!%p4106_p12), %vm6071_vm0, %v4719_v14 }
  0x5b   : > { %909 = vst.msk [vmem:[#allocation2 + $0x84] sm:$0xf] (!%p4106_p12), %vm581_vm6, %v4719_v14  ;;  %910 = vst.msk [vmem:[#allocation2 + $0x88] sm:$0xf] (!%p4106_p12), %vm581_vm6, %v4719_v14 }
  0x60 PF: > { %v953_v15 = vld [vmem:[#allocation2 + $0xc] sm:$0xf]  ;;  %v5078_v16 = vld [vmem:[#allocation2 + $0x10] sm:$0xf]  ;;  %v913_v20 = vld [vmem:[#allocation2 + $0x4] sm:$0xf] }
  0x61   : > { %v5081_v18 = vcombine.low %v953_v15, %v5078_v16  ;;  %v942_v21 = vld [vmem:[#allocation2] sm:$0xe]  ;;  %v4512_v22 = vld [vmem:[#allocation2 + $0x8] ss:$0 sps:$4 sm:$0x11]   ;;  %s4720_s23 = smov 12  }
  0x62   : > { %v4127_v23 = vcombine.low %v942_v21, %v913_v20  ;;  %vm1284_vm9 = vcmask 1046528   ;;  %v912_v24 = vld [vmem:[#allocation2] sm:$0xf]  ;;  %v914_v25 = vld [vmem:[#allocation2 + $0xc] sm:$0xf]  ;;  %v1286_v26 = vrot.slane %v4512_v22, 1 }
  0x63   : > { %1385 = vrot.lane.b32.xlu0 %v5081_v18, %s4720_s23  ;;  %v5085_v27 = vcombine.low %v912_v24, %v913_v20  ;;  %v915_v28 = vld [vmem:[#allocation2 + $0x10] sm:$0xf]  ;;  %v1122_v29 = vshll.u32 %v4512_v22, 16  ;;  %v943_v32 = vld [vmem:[#allocation2 + $0xc] sm:$0xe]  ;;  %v1438_v31 = vshll.u32 %v5081_v18, 16 }
  0x64   : > { %v1285_v30 = vrot.slane %v4127_v23, 1  ;;  %v5087_v33 = vcombine.low %v914_v25, %v915_v28  ;;  %v4516_v17 = vld [vmem:[#allocation2 + $0x14] ss:$0 sps:$4 sm:$0x11]   ;;  %v4128_v34 = vcombine.low %v943_v32, %v915_v28  ;;  %v955_v38 = vld [vmem:[#allocation2 + $0x18] sm:$0xf] }
  0x65   : > { %v1115_v35 = vshrl.u32 %v5085_v27, 16  ;;  %v1117_v36 = vshll.u32 %v5085_v27, 16  ;;  %v1289_v40 = vrot.slane %v4516_v17, 1  ;;  %vm1113_vm10 = vsmask.f32 7424  ;;  %s4721_s25 = smov 8  }
  0x66   : > { %v1287_v39 = vsel %vm1284_vm9, %v1285_v30, %v1286_v26  ;;  %v1124_v41 = vrot.slane %v1122_v29, 1  ;;  %v956_v42 = vld [vmem:[#allocation2 + $0x1c] sm:$0xf]  ;;  %v983_v37 = vld [vmem:[#allocation2 + $0xc] sm:$0xe]  ;;  %v1288_v43 = vrot.slane %v4128_v34, 1 }
  0x67   : > { %1315 = vrot.lane.b32.xlu1 %v1287_v39, %s4721_s25  ;;  %v1119_v44 = vrot.slane %v1117_v36, 1  ;;  %v984_v45 = vld [vmem:[#allocation2 + $0x18] sm:$0xe]  ;;  %v4138_v46 = vcombine.low %v955_v38, %v956_v42  ;;  %v1127_v47 = vshrl.u32 %v5087_v33, 16  ;;  %v1129_v48 = vshll.u32 %v5087_v33, 16  ;;  %s4722_s8 = smov 4  }
  0x68   : > { %v1134_v49 = vshll.u32 %v4516_v17, 16  ;;  %v4520_v50 = vld [vmem:[#allocation2 + $0x20] ss:$0 sps:$4 sm:$0x11]   ;;  %v1290_v51 = vsel %vm1284_vm9, %v1288_v43, %v1289_v40  ;;  %v995_v55 = vld [vmem:[#allocation2 + $0x24] sm:$0xf]  ;;  %v4158_v56 = vcombine.low %v984_v45, %v956_v42  ;;  %v4157_v5 = vcombine.low %v983_v37, %v5078_v16 }
  0x69   : > { %v1120_v52 = vor.u32 %v1119_v44, %v1115_v35  ;;  %v1450_v53 = vshll.u32 %v4138_v46, 16  ;;  %v1448_v54 = vshrl.u32 %v4138_v46, 16  ;;  %v1131_v57 = vrot.slane %v1129_v48, 1  ;;  %v4521_v60 = vld [vmem:[#allocation2 + $0x14] ss:$0 sps:$4 sm:$0x11]  }
  0x6a   : > { %v1136_v58 = vrot.slane %v1134_v49, 1  ;;  %v1455_v59 = vshll.u32 %v4520_v50, 16  ;;  %v1436_v0 = vshrl.u32 %v5081_v18, 16  ;;  %v1440_v2 = vrot.slane %v1438_v31, 1  ;;  %v5100_v3 = vld [vmem:[#allocation2 + $0x28] sm:$0xf] }
  0x6b   : > { %1317 = vrot.lane.b32.xlu1 %v1290_v51, %s4721_s25  ;;  %v1125_v62 = vsel %vm1113_vm10, %v1120_v52, %v1124_v41  ;;  %v1452_v63 = vrot.slane %v1450_v53, 1  ;;  %v1132_v6 = vor.u32 %v1131_v57, %v1127_v47  ;;  %v1443_v8 = vshll.u32 %v4521_v60, 16  ;;  %v993_v11 = vld [vmem:[#allocation2 + $0x18] sm:$0xf]  ;;  %v994_v12 = vld [vmem:[#allocation2 + $0x1c] sm:$0xf] }
  0x6c   : > { %1234 = vrot.lane.b32.xlu0 %v1125_v62, %s4722_s8  ;;  %v1457_v7 = vrot.slane %v1455_v59, 1  ;;  %v1441_v10 = vor.u32 %v1440_v2, %v1436_v0  ;;  %v1608_v15 = vrot.slane %v4158_v56, 1  ;;  %v4168_v18 = vcombine.low %v995_v55, %v5100_v3  ;;  %v5107_v21 = vld [vmem:[#allocation2 + $0x2c] ss:$0 sps:$4 sm:$0x11]   ;;  %v4588_v34 = vld [vmem:[%s6065_s3] sm:$0xff]  }
  0x6d   : > { %v1453_v9 = vor.u32 %v1452_v63, %v1448_v54  ;;  %v1137_v13 = vsel %vm1113_vm10, %v1132_v6, %v1136_v58  ;;  %v1445_v14 = vrot.slane %v1443_v8, 1  ;;  %v1609_v20 = vrot.slane %v4520_v50, 1  ;;  %v916_v26 = vld [vmem:[#allocation2 + $0x18] sm:$0xf]  ;;  %v5114_v32 = vld [vmem:[#allocation2 + $0x1c] sm:$0xf]  ;;  %4408 = vmatprep.subr.bf16.mxu0 %v4588_v34 }
  0x6e   : > { %v4167_v16 = vcombine.low %v993_v11, %v994_v12  ;;  %v1605_v23 = vrot.slane %v4157_v5, 1  ;;  %v1606_v24 = vrot.slane %v4521_v60, 1  ;;  %v1770_v25 = vshll.u32 %v4168_v18, 16  ;;  %v5112_v30 = vld [vmem:[#allocation2 + $0x20] ss:$0 sps:$4 sm:$0x11]   ;;  %4409 = vmatpush3.bf16.msra.mxu0 %v4588_v34 }
  0x6f   : > { %1387 = vrot.lane.b32.xlu1 %v4138_v46, %s4720_s23  ;;  %v1458_v22 = vsel %vm1113_vm10, %v1453_v9, %v1457_v7  ;;  %v1446_v28 = vsel %vm1113_vm10, %v1441_v10, %v1445_v14  ;;  %v1023_v17 = vld [vmem:[#allocation2 + $0x18] sm:$0xe]  ;;  %v5117_v31 = vcombine.low %v916_v26, %v5114_v32  ;;  %s4723_s13 = smov 16   ;;  %v1768_v35 = vshrl.u32 %v4168_v18, 16  ;;  %v918_v37 = vld [vmem:[#allocation2 + $0x24] sm:$0xf] }
  0x70   : > { %1236 = vrot.lane.b32.xlu0 %v1137_v13, %s4722_s8  ;;  %v1758_v29 = vshll.u32 %v4167_v16, 16  ;;  %v1772_v36 = vrot.slane %v1770_v25, 1  ;;  %v1775_v38 = vshll.u32 %v5107_v21, 16  ;;  %v5124_v39 = vld [vmem:[#allocation2 + $0x20] ss:$0 sps:$4 sm:$0x11]   ;;  %v1610_v40 = vsel %vm1284_vm9, %v1608_v15, %v1609_v20 }
  0x71   : > { %v1756_v41 = vshrl.u32 %v4167_v16, 16  ;;  %v1141_v42 = vshll.u32 %v5117_v31, 16  ;;  %v4593_v43 = vld [vmem:[%s6065_s3 + $0x8] sm:$0xff]   ;;  %v1607_v44 = vsel %vm1284_vm9, %v1605_v23, %v1606_v24  ;;  %v1763_v46 = vshll.u32 %v5112_v30, 16  ;;  %s4724_s16 = smov 20   ;;  %s4725_s12 = smov 24  }
  0x72   : > { %v1760_v45 = vrot.slane %v1758_v29, 1  ;;  %v919_v47 = vld [vmem:[#allocation2 + $0x28] sm:$0xf]  ;;  %4410 = vmatprep.subr.bf16.mxu0 %v4593_v43  ;;  %v4187_v49 = vcombine.low %v1023_v17, %v994_v12  ;;  %v1773_v50 = vor.u32 %v1772_v36, %v1768_v35  ;;  %v1777_v51 = vrot.slane %v1775_v38, 1  ;;  %v1024_v59 = vld [vmem:[#allocation2 + $0x24] sm:$0xe] }
  0x73   : > { %1557 = vrot.lane.b32.xlu1 %v1458_v22, %s4723_s13  ;;  %v5134_v48 = vcombine.low %v918_v37, %v919_v47  ;;  %v1146_v52 = vshll.u32 %v5124_v39, 16  ;;  %v1139_v53 = vshrl.u32 %v5117_v31, 16  ;;  %v1143_v54 = vrot.slane %v1141_v42, 1  ;;  %v4531_v55 = vld [vmem:[#allocation2 + $0x2c] ss:$0 sps:$4 sm:$0x11]   ;;  %4411 = vmatpush3.bf16.msra.mxu0 %v4593_v43 }
  0x74   : > { %1555 = vrot.lane.b32.xlu0 %v1446_v28, %s4723_s13  ;;  %v1761_v57 = vor.u32 %v1760_v45, %v1756_v41  ;;  %v1765_v58 = vrot.slane %v1763_v46, 1  ;;  %v1778_v60 = vsel %vm1113_vm10, %v1773_v50, %v1777_v51  ;;  %v1925_v63 = vrot.slane %v4187_v49, 1  ;;  %v945_v8 = vld [vmem:[#allocation2 + $0x24] sm:$0xe]  ;;  %v959_v11 = vld [vmem:[#allocation2 + $0x30] sm:$0xf] }
  0x75   : > { %v1153_v56 = vshll.u32 %v5134_v48, 16  ;;  %v1148_v62 = vrot.slane %v1146_v52, 1  ;;  %v1926_v0 = vrot.slane %v5112_v30, 1  ;;  %v1144_v2 = vor.u32 %v1143_v54, %v1139_v53  ;;  %v960_v12 = vld [vmem:[#allocation2 + $0x34] sm:$0xf]  ;;  %s4726_s17 = smov 28  }
  0x76   : > { %v1151_v5 = vshrl.u32 %v5134_v48, 16  ;;  %v1158_v7 = vshll.u32 %v4531_v55, 16  ;;  %v4188_v9 = vcombine.low %v1024_v59, %v5100_v3  ;;  %v1766_v10 = vsel %vm1113_vm10, %v1761_v57, %v1765_v58  ;;  %v944_v13 = vld [vmem:[#allocation2 + $0x18] sm:$0xe]  ;;  %v957_v14 = vld [vmem:[#allocation2 + $0x24] sm:$0xf] }
  0x77   : > { %1637 = vrot.lane.b32.xlu1 %v1610_v40, %s4724_s16  ;;  %v1155_v6 = vrot.slane %v1153_v56, 1  ;;  %v958_v15 = vld [vmem:[#allocation2 + $0x28] sm:$0xf]  ;;  %v4130_v20 = vcombine.low %v945_v8, %v919_v47  ;;  %v4140_v3 = vcombine.low %v959_v11, %v960_v12  ;;  %v1929_v25 = vrot.slane %v5107_v21, 1  ;;  %s4727_s10 = smov 32  }
  0x78   : > { %1635 = vrot.lane.b32.xlu0 %v1607_v44, %s4724_s16  ;;  %v1160_v23 = vrot.slane %v1158_v7, 1  ;;  %v1928_v24 = vrot.slane %v4188_v9, 1  ;;  %v4129_v26 = vcombine.low %v944_v13, %v5114_v32  ;;  %v4139_v28 = vcombine.low %v957_v14, %v958_v15  ;;  %v4538_v35 = vld [vmem:[#allocation2 + $0x38] ss:$0 sps:$4 sm:$0x11]  }
  0x79   : > { %v1156_v22 = vor.u32 %v1155_v6, %v1151_v5  ;;  %v1294_v30 = vrot.slane %v4130_v20, 1  ;;  %v1295_v17 = vrot.slane %v4531_v55, 1  ;;  %v1474_v34 = vshll.u32 %v4140_v3, 16  ;;  %v4539_v41 = vld [vmem:[#allocation2 + $0x2c] ss:$0 sps:$4 sm:$0x11]  }
  0x7a   : > { %v1930_v36 = vsel %vm1284_vm9, %v1928_v24, %v1929_v25  ;;  %v1291_v38 = vrot.slane %v4129_v26, 1  ;;  %v1292_v40 = vrot.slane %v5124_v39, 1  ;;  %v1462_v21 = vshll.u32 %v4139_v28, 16  ;;  %v986_v32 = vld [vmem:[#allocation2 + $0x30] sm:$0xe] }
  0x7b   : > { %1707 = vrot.lane.b32.xlu1 %v4168_v18, %s4725_s12  ;;  %v1927_v18 = vsel %vm1284_vm9, %v1925_v63, %v1926_v0  ;;  %v1161_v29 = vsel %vm1113_vm10, %v1156_v22, %v1160_v23  ;;  %v985_v42 = vld [vmem:[#allocation2 + $0x24] sm:$0xe]  ;;  %v1472_v37 = vshrl.u32 %v4140_v3, 16  ;;  %v1296_v43 = vsel %vm1284_vm9, %v1294_v30, %v1295_v17  ;;  %v999_v47 = vld [vmem:[#allocation2 + $0x3c] sm:$0xf] }
  0x7c   : > { %1705 = vrot.lane.b32.xlu0 %v4167_v16, %s4725_s12  ;;  %v1149_v16 = vsel %vm1113_vm10, %v1144_v2, %v1148_v62  ;;  %v1476_v44 = vrot.slane %v1474_v34, 1  ;;  %v1479_v45 = vshll.u32 %v4538_v35, 16  ;;  %v1460_v46 = vshrl.u32 %v4139_v28, 16  ;;  %v5163_v39 = vld [vmem:[#allocation2 + $0x40] sm:$0xf] }
  0x7d   : > { %v1293_v49 = vsel %vm1284_vm9, %v1291_v38, %v1292_v40  ;;  %v1464_v50 = vrot.slane %v1462_v21, 1  ;;  %v1467_v51 = vshll.u32 %v4539_v41, 16  ;;  %v997_v52 = vld [vmem:[#allocation2 + $0x30] sm:$0xf]  ;;  %v5165_v53 = vld [vmem:[#allocation2 + $0x34] sm:$0xf]  ;;  %v4160_v54 = vcombine.low %v986_v32, %v960_v12 }
  0x7e   : > { %v4159_v55 = vcombine.low %v985_v42, %v958_v15  ;;  %v1477_v56 = vor.u32 %v1476_v44, %v1472_v37  ;;  %v1481_v57 = vrot.slane %v1479_v45, 1  ;;  %v4170_v58 = vcombine.low %v999_v47, %v5163_v39  ;;  %v920_v63 = vld [vmem:[#allocation2 + $0x30] sm:$0xf]  ;;  %v5171_v0 = vld [vmem:[#allocation2 + $0x34] sm:$0xf] }
  0x7f   : > { %1877 = vrot.lane.b32.xlu1 %v1778_v60, %s4726_s17  ;;  %v1465_v59 = vor.u32 %v1464_v50, %v1460_v46  ;;  %v1469_v60 = vrot.slane %v1467_v51, 1  ;;  %v4169_v62 = vcombine.low %v997_v52, %v5165_v53  ;;  %v5173_v2 = vld [vmem:[#allocation2 + $0x44] ss:$0 sps:$4 sm:$0x11]   ;;  %v1614_v5 = vrot.slane %v4160_v54, 1 }
  0x80   : > { %1875 = vrot.lane.b32.xlu0 %v1766_v10, %s4726_s17  ;;  %v1615_v6 = vrot.slane %v4538_v35, 1  ;;  %v1482_v7 = vsel %vm1113_vm10, %v1477_v56, %v1481_v57  ;;  %v1611_v8 = vrot.slane %v4159_v55, 1  ;;  %v1794_v9 = vshll.u32 %v4170_v58, 16  ;;  %v4545_v10 = vld [vmem:[#allocation2 + $0x38] ss:$0 sps:$4 sm:$0x11]  }
  0x81   : > { %v5179_v11 = vcombine.low %v920_v63, %v5171_v0  ;;  %v1470_v12 = vsel %vm1113_vm10, %v1465_v59, %v1469_v60  ;;  %v1612_v13 = vrot.slane %v4539_v41, 1  ;;  %v1782_v14 = vshll.u32 %v4169_v62, 16  ;;  %v922_v15 = vld [vmem:[#allocation2 + $0x3c] sm:$0xf]  ;;  %v1025_v17 = vld [vmem:[#allocation2 + $0x30] sm:$0xe] }
  0x82   : > { %v1616_v20 = vsel %vm1284_vm9, %v1614_v5, %v1615_v6  ;;  %v5185_v22 = vld [vmem:[#allocation2 + $0x38] ss:$0 sps:$4 sm:$0x11]   ;;  %v1792_v23 = vshrl.u32 %v4170_v58, 16  ;;  %v1787_v30 = vshll.u32 %v4545_v10, 16  ;;  %v4189_v42 = vcombine.low %v1025_v17, %v5165_v53 }
  0x83   : > { %1238 = vrot.lane.b32.xlu1 %v1149_v16, %s4722_s8  ;;  %v1799_v16 = vshll.u32 %v5173_v2, 16  ;;  %v1165_v24 = vshll.u32 %v5179_v11, 16  ;;  %v1613_v26 = vsel %vm1284_vm9, %v1611_v8, %v1612_v13  ;;  %v1026_v34 = vld [vmem:[#allocation2 + $0x3c] sm:$0xe]  ;;  %v1163_v40 = vshrl.u32 %v5179_v11, 16 }
  0x84   : > { %1955 = vrot.lane.b32.xlu0 %v1927_v18, %s4727_s10  ;;  %v923_v18 = vld [vmem:[#allocation2 + $0x40] sm:$0xf]  ;;  %v4549_v41 = vld [vmem:[#allocation2 + $0x44] ss:$0 sps:$4 sm:$0x11]   ;;  %v4190_v44 = vcombine.low %v1026_v34, %v5163_v39  ;;  %v1931_v56 = vrot.slane %v4189_v42, 1 }
  0x85   : > { %v5189_v25 = vcombine.low %v922_v15, %v923_v18  ;;  %v1801_v35 = vrot.slane %v1799_v16, 1  ;;  %v1167_v21 = vrot.slane %v1165_v24, 1  ;;  %v947_v47 = vld [vmem:[#allocation2 + $0x3c] sm:$0xe]  ;;  %v1182_v54 = vshll.u32 %v4549_v41, 16 }
  0x86   : > { %v964_v55 = vld [vmem:[#allocation2 + $0x4c] sm:$0xf]  ;;  %v1932_v57 = vrot.slane %v4545_v10, 1  ;;  %v946_v39 = vld [vmem:[#allocation2 + $0x30] sm:$0xe]  ;;  %v4132_v60 = vcombine.low %v947_v47, %v923_v18  ;;  %v1298_v24 = vrot.slane %v5185_v22, 1 }
  0x87   : > { %1240 = vrot.lane.b32.xlu1 %v1161_v29, %s4722_s8  ;;  %v1784_v29 = vrot.slane %v1782_v14, 1  ;;  %v1177_v32 = vshll.u32 %v5189_v25, 16  ;;  %v1175_v46 = vshrl.u32 %v5189_v25, 16  ;;  %v1168_v51 = vor.u32 %v1167_v21, %v1163_v40  ;;  %v961_v59 = vld [vmem:[#allocation2 + $0x3c] sm:$0xf] }
  0x88   : > { %1957 = vrot.lane.b32.xlu0 %v1930_v36, %s4727_s10  ;;  %v1170_v36 = vshll.u32 %v5185_v22, 16  ;;  %v1184_v6 = vrot.slane %v1182_v54, 1  ;;  %v1933_v8 = vsel %vm1284_vm9, %v1931_v56, %v1932_v57  ;;  %v4131_v10 = vcombine.low %v946_v39, %v5171_v0  ;;  %v4557_v16 = vld [vmem:[#allocation2 + $0x44] ss:$0 sps:$4 sm:$0x11]  }
  0x89   : > { %v1179_v52 = vrot.slane %v1177_v32, 1  ;;  %v1300_v13 = vrot.slane %v4132_v60, 1  ;;  %v1301_v14 = vrot.slane %v4549_v41, 1  ;;  %v988_v0 = vld [vmem:[#allocation2 + $0x48] sm:$0xe]  ;;  %v1491_v34 = vshll.u32 %v4557_v16, 16 }
  0x8a   : > { %v1172_v45 = vrot.slane %v1170_v36, 1  ;;  %v1001_v21 = vld [vmem:[#allocation2 + $0x48] sm:$0xf]  ;;  %v1002_v41 = vld [vmem:[#allocation2 + $0x4c] sm:$0xf]  ;;  %v4162_v32 = vcombine.low %v988_v0, %v964_v55  ;;  %vm6070_vm11 = vcmask 1041408  }
  0x8b   : > { %1321 = vrot.lane.b32.xlu1 %v1296_v43, %s4721_s25  ;;  %v1789_v43 = vrot.slane %v1787_v30, 1  ;;  %v1180_v5 = vor.u32 %v1179_v52, %v1175_v46  ;;  %v1302_v30 = vsel %vm1284_vm9, %v1300_v13, %v1301_v14  ;;  %v4171_v47 = vcombine.low %v1001_v21, %v1002_v41  ;;  %v4563_v57 = vld [vmem:[#allocation2 + $0x50] ss:$0 sps:$4 sm:$0x11]  }
  0x8c   : > { %1319 = vrot.lane.b32.xlu0 %v1293_v49, %s4721_s25  ;;  %v963_v49 = vld [vmem:[#allocation2 + $0x48] sm:$0xf]  ;;  %v1620_v52 = vrot.slane %v4162_v32, 1  ;;  %v4567_v0 = vld [vmem:[#allocation2 + $0x5c] ss:$0 sps:$4 sm:$0x11]  }
  0x8d   : > { %v4142_v63 = vcombine.low %v963_v49, %v964_v55  ;;  %v1185_v18 = vsel %vm1113_vm10, %v1180_v5, %v1184_v6  ;;  %v924_v49 = vld [vmem:[#allocation2 + $0x48] sm:$0xf]  ;;  %v1806_v60 = vshll.u32 %v4171_v47, 16  ;;  %v5235_v5 = vld [vmem:[#allocation2 + $0x58] sm:$0xf]  ;;  %vm1975_vm12 = vcmask 31744  }
  0x8e   : > { %v4596_v21 = vld [vmem:[%s6065_s3 + $0x10] ss:$0 sps:$4 sm:$0x33]   ;;  %vm1996_vm13 = vcmask 64512   ;;  %vm2017_vm14 = vcmask 97280   ;;  %vm2038_vm15 = vcmask 130048  }
  0x8f   : > { %1391 = vrot.lane.b32.xlu1 %v4140_v3, %s4720_s23  ;;  %v1796_v3 = vrot.slane %v1794_v9, 1  ;;  %v1935_v9 = vrot.slane %v5173_v2, 1  ;;  %v1498_v15 = vshll.u32 %v4142_v63, 16  ;;  %4456 = vmatprep.subr.msk.bf16.mxu0 %vm6070_vm11, %v4596_v21  ;;  %vm2059_vm1 = vcmask 162816  }
  0x90   : > { %1389 = vrot.lane.b32.xlu0 %v4139_v28, %s4720_s23  ;;  %v1780_v28 = vshrl.u32 %v4169_v62, 16  ;;  %vm2080_vm3 = vcmask 195584   ;;  %vm2101_vm5 = vcmask 228352   ;;  %vm2170_vm0 = vcmask 293888  }
  0x91   : > { %v1797_v38 = vor.u32 %v1796_v3, %v1792_v23  ;;  %v1297_v3 = vrot.slane %v4131_v10, 1  ;;  %v4728_v61 = vmov (!%p4105_p11), 0  }
  0x92   : > { %v1785_v37 = vor.u32 %v1784_v29, %v1780_v28  ;;  %v1500_v28 = vrot.slane %v1498_v15, 1  ;;  %v1003_v29 = vld [vmem:[#allocation2 + $0x54] sm:$0xf]  ;;  %v1804_v15 = vshrl.u32 %v4171_v47, 16 }
  0x93   : > { %1561 = vrot.lane.b32.xlu1 %v1482_v7, %s4723_s13  ;;  %v1802_v50 = vsel %vm1113_vm10, %v1797_v38, %v1801_v35  ;;  %v1934_v7 = vrot.slane %v4190_v44, 1  ;;  %v5218_v35 = vld [vmem:[#allocation2 + $0x58] sm:$0xf]  ;;  %v1299_v36 = vsel %vm1284_vm9, %v1297_v3, %v1298_v24  ;;  %v987_v38 = vld [vmem:[#allocation2 + $0x3c] sm:$0xe] }
  0x94   : > { %1559 = vrot.lane.b32.xlu0 %v1470_v12, %s4723_s13  ;;  %v1790_v53 = vsel %vm1113_vm10, %v1785_v37, %v1789_v43  ;;  %v4172_v42 = vcombine.low %v1003_v29, %v5218_v35 }
  0x95   : > { %v1936_v23 = vsel %vm1284_vm9, %v1934_v7, %v1935_v9  ;;  %v5238_v7 = vld [vmem:[#allocation2 + $0x50] ss:$0 sps:$4 sm:$0x11]  }
  0x96   : > { %v1818_v55 = vshll.u32 %v4172_v42, 16  ;;  %v1194_v3 = vshll.u32 %v5238_v7, 16 }
  0x97   : > { %1641 = vrot.lane.b32.xlu1 %v1616_v20, %s4724_s16  ;;  %v4556_v20 = vld [vmem:[#allocation2 + $0x50] ss:$0 sps:$4 sm:$0x11]  }
  0x98   : > { %1639 = vrot.lane.b32.xlu0 %v1613_v26, %s4724_s16  ;;  %v1496_v26 = vshrl.u32 %v4142_v63, 16  ;;  %v1503_v17 = vshll.u32 %v4556_v20, 16  ;;  %v1621_v54 = vrot.slane %v4556_v20, 1  ;;  %v1820_v9 = vrot.slane %v1818_v55, 1 }
  0x99   : > { %v1811_v20 = vshll.u32 %v4563_v57, 16 }
  0x9a   : > { %v1501_v43 = vor.u32 %v1500_v28, %v1496_v26  ;;  %v1505_v44 = vrot.slane %v1503_v17, 1  ;;  %v1622_v10 = vsel %vm1284_vm9, %v1620_v52, %v1621_v54  ;;  %v1028_v17 = vld [vmem:[#allocation2 + $0x54] sm:$0xe]  ;;  %v966_v54 = vld [vmem:[#allocation2 + $0x58] sm:$0xf] }
  0x9b   : > { %1711 = vrot.lane.b32.xlu1 %v4170_v58, %s4725_s12  ;;  %v962_v58 = vld [vmem:[#allocation2 + $0x40] sm:$0xf]  ;;  %v965_v52 = vld [vmem:[#allocation2 + $0x54] sm:$0xf] }
  0x9c   : > { %1709 = vrot.lane.b32.xlu0 %v4169_v62, %s4725_s12  ;;  %v1173_v62 = vsel %vm1113_vm10, %v1168_v51, %v1172_v45  ;;  %v4141_v12 = vcombine.low %v961_v59, %v962_v58  ;;  %v4161_v37 = vcombine.low %v987_v38, %v962_v58  ;;  %v1493_v45 = vrot.slane %v1491_v34, 1  ;;  %v5226_v51 = vld [vmem:[#allocation2 + $0x5c] ss:$0 sps:$4 sm:$0x11]  }
  0x9d   : > { %v1618_v58 = vrot.slane %v4557_v16, 1  ;;  %v1823_v6 = vshll.u32 %v5226_v51, 16  ;;  %v1196_v34 = vrot.slane %v1194_v3, 1  ;;  %v1938_v38 = vrot.slane %v4563_v57, 1 }
  0x9e   : > { %v1486_v2 = vshll.u32 %v4141_v12, 16  ;;  %v1484_v40 = vshrl.u32 %v4141_v12, 16  ;;  %v1617_v56 = vrot.slane %v4161_v37, 1  ;;  %v1206_v37 = vshll.u32 %v4567_v0, 16 }
  0x9f   : > { %1881 = vrot.lane.b32.xlu1 %v1802_v50, %s4726_s17  ;;  %v5224_v50 = vld [vmem:[#allocation2 + $0x4c] sm:$0xf] }
  0xa0   : > { %1879 = vrot.lane.b32.xlu0 %v1790_v53, %s4726_s17  ;;  %v1488_v22 = vrot.slane %v1486_v2, 1  ;;  %v1506_v53 = vsel %vm1113_vm10, %v1501_v43, %v1505_v44  ;;  %v5232_v39 = vcombine.low %v924_v49, %v5224_v50  ;;  %v1619_v14 = vsel %vm1284_vm9, %v1617_v56, %v1618_v58  ;;  %v949_v43 = vld [vmem:[#allocation2 + $0x54] sm:$0xe]  ;;  %v948_v49 = vld [vmem:[#allocation2 + $0x48] sm:$0xe] }
  0xa1   : > { %v4192_v44 = vcombine.low %v1028_v17, %v5218_v35  ;;  %v4134_v55 = vcombine.low %v949_v43, %v5235_v5  ;;  %v1208_v57 = vrot.slane %v1206_v37, 1  ;;  %v1006_v17 = vld [vmem:[#allocation2 + $0x64] sm:$0xf]  ;;  %v928_v37 = vld [vmem:[#allocation2 + $0x60] sm:$0xf] }
  0xa2   : > { %v1489_v46 = vor.u32 %v1488_v22, %v1484_v40  ;;  %v1187_v2 = vshrl.u32 %v5232_v39, 16  ;;  %v5285_v43 = vld [vmem:[#allocation2 + $0x64] sm:$0xf] }
  0xa3   : > { %1242 = vrot.lane.b32.xlu1 %v1173_v62, %s4722_s8  ;;  %v926_v62 = vld [vmem:[#allocation2 + $0x54] sm:$0xf]  ;;  %v1940_v58 = vrot.slane %v4192_v44, 1 }
  0xa4   : > { %1959 = vrot.lane.b32.xlu0 %v1933_v8, %s4727_s10  ;;  %v1494_v59 = vsel %vm1113_vm10, %v1489_v46, %v1493_v45  ;;  %v1816_v8 = vshrl.u32 %v4172_v42, 16  ;;  %v5245_v13 = vcombine.low %v926_v62, %v5235_v5  ;;  %v968_v46 = vld [vmem:[#allocation2 + $0x64] sm:$0xf]  ;;  %v4133_v62 = vcombine.low %v948_v49, %v5224_v50  ;;  %v990_v50 = vld [vmem:[#allocation2 + $0x60] sm:$0xe] }
  0xa6   : > { %v1821_v24 = vor.u32 %v1820_v9, %v1816_v8  ;;  %v1201_v28 = vshll.u32 %v5245_v13, 16  ;;  %v1199_v22 = vshrl.u32 %v5245_v13, 16  ;;  %v1307_v8 = vrot.slane %v4567_v0, 1 }
  0xa7   : > { %1244 = vrot.lane.b32.xlu1 %v1185_v18, %s4722_s8  ;;  %v1808_v18 = vrot.slane %v1806_v60, 1  ;;  %v1941_v60 = vrot.slane %v5226_v51, 1  ;;  %v4575_v51 = vld [vmem:[#allocation2 + $0x5c] ss:$0 sps:$4 sm:$0x11]  }
  0xa8   : > { %1961 = vrot.lane.b32.xlu0 %v1936_v23, %s4727_s10  ;;  %v1825_v23 = vrot.slane %v1823_v6, 1  ;;  %v1203_v32 = vrot.slane %v1201_v28, 1  ;;  %v1306_v6 = vrot.slane %v4134_v55, 1 }
  0xa9   : > { %v1809_v29 = vor.u32 %v1808_v18, %v1804_v15  ;;  %v1304_v15 = vrot.slane %v5238_v7, 1 }
  0xaa   : > { %v1826_v40 = vsel %vm1113_vm10, %v1821_v24, %v1825_v23  ;;  %v1204_v56 = vor.u32 %v1203_v32, %v1199_v22 }
  0xab   : > { %1325 = vrot.lane.b32.xlu1 %v1302_v30, %s4721_s25  ;;  %v1813_v30 = vrot.slane %v1811_v20, 1  ;;  %v1007_v20 = vld [vmem:[#allocation2 + $0x6c] sm:$0xf] }
  0xac   : > { %1323 = vrot.lane.b32.xlu0 %v1299_v36, %s4721_s25  ;;  %v1209_v5 = vsel %vm1113_vm10, %v1204_v56, %v1208_v57  ;;  %v930_v56 = vld [vmem:[#allocation2 + $0x6c] sm:$0xf]  ;;  %v5296_v57 = vld [vmem:[#allocation2 + $0x70] sm:$0xf] }
  0xad   : > { %v1814_v45 = vsel %vm1113_vm10, %v1809_v29, %v1813_v30  ;;  %v1515_v29 = vshll.u32 %v4575_v51, 16  ;;  %v1005_v30 = vld [vmem:[#allocation2 + $0x60] sm:$0xf] }
  0xae   : > { %v4173_v32 = vcombine.low %v1005_v30, %v1006_v17 }
  0xaf   : > { %1395 = vrot.lane.b32.xlu1 %v4142_v63, %s4720_s23  ;;  %v1027_v63 = vld [vmem:[#allocation2 + $0x48] sm:$0xe] }
  0xb0   : > { %1393 = vrot.lane.b32.xlu0 %v4141_v12, %s4720_s23  ;;  %v1189_v12 = vshll.u32 %v5232_v39, 16  ;;  %v4191_v16 = vcombine.low %v1027_v63, %v1002_v41  ;;  %v4143_v63 = vcombine.low %v965_v52, %v966_v54 }
  0xb2   : > { %v1191_v26 = vrot.slane %v1189_v12, 1  ;;  %v1937_v36 = vrot.slane %v4191_v16, 1  ;;  %v1942_v12 = vsel %vm1284_vm9, %v1940_v58, %v1941_v60  ;;  %v1510_v18 = vshll.u32 %v4143_v63, 16 }
  0xb3   : > { %1565 = vrot.lane.b32.xlu1 %v1506_v53, %s4723_s13  ;;  %v2193_v53 = vsel %vm6070_vm11, %v4596_v21, 0  ;;  %v1308_v16 = vsel %vm1284_vm9, %v1306_v6, %v1307_v8  ;;  %v1508_v28 = vshrl.u32 %v4143_v63, 16  ;;  %v5306_v8 = vcombine.low %v930_v56, %v5296_v57 }
  0xb4   : > { %1563 = vrot.lane.b32.xlu0 %v1494_v59, %s4723_s13  ;;  %v1192_v41 = vor.u32 %v1191_v26, %v1187_v2  ;;  %4413 = vmatpush3.bf16.msra.mxu0 %v2193_v53  ;;  %v5279_v2 = vld [vmem:[#allocation2 + $0x70] sm:$0xf]  ;;  %v989_v26 = vld [vmem:[#allocation2 + $0x54] sm:$0xe]  ;;  %v1512_v7 = vrot.slane %v1510_v18, 1  ;;  %v1624_v53 = vrot.slane %v4575_v51, 1 }
  0xb5   : > { %vm2122_vm11 = vcmask 261120  }
  0xb6   : > { %v1197_v35 = vsel %vm1113_vm10, %v1192_v41, %v1196_v34  ;;  %v4164_v34 = vcombine.low %v990_v50, %v968_v46  ;;  %v1513_v21 = vor.u32 %v1512_v7, %v1508_v28  ;;  %v1517_v41 = vrot.slane %v1515_v29, 1  ;;  %v1030_v7 = vld [vmem:[#allocation2 + $0x6c] sm:$0xe] }
  0xb7   : > { %1645 = vrot.lane.b32.xlu1 %v1622_v10, %s4724_s16  ;;  %v4574_v10 = vld [vmem:[#allocation2 + $0x68] ss:$0 sps:$4 sm:$0x11]  }
  0xb8   : > { %1643 = vrot.lane.b32.xlu0 %v1619_v14, %s4724_s16  ;;  %v1303_v14 = vrot.slane %v4133_v62, 1  ;;  %v1527_v24 = vshll.u32 %v4574_v10, 16  ;;  %v1626_v44 = vrot.slane %v4164_v34, 1  ;;  %v1627_v49 = vrot.slane %v4574_v10, 1 }
  0xb9   : > { %v1518_v55 = vsel %vm1113_vm10, %v1513_v21, %v1517_v41  ;;  %v5300_v62 = vld [vmem:[#allocation2 + $0x68] ss:$0 sps:$4 sm:$0x11]   ;;  %v1828_v10 = vshrl.u32 %v4173_v32, 16  ;;  %v951_v41 = vld [vmem:[#allocation2 + $0x6c] sm:$0xe] }
  0xba   : > { %v1305_v0 = vsel %vm1284_vm9, %v1303_v14, %v1304_v15  ;;  %v1529_v22 = vrot.slane %v1527_v24, 1  ;;  %v1218_v50 = vshll.u32 %v5300_v62, 16  ;;  %v1225_v24 = vshll.u32 %v5306_v8, 16 }
  0xbb   : > { %1715 = vrot.lane.b32.xlu1 %v4172_v42, %s4725_s12  ;;  %v967_v42 = vld [vmem:[#allocation2 + $0x60] sm:$0xf] }
  0xbc   : > { %1713 = vrot.lane.b32.xlu0 %v4171_v47, %s4725_s12  ;;  %v1939_v47 = vsel %vm1284_vm9, %v1937_v36, %v1938_v38  ;;  %v4144_v59 = vcombine.low %v967_v42, %v968_v46  ;;  %v4174_v36 = vcombine.low %v1007_v20, %v5279_v2  ;;  %v4163_v38 = vcombine.low %v989_v26, %v966_v54  ;;  %v5288_v42 = vld [vmem:[#allocation2 + $0x74] ss:$0 sps:$4 sm:$0x11]   ;;  %v4581_v54 = vld [vmem:[#allocation2 + $0x68] ss:$0 sps:$4 sm:$0x11]  }
  0xbd   : > { %v1847_v60 = vshll.u32 %v5288_v42, 16  ;;  %v1835_v14 = vshll.u32 %v4581_v54, 16  ;;  %v1220_v30 = vrot.slane %v1218_v50, 1  ;;  %v1944_v34 = vrot.slane %v4581_v54, 1  ;;  %v969_v54 = vld [vmem:[#allocation2 + $0x6c] sm:$0xf] }
  0xbe   : > { %v1522_v9 = vshll.u32 %v4144_v59, 16  ;;  %v1520_v23 = vshrl.u32 %v4144_v59, 16  ;;  %v1623_v52 = vrot.slane %v4163_v38, 1 }
  0xbf   : > { %1885 = vrot.lane.b32.xlu1 %v1826_v40, %s4726_s17  ;;  %v1849_v51 = vrot.slane %v1847_v60, 1  ;;  %v1837_v28 = vrot.slane %v1835_v14, 1 }
  0xc0   : > { %1883 = vrot.lane.b32.xlu0 %v1814_v45, %s4726_s17  ;;  %v1524_v3 = vrot.slane %v1522_v9, 1  ;;  %v1842_v45 = vshll.u32 %v4174_v36, 16  ;;  %v1625_v9 = vsel %vm1284_vm9, %v1623_v52, %v1624_v53  ;;  %v950_v52 = vld [vmem:[#allocation2 + $0x60] sm:$0xe]  ;;  %v4136_v53 = vcombine.low %v951_v41, %v5296_v57 }
  0xc2   : > { %v1525_v40 = vor.u32 %v1524_v3, %v1520_v23  ;;  %v1844_v58 = vrot.slane %v1842_v45, 1  ;;  %v4585_v3 = vld [vmem:[#allocation2 + $0x74] ss:$0 sps:$4 sm:$0x11]   ;;  %v1312_v57 = vrot.slane %v4136_v53, 1 }
  0xc3   : > { %1246 = vrot.lane.b32.xlu1 %v1197_v35, %s4722_s8  ;;  %v1830_v35 = vshll.u32 %v4173_v32, 16  ;;  %v1230_v21 = vshll.u32 %v4585_v3, 16 }
  0xc4   : > { %1963 = vrot.lane.b32.xlu0 %v1939_v47, %s4727_s10  ;;  %v1530_v46 = vsel %vm1113_vm10, %v1525_v40, %v1529_v22  ;;  %v5293_v47 = vcombine.low %v928_v37, %v5285_v43  ;;  %v1223_v40 = vshrl.u32 %v5306_v8, 16  ;;  %v1227_v22 = vrot.slane %v1225_v24, 1  ;;  %v992_v24 = vld [vmem:[#allocation2 + $0x78] sm:$0xe] }
  0xc5   : > { %v4194_v37 = vcombine.low %v1030_v7, %v5279_v2  ;;  %v1232_v56 = vrot.slane %v1230_v21, 1 }
  0xc6   : > { %v1213_v6 = vshll.u32 %v5293_v47, 16 }
  0xc7   : > { %1248 = vrot.lane.b32.xlu1 %v1209_v5, %s4722_s8  ;;  %v1029_v5 = vld [vmem:[#allocation2 + $0x60] sm:$0xe]  ;;  %v1946_v60 = vrot.slane %v4194_v37, 1  ;;  %v1009_v37 = vld [vmem:[#allocation2 + $0x78] sm:$0xf] }
  0xc8   : > { %1965 = vrot.lane.b32.xlu0 %v1942_v12, %s4727_s10  ;;  %v1832_v12 = vrot.slane %v1830_v35, 1  ;;  %v4193_v15 = vcombine.low %v1029_v5, %v1006_v17  ;;  %v1215_v23 = vrot.slane %v1213_v6, 1  ;;  %v1228_v35 = vor.u32 %v1227_v22, %v1223_v40  ;;  %v1011_v40 = vld [vmem:[#allocation2 + $0x84] sm:$0xf]  ;;  %v5360_v22 = vld [vmem:[#allocation2 + $0x88] sm:$0xf] }
  0xc9   : > { %v4135_v5 = vcombine.low %v950_v52, %v5285_v43  ;;  %v1310_v43 = vrot.slane %v5300_v62, 1  ;;  %v5371_v53 = vcombine.low %v1011_v40, %v5360_v22 }
  0xca   : > { %v1833_v26 = vor.u32 %v1832_v12, %v1828_v10  ;;  %v1943_v17 = vrot.slane %v4193_v15, 1  ;;  %v1313_v10 = vrot.slane %v4585_v3, 1  ;;  %v1233_v12 = vsel %vm1113_vm10, %v1228_v35, %v1232_v56  ;;  %v5344_v15 = vld [vmem:[#allocation2 + $0x80] ss:$0 sps:$4 sm:$0x11]  }
  0xcb   : > { %1329 = vrot.lane.b32.xlu1 %v1308_v16, %s4721_s25  ;;  %v1211_v16 = vshrl.u32 %v5293_v47, 16 }
  0xcc   : > { %1327 = vrot.lane.b32.xlu0 %v1305_v0, %s4721_s25  ;;  %v1838_v45 = vsel %vm1113_vm10, %v1833_v26, %v1837_v28  ;;  %v1314_v3 = vsel %vm1284_vm9, %v1312_v57, %v1313_v10  ;;  %v991_v26 = vld [vmem:[#allocation2 + $0x6c] sm:$0xe] }
  0xcd   : > { %v1216_v38 = vor.u32 %v1215_v23, %v1211_v16  ;;  %v5350_v16 = vld [vmem:[#allocation2 + $0x74] ss:$0 sps:$4 sm:$0x11]  }
  0xce   : > { %v1630_v57 = vrot.slane %v5350_v16, 1 }
  0xcf   : > { %1399 = vrot.lane.b32.xlu1 %v4144_v59, %s4720_s23  ;;  %v1840_v59 = vshrl.u32 %v4174_v36, 16  ;;  %v1221_v2 = vsel %vm1113_vm10, %v1216_v38, %v1220_v30  ;;  %v1539_v38 = vshll.u32 %v5350_v16, 16 }
  0xd0   : > { %1397 = vrot.lane.b32.xlu0 %v4143_v63, %s4720_s23  ;;  %v1628_v63 = vsel %vm1284_vm9, %v1626_v44, %v1627_v49 }
  0xd1   : > { %v1845_v18 = vor.u32 %v1844_v58, %v1840_v59  ;;  %v1541_v35 = vrot.slane %v1539_v38, 1  ;;  %v1031_v38 = vld [vmem:[#allocation2 + $0x78] sm:$0xe] }
  0xd3   : > { %1569 = vrot.lane.b32.xlu1 %v1530_v46, %s4723_s13  ;;  %v1850_v29 = vsel %vm1113_vm10, %v1845_v18, %v1849_v51  ;;  %v5326_v46 = vld [vmem:[#allocation2 + $0x7c] sm:$0xf]  ;;  %v1309_v51 = vrot.slane %v4135_v5, 1 }
  0xd4   : > { %1567 = vrot.lane.b32.xlu0 %v1518_v55, %s4723_s13  ;;  %v5328_v55 = vld [vmem:[#allocation2 + $0x70] sm:$0xf]  ;;  %v4166_v41 = vcombine.low %v992_v24, %v5326_v46 }
  0xd5   : > { %v5312_v20 = vpop.permute.xlu0 %1385  ;;  %v4145_v6 = vcombine.low %v969_v54, %v5328_v55  ;;  %v1311_v62 = vsel %vm1284_vm9, %v1309_v51, %v1310_v43 }
  0xd7   : > { %1649 = vrot.lane.b32.xlu1 %v1628_v63, %s4724_s16  ;;  %v1947_v63 = vrot.slane %v5288_v42, 1  ;;  %v1534_v50 = vshll.u32 %v4145_v6, 16  ;;  %v1532_v30 = vshrl.u32 %v4145_v6, 16 }
  0xd8   : > { %1647 = vrot.lane.b32.xlu0 %v1625_v9, %s4724_s16 }
  0xd9   : > { %v5316_v0 = vpop.permute.xlu1 %1315  ;;  %v1948_v42 = vsel %vm1284_vm9, %v1946_v60, %v1947_v63  ;;  %v1632_v63 = vrot.slane %v4166_v41, 1 }
  0xdb   : > { %1719 = vrot.lane.b32.xlu1 %v4174_v36, %s4725_s12  ;;  %v971_v36 = vld [vmem:[#allocation2 + $0x78] sm:$0xf] }
  0xdc   : > { %1717 = vrot.lane.b32.xlu0 %v4173_v32, %s4725_s12  ;;  %v1945_v32 = vsel %vm1284_vm9, %v1943_v17, %v1944_v34  ;;  %v4146_v59 = vcombine.low %v971_v36, %v5326_v46  ;;  %v1536_v34 = vrot.slane %v1534_v50, 1  ;;  %v4165_v36 = vcombine.low %v991_v26, %v5328_v55 }
  0xdd   : > { %v5323_v44 = vpop.permute.xlu1 %1317  ;;  %v1864_v50 = vshrl.u32 %v5371_v53, 16 }
  0xde   : > { %v1235_v49 = vpop.permute.xlu0 %1234  ;;  %v1546_v14 = vshll.u32 %v4146_v59, 16  ;;  %v1544_v28 = vshrl.u32 %v4146_v59, 16  ;;  %v1537_v46 = vor.u32 %v1536_v34, %v1532_v30  ;;  %v1629_v5 = vrot.slane %v4165_v36, 1 }
  0xdf   : > { %1889 = vrot.lane.b32.xlu1 %v1850_v29, %s4726_s17  ;;  %v1551_v29 = vshll.u32 %v5344_v15, 16  ;;  %v1977_v52 = vsel %vm1975_vm12, %v5085_v27, %v1235_v49  ;;  %v1633_v27 = vrot.slane %v5344_v15, 1  ;;  %v4602_v15 = vld [vmem:[#allocation2 + $0x80] ss:$0 sps:$4 sm:$0x11]  }
  0xe0   : > { %1887 = vrot.lane.b32.xlu0 %v1838_v45, %s4726_s17  ;;  %v1548_v7 = vrot.slane %v1546_v14, 1  ;;  %v5363_v45 = vld [vmem:[#allocation2 + $0x7c] sm:$0xf]  ;;  %v1998_v49 = vsel %vm1996_vm13, %v1977_v52, %v5316_v0  ;;  %v1859_v30 = vshll.u32 %v4602_v15, 16 }
  0xe1   : > { %v5336_v58 = vpop.permute.xlu1 %1387  ;;  %v5374_v56 = vcombine.low %v1009_v37, %v5363_v45  ;;  %v1634_v51 = vsel %vm1284_vm9, %v1632_v63, %v1633_v27 }
  0xe2   : > { %v1237_v9 = vpop.permute.xlu0 %1236  ;;  %v1549_v54 = vor.u32 %v1548_v7, %v1544_v28  ;;  %v1032_v28 = vld [vmem:[#allocation2 + $0x84] sm:$0xe] }
  0xe3   : > { %1250 = vrot.lane.b32.xlu1 %v1221_v2, %s4722_s8  ;;  %v1979_v60 = vsel %vm1975_vm12, %v5087_v33, %v1237_v9  ;;  %v1866_v33 = vshll.u32 %v5371_v53, 16  ;;  %v5386_v9 = vld [vmem:[#allocation2 + $0x8c] ss:$0 sps:$4 sm:$0x11]   ;;  %v1854_v14 = vshll.u32 %v5374_v56, 16  ;;  %v1852_v7 = vshrl.u32 %v5374_v56, 16 }
  0xe4   : > { %1967 = vrot.lane.b32.xlu0 %v1945_v32, %s4727_s10  ;;  %v1553_v32 = vrot.slane %v1551_v29, 1  ;;  %v1871_v24 = vshll.u32 %v5386_v9, 16  ;;  %v4196_v41 = vcombine.low %v1032_v28, %v5360_v22 }
  0xe5   : > { %v5346_v18 = vpop.permute.xlu1 %1557  ;;  %v1856_v29 = vrot.slane %v1854_v14, 1 }
  0xe6   : > { %v1556_v23 = vpop.permute.xlu0 %1555  ;;  %v1554_v10 = vsel %vm1113_vm10, %v1549_v54, %v1553_v32  ;;  %v1873_v36 = vrot.slane %v1871_v24, 1 }
  0xe7   : > { %1252 = vrot.lane.b32.xlu1 %v1233_v12, %s4722_s8  ;;  %v2000_v12 = vsel %vm1996_vm13, %v1979_v60, %v5323_v44  ;;  %v1631_v44 = vsel %vm1284_vm9, %v1629_v5, %v1630_v57  ;;  %v1857_v32 = vor.u32 %v1856_v29, %v1852_v7 }
  0xe8   : > { %1969 = vrot.lane.b32.xlu0 %v1948_v42, %s4727_s10  ;;  %v2019_v42 = vsel %vm2017_vm14, %v1998_v49, %v5312_v20  ;;  %v2021_v16 = vsel %vm2017_vm14, %v2000_v12, %v5336_v58  ;;  %v1868_v20 = vrot.slane %v1866_v33, 1  ;;  %v1950_v49 = vrot.slane %v4602_v15, 1 }
  0xe9   : > { %v5356_v17 = vpop.permute.xlu1 %1637  ;;  %v2040_v43 = vsel %vm2038_vm15, %v2019_v42, %v1556_v23  ;;  %v2042_v58 = vsel %vm2038_vm15, %v2021_v16, %v5346_v18  ;;  %v4195_v18 = vcombine.low %v1031_v38, %v5363_v45  ;;  %v1953_v45 = vrot.slane %v5386_v9, 1 }
  0xea   : > { %v1636_v21 = vpop.permute.xlu0 %1635  ;;  %v1869_v37 = vor.u32 %v1868_v20, %v1864_v50 }
  0xeb   : > { %1333 = vrot.lane.b32.xlu1 %v1314_v3, %s4721_s25  ;;  %v2061_v3 = vsel %vm2059_vm1, %v2040_v43, %v1636_v21  ;;  %v2063_v21 = vsel %vm2059_vm1, %v2042_v58, %v5356_v17  ;;  %v1949_v27 = vrot.slane %v4195_v18, 1 }
  0xec   : > { %1331 = vrot.lane.b32.xlu0 %v1311_v62, %s4721_s25  ;;  %v1874_v22 = vsel %vm1113_vm10, %v1869_v37, %v1873_v36 }
  0xed   : > { %v1708_v2 = vpop.permute.xlu1 %1707  ;;  %v1951_v57 = vsel %vm1284_vm9, %v1949_v27, %v1950_v49 }
  0xee   : > { %v1706_v55 = vpop.permute.xlu0 %1705  ;;  %v2084_v52 = vsel %vm2080_vm3, %v2063_v21, %v1708_v2  ;;  %v1952_v2 = vrot.slane %v4196_v41, 1 }
  0xef   : > { %1403 = vrot.lane.b32.xlu1 %v4146_v59, %s4720_s23  ;;  %v1542_v59 = vsel %vm1113_vm10, %v1537_v46, %v1541_v35  ;;  %v2082_v26 = vsel %vm2080_vm3, %v2061_v3, %v1706_v55  ;;  %v1861_v46 = vrot.slane %v1859_v30, 1 }
  0xf0   : > { %1401 = vrot.lane.b32.xlu0 %v4145_v6, %s4720_s23 }
  0xf1   : > { %v1878_v0 = vpop.permute.xlu1 %1877  ;;  %v1862_v63 = vsel %vm1113_vm10, %v1857_v32, %v1861_v46 }
  0xf2   : > { %v1876_v6 = vpop.permute.xlu0 %1875  ;;  %v2105_v35 = vsel %vm2101_vm5, %v2084_v52, %v1878_v0 }
  0xf3   : > { %1573 = vrot.lane.b32.xlu1 %v1554_v10, %s4723_s13  ;;  %v2103_v62 = vsel %vm2101_vm5, %v2082_v26, %v1876_v6 }
  0xf4   : > { %1571 = vrot.lane.b32.xlu0 %v1542_v59, %s4723_s13 }
  0xf5   : > { %v1239_v23 = vpop.permute.xlu1 %1238 }
  0xf6   : > { %v1956_v34 = vpop.permute.xlu0 %1955  ;;  %v1981_v15 = vsel %vm1975_vm12, %v5117_v31, %v1239_v23 }
  0xf7   : > { %1653 = vrot.lane.b32.xlu1 %v1634_v51, %s4724_s16  ;;  %v2124_v40 = vsel %vm2122_vm11, %v2103_v62, %v1956_v34 }
  0xf8   : > { %1651 = vrot.lane.b32.xlu0 %v1631_v44, %s4724_s16  ;;  %4414 = vmatprep.mubr.msk.bf16.mxu0 %vm2170_vm0, %v2124_v40 }
  0xf9   : > { %v1241_v54 = vpop.permute.xlu1 %1240 }
  0xfa   : > { %v1958_v60 = vpop.permute.xlu0 %1957  ;;  %v1983_v50 = vsel %vm1975_vm12, %v5134_v48, %v1241_v54 }
  0xfb   : > { %v2126_v17 = vsel %vm2122_vm11, %v2105_v35, %v1958_v60  ;;  %1723 = vrot.lane.b32.xlu1 %v5371_v53, %s4725_s12  ;;  %v1954_v53 = vsel %vm1284_vm9, %v1952_v2, %v1953_v45 }
  0xfc   : > { %1721 = vrot.lane.b32.xlu0 %v5374_v56, %s4725_s12  ;;  %4415 = vmatmul.mubr.msk.bf16.vlgmr.msra.gmra.mrb[0].mxu0 %vm2170_vm0, %v2126_v17 }
  0xfd   : > { %v1322_v55 = vpop.permute.xlu1 %1321 }
  0xfe   : > { %v1320_v5 = vpop.permute.xlu0 %1319  ;;  %v2004_v3 = vsel %vm1996_vm13, %v1983_v50, %v1322_v55 }
  0xff   : > { %1893 = vrot.lane.b32.xlu1 %v1874_v22, %s4726_s17  ;;  %v2002_v42 = vsel %vm1996_vm13, %v1981_v15, %v1320_v5 }
 0x100   : > { %1891 = vrot.lane.b32.xlu0 %v1862_v63, %s4726_s17 }
 0x101   : > { %v1392_v56 = vpop.permute.xlu1 %1391 }
 0x102   : > { %v1390_v10 = vpop.permute.xlu0 %1389  ;;  %v2025_v31 = vsel %vm2017_vm14, %v2004_v3, %v1392_v56 }
 0x103   : > { %1973 = vrot.lane.b32.xlu1 %v1954_v53, %s4727_s10  ;;  %v2023_v51 = vsel %vm2017_vm14, %v2002_v42, %v1390_v10 }
 0x104   : > { %1971 = vrot.lane.b32.xlu0 %v1951_v57, %s4727_s10 }
 0x105   : > { %v1562_v33 = vpop.permute.xlu1 %1561 }
 0x106   : > { %v1560_v9 = vpop.permute.xlu0 %1559  ;;  %v2046_v28 = vsel %vm2038_vm15, %v2025_v31, %v1562_v33 }
 0x107   : > { %v2044_v44 = vsel %vm2038_vm15, %v2023_v51, %v1560_v9 }
 0x109   : > { %v1642_v12 = vpop.permute.xlu1 %1641 }
 0x10a   : > { %v1640_v0 = vpop.permute.xlu0 %1639  ;;  %v2067_v29 = vsel %vm2059_vm1, %v2046_v28, %v1642_v12 }
 0x10b   : > { %v2065_v16 = vsel %vm2059_vm1, %v2044_v44, %v1640_v0 }
 0x10d   : > { %v1712_v59 = vpop.permute.xlu1 %1711 }
 0x10e   : > { %v1710_v14 = vpop.permute.xlu0 %1709  ;;  %v2088_v48 = vsel %vm2080_vm3, %v2067_v29, %v1712_v59  ;;  %v2328_v29 = vld [vmem:[#allocation3] sm:$0x1] }
 0x10f   : > { %v2086_v20 = vsel %vm2080_vm3, %v2065_v16, %v1710_v14 }
 0x111   : > { %v1882_v6 = vpop.permute.xlu1 %1881 }
 0x112   : > { %v1880_v43 = vpop.permute.xlu0 %1879  ;;  %v2109_v62 = vsel %vm2101_vm5, %v2088_v48, %v1882_v6 }
 0x113   : > { %v2107_v26 = vsel %vm2101_vm5, %v2086_v20, %v1880_v43 }
 0x115   : > { %v1243_v24 = vpop.permute.xlu1 %1242 }
 0x116   : > { %v1960_v23 = vpop.permute.xlu0 %1959  ;;  %v1985_v46 = vsel %vm1975_vm12, %v5179_v11, %v1243_v24 }
 0x117   : > { %v2128_v7 = vsel %vm2122_vm11, %v2107_v26, %v1960_v23  ;;  %v2331_v23 = vld [vmem:[#allocation3 + $0xc] sm:$0x1] }
 0x118   : > { %4418 = vmatprep.mubr.msk.bf16.mxu0 %vm2170_vm0, %v2128_v7  ;;  %v2332_v7 = vsel %vm4806_vm2, 0, %v2331_v23 }
 0x119   : > { %v1245_v30 = vpop.permute.xlu1 %1244  ;;  %2333 = vst [vmem:[#allocation3 + $0xc] sm:$0x1] %v2332_v7 }
 0x11a   : > { %v1962_v34 = vpop.permute.xlu0 %1961  ;;  %v1987_v45 = vsel %vm1975_vm12, %v5189_v25, %v1245_v30 }
 0x11b   : > { %v2130_v38 = vsel %vm2122_vm11, %v2109_v62, %v1962_v34  ;;  %v2361_v62 = vld [vmem:[#allocation3 + $0x14] sm:$0x1] }
 0x11c   : > { %4419 = vmatmul.mubr.msk.bf16.gmra.mrb[4].mxu0 %vm2170_vm0, %v2130_v38 }
 0x11d   : > { %v1326_v58 = vpop.permute.xlu1 %1325 }
 0x11e   : > { %v1324_v40 = vpop.permute.xlu0 %1323  ;;  %v2008_v63 = vsel %vm1996_vm13, %v1987_v45, %v1326_v58 }
 0x11f   : > { %v2006_v35 = vsel %vm1996_vm13, %v1985_v46, %v1324_v40  ;;  %v2362_v40 = vsel %vm4830_vm4, 0, %v2361_v62  ;;  %v2373_v62 = vld [vmem:[#allocation3 + $0x44] sm:$0x1] }
 0x120   : > { %2363 = vst [vmem:[#allocation3 + $0x14] sm:$0x1] %v2362_v40  ;;  %v2349_v40 = vld [vmem:[#allocation3 + $0x54] sm:$0x1] }
 0x121   : > { %v1396_v21 = vpop.permute.xlu1 %1395 }
 0x122   : > { %v1394_v41 = vpop.permute.xlu0 %1393  ;;  %v2029_v11 = vsel %vm2017_vm14, %v2008_v63, %v1396_v21  ;;  %v2358_v21 = vld [vmem:[#allocation3 + $0x8] sm:$0x1] }
 0x123   : > { %v2027_v17 = vsel %vm2017_vm14, %v2006_v35, %v1394_v41 }
 0x125   : > { %v1566_v37 = vpop.permute.xlu1 %1565 }
 0x126   : > { %v1564_v36 = vpop.permute.xlu0 %1563  ;;  %v2050_v56 = vsel %vm2038_vm15, %v2029_v11, %v1566_v37 }
 0x127   : > { %v2048_v2 = vsel %vm2038_vm15, %v2027_v17, %v1564_v36  ;;  %v2359_v36 = vsel %vm4830_vm4, 0, %v2358_v21  ;;  %v2350_v21 = vsel %vm4806_vm2, 0, %v2349_v40 }
 0x128   : > { %2360 = vst [vmem:[#allocation3 + $0x8] sm:$0x1] %v2359_v36  ;;  %2351 = vst [vmem:[#allocation3 + $0x54] sm:$0x1] %v2350_v21 }
 0x129   : > { %v1646_v52 = vpop.permute.xlu1 %1645 }
 0x12a   : > { %v1644_v54 = vpop.permute.xlu0 %1643  ;;  %v2071_v10 = vsel %vm2059_vm1, %v2050_v56, %v1646_v52 }
 0x12b   : > { %v2069_v55 = vsel %vm2059_vm1, %v2048_v2, %v1644_v54 }
 0x12d   : > { %v1716_v18 = vpop.permute.xlu1 %1715 }
 0x12e   : > { %v1714_v32 = vpop.permute.xlu0 %1713  ;;  %v2092_v25 = vsel %vm2080_vm3, %v2071_v10, %v1716_v18 }
 0x12f   : > { %v2090_v27 = vsel %vm2080_vm3, %v2069_v55, %v1714_v32 }
 0x131   : > { %v1886_v60 = vpop.permute.xlu1 %1885 }
 0x132   : > { %v1884_v22 = vpop.permute.xlu0 %1883  ;;  %v2113_v9 = vsel %vm2101_vm5, %v2092_v25, %v1886_v60 }
 0x133   : > { %v2111_v5 = vsel %vm2101_vm5, %v2090_v27, %v1884_v22 }
 0x135   : > { %v1247_v49 = vpop.permute.xlu1 %1246 }
 0x136   : > { %v1964_v53 = vpop.permute.xlu0 %1963  ;;  %v1989_v3 = vsel %vm1975_vm12, %v5232_v39, %v1247_v49  ;;  %v2329_v39 = vsel %vm4806_vm2, 0, %v2328_v29  ;;  %v2343_v29 = vld [vmem:[#allocation3 + $0x3c] sm:$0x1] }
 0x137   : > { %v2132_v57 = vsel %vm2122_vm11, %v2111_v5, %v1964_v53  ;;  %2330 = vst [vmem:[#allocation3] sm:$0x1] %v2329_v39 }
 0x138   : > { %4422 = vmatprep.mubr.msk.bf16.mxu0 %vm2170_vm0, %v2132_v57 }
 0x139   : > { %v1249_v33 = vpop.permute.xlu1 %1248 }
 0x13a   : > { %v1966_v12 = vpop.permute.xlu0 %1965  ;;  %v1991_v48 = vsel %vm1975_vm12, %v5245_v13, %v1249_v33 }
 0x13b   : > { %v2134_v0 = vsel %vm2122_vm11, %v2113_v9, %v1966_v12 }
 0x13c   : > { %4423 = vmatmul.mubr.msk.bf16.gmra.mrb[8].mxu0 %vm2170_vm0, %v2134_v0 }
 0x13d   : > { %v1330_v59 = vpop.permute.xlu1 %1329 }
 0x13e   : > { %v1328_v14 = vpop.permute.xlu0 %1327  ;;  %v2012_v34 = vsel %vm1996_vm13, %v1991_v48, %v1330_v59  ;;  %v2344_v48 = vsel %vm4806_vm2, 0, %v2343_v29 }
 0x13f   : > { %v2010_v20 = vsel %vm1996_vm13, %v1989_v3, %v1328_v14  ;;  %v2337_v14 = vld [vmem:[#allocation3 + $0x24] sm:$0x1]  ;;  %2345 = vst [vmem:[#allocation3 + $0x3c] sm:$0x1] %v2344_v48  ;;  %v2652_v48 = vld [vmem:[#allocation3 + $0x8] sm:$0x1] }
 0x141   : > { %v1400_v15 = vpop.permute.xlu1 %1399 }
 0x142   : > { %v1398_v42 = vpop.permute.xlu0 %1397  ;;  %v2033_v41 = vsel %vm2017_vm14, %v2012_v34, %v1400_v15  ;;  %v2374_v34 = vsel %vm4830_vm4, 0, %v2373_v62 }
 0x143   : > { %v2031_v31 = vsel %vm2017_vm14, %v2010_v20, %v1398_v42  ;;  %v2334_v42 = vld [vmem:[#allocation3 + $0x18] sm:$0x1]  ;;  %2375 = vst [vmem:[#allocation3 + $0x44] sm:$0x1] %v2374_v34 }
 0x145   : > { %v1570_v6 = vpop.permute.xlu1 %1569 }
 0x146   : > { %v1568_v51 = vpop.permute.xlu0 %1567  ;;  %v2054_v52 = vsel %vm2038_vm15, %v2033_v41, %v1570_v6  ;;  %v2346_v41 = vld [vmem:[#allocation3 + $0x48] sm:$0x1] }
 0x147   : > { %v2052_v28 = vsel %vm2038_vm15, %v2031_v31, %v1568_v51 }
 0x149   : > { %v1650_v43 = vpop.permute.xlu1 %1649 }
 0x14a   : > { %v1648_v44 = vpop.permute.xlu0 %1647  ;;  %v2075_v18 = vsel %vm2059_vm1, %v2054_v52, %v1650_v43  ;;  %v2335_v43 = vsel %vm4806_vm2, 0, %v2334_v42  ;;  %v2376_v52 = vld [vmem:[#allocation3 + $0x50] sm:$0x1] }
 0x14b   : > { %v2073_v30 = vsel %vm2059_vm1, %v2052_v28, %v1648_v44  ;;  %v2367_v44 = vld [vmem:[#allocation3 + $0x2c] sm:$0x1]  ;;  %2336 = vst [vmem:[#allocation3 + $0x18] sm:$0x1] %v2335_v43 }
 0x14c   : > { %v2368_v20 = vsel %vm4830_vm4, 0, %v2367_v44 }
 0x14d   : > { %v1720_v50 = vpop.permute.xlu1 %1719  ;;  %2369 = vst [vmem:[#allocation3 + $0x2c] sm:$0x1] %v2368_v20 }
 0x14e   : > { %v1718_v16 = vpop.permute.xlu0 %1717  ;;  %v2096_v32 = vsel %vm2080_vm3, %v2075_v18, %v1720_v50  ;;  %v5549_v18 = vld [vmem:[%s6066_s4] ss:$0 sm:$0xff] }
 0x14f   : > { %v2094_v38 = vsel %vm2080_vm3, %v2073_v30, %v1718_v16  ;;  %v2340_v30 = vld [vmem:[#allocation3 + $0x30] sm:$0x1] }
 0x150   : > { %v2341_v39 = vsel %vm4806_vm2, 0, %v2340_v30 }
 0x151   : > { %v1890_v24 = vpop.permute.xlu1 %1889  ;;  %2342 = vst [vmem:[#allocation3 + $0x30] sm:$0x1] %v2341_v39 }
 0x152   : > { %v1888_v26 = vpop.permute.xlu0 %1887  ;;  %v2117_v35 = vsel %vm2101_vm5, %v2096_v32, %v1890_v24  ;;  %v2364_v24 = vld [vmem:[#allocation3 + $0x20] sm:$0x1] }
 0x153   : > { %v2115_v13 = vsel %vm2101_vm5, %v2094_v38, %v1888_v26  ;;  %v2365_v28 = vsel %vm4830_vm4, 0, %v2364_v24  ;;  %v2370_v38 = vld [vmem:[#allocation3 + $0x38] sm:$0x1]  ;;  %v2659_v24 = vld [vmem:[#allocation3 + $0x14] sm:$0x1] }
 0x154   : > { %2366 = vst [vmem:[#allocation3 + $0x20] sm:$0x1] %v2365_v28 }
 0x155   : > { %v1251_v58 = vpop.permute.xlu1 %1250 }
 0x156   : > { %v1968_v37 = vpop.permute.xlu0 %1967  ;;  %v1993_v57 = vsel %vm1975_vm12, %v5293_v47, %v1251_v58  ;;  %v2338_v47 = vsel %vm4806_vm2, 0, %v2337_v14  ;;  %v2371_v58 = vsel %vm4830_vm4, 0, %v2370_v38 }
 0x157   : > { %v2136_v54 = vsel %vm2122_vm11, %v2115_v13, %v1968_v37  ;;  %2339 = vst [vmem:[#allocation3 + $0x24] sm:$0x1] %v2338_v47  ;;  %2372 = vst [vmem:[#allocation3 + $0x38] sm:$0x1] %v2371_v58  ;;  %v2347_v13 = vsel %vm4806_vm2, 0, %v2346_v41 }
 0x158   : > { %4426 = vmatprep.mubr.msk.bf16.mxu0 %vm2170_vm0, %v2136_v54  ;;  %v2379_v37 = vld [vmem:[#allocation3 + $0x5c] sm:$0x1]  ;;  %2348 = vst [vmem:[#allocation3 + $0x48] sm:$0x1] %v2347_v13  ;;  %v2377_v54 = vsel %vm4830_vm4, 0, %v2376_v52 }
 0x159   : > { %v1253_v46 = vpop.permute.xlu1 %1252  ;;  %v2380_v36 = vsel %vm4830_vm4, 0, %v2379_v37  ;;  %2378 = vst [vmem:[#allocation3 + $0x50] sm:$0x1] %v2377_v54 }
 0x15a   : > { %v1970_v60 = vpop.permute.xlu0 %1969  ;;  %v1995_v56 = vsel %vm1975_vm12, %v5306_v8, %v1253_v46  ;;  %2381 = vst [vmem:[#allocation3 + $0x5c] sm:$0x1] %v2380_v36  ;;  %v2355_v46 = vld [vmem:[#allocation3 + $0x6c] sm:$0x1] }
 0x15b   : > { %v2138_v17 = vsel %vm2122_vm11, %v2117_v35, %v1970_v60 }
 0x15c   : > { %4427 = vmatmul.mubr.msk.bf16.gmra.mrb[12].mxu0 %vm2170_vm0, %v2138_v17  ;;  %v2356_v17 = vsel %vm4806_vm2, 0, %v2355_v46 }
 0x15d   : > { %v1334_v22 = vpop.permute.xlu1 %1333  ;;  %2357 = vst [vmem:[#allocation3 + $0x6c] sm:$0x1] %v2356_v17 }
 0x15e   : > { %v1332_v2 = vpop.permute.xlu0 %1331  ;;  %v2016_v10 = vsel %vm1996_vm13, %v1995_v56, %v1334_v22  ;;  %v2352_v22 = vld [vmem:[#allocation3 + $0x60] sm:$0x1] }
 0x15f   : > { %v2014_v25 = vsel %vm1996_vm13, %v1993_v57, %v1332_v2 }
 0x161   : > { %v1404_v45 = vpop.permute.xlu1 %1403 }
 0x162   : > { %v1402_v55 = vpop.permute.xlu0 %1401  ;;  %v2037_v33 = vsel %vm2017_vm14, %v2016_v10, %v1404_v45 }
 0x163   : > { %v2035_v12 = vsel %vm2017_vm14, %v2014_v25, %v1402_v55  ;;  %v2353_v55 = vsel %vm4806_vm2, 0, %v2352_v22 }
 0x164   : > { %2354 = vst [vmem:[#allocation3 + $0x60] sm:$0x1] %v2353_v55 }
 0x165   : > { %v1574_v63 = vpop.permute.xlu1 %1573 }
 0x166   : > { %v1572_v27 = vpop.permute.xlu0 %1571  ;;  %v2058_v0 = vsel %vm2038_vm15, %v2037_v33, %v1574_v63  ;;  %v2385_v63 = vld [vmem:[#allocation3 + $0x74] sm:$0x1] }
 0x167   : > { %v2056_v15 = vsel %vm2038_vm15, %v2035_v12, %v1572_v27 }
 0x169   : > { %v1654_v49 = vpop.permute.xlu1 %1653 }
 0x16a   : > { %v1652_v11 = vpop.permute.xlu0 %1651  ;;  %v2079_v8 = vsel %vm2059_vm1, %v2058_v0, %v1654_v49 }
 0x16b   : > { %v2077_v6 = vsel %vm2059_vm1, %v2056_v15, %v1652_v11 }
 0x16d   : > { %v1724_v5 = vpop.permute.xlu1 %1723 }
 0x16e   : > { %v1722_v53 = vpop.permute.xlu0 %1721  ;;  %v2100_v51 = vsel %vm2080_vm3, %v2079_v8, %v1724_v5  ;;  %v2386_v5 = vsel %vm4830_vm4, 0, %v2385_v63 }
 0x16f   : > { %v2098_v50 = vsel %vm2080_vm3, %v2077_v6, %v1722_v53  ;;  %v2382_v53 = vld [vmem:[#allocation3 + $0x68] sm:$0x1]  ;;  %2387 = vst [vmem:[#allocation3 + $0x74] sm:$0x1] %v2386_v5  ;;  %v2655_v6 = vld [vmem:[#allocation3 + $0xc] sm:$0xf] }
 0x170   : > { %v2383_v10 = vsel %vm4830_vm4, 0, %v2382_v53  ;;  %vm6081_vm4 = vcmask (!%p4105_p11), 24576  }
 0x171   : > { %v1894_v9 = vpop.permute.xlu1 %1893  ;;  %2384 = vst [vmem:[#allocation3 + $0x68] sm:$0x1] %v2383_v10 }
 0x172   : > { %v1892_v59 = vpop.permute.xlu0 %1891  ;;  %v2121_v16 = vsel %vm2101_vm5, %v2100_v51, %v1894_v9 }
 0x173   : > { %v2119_v31 = vsel %vm2101_vm5, %v2098_v50, %v1892_v59 }
 0x175   : > { %v1974_v3 = vpop.permute.xlu1 %1973 }
 0x176   : > { %v2142_v26 = vsel %vm2122_vm11, %v2121_v16, %v1974_v3  ;;  %v1972_v23 = vpop.permute.xlu0 %1971  ;;  %v2648_v16 = vld [vmem:[#allocation3] sm:$0xf] }
 0x177   : > { %v2140_v7 = vsel %vm2122_vm11, %v2119_v31, %v1972_v23 }
 0x178   : > { %4430 = vmatprep.mubr.msk.bf16.mxu0 %vm2170_vm0, %v2140_v7 }
 0x179   : > { %4431 = vmatmul.mubr.msk.bf16.gmra.mrb[16].mxu0 %vm2170_vm0, %v2142_v26 }
 0x1cf   : > { %v4416_v32 = vpop.f32.mrb[0].mxu0 }
 0x1d0   : > { %v2238_v35 = vadd.f32 %v4416_v32, %v5549_v18  ;;  %v2229_v60 = vpop.f32.mrb[1].mxu0 }
 0x1d1   : > { %v2230_v2 = vadd.f32 %v5549_v18, %v2229_v60  ;;  %v4417_v45 = vpop.f32.mrb[2].mxu0 }
 0x1d2   : > { %v2310_v27 = vmax.f32 %v2238_v35, 0.0  ;;  %v2241_v49 = vadd.f32 %v4417_v45, %v5549_v18  ;;  %v2232_v11 = vpop.f32.mrb[3].mxu0 }
 0x1d3   : > { %v2308_v56 = vmax.f32 %v2230_v2, 0.0  ;;  %v2233_v57 = vadd.f32 %v5549_v18, %v2232_v11 }
 0x1d4   : > { %v4327_v25 = vpack.c.bf16 %v2310_v27, %v2310_v27  ;;  %v2311_v33 = vmax.f32 %v2241_v49, 0.0 }
 0x1d5   : > { %v4325_v9 = vpack.c.bf16 %v2308_v56, %v2308_v56  ;;  %v2309_v12 = vmax.f32 %v2233_v57, 0.0  ;;  %v2669_v56 = vld [vmem:[#allocation3 + $0x24] sm:$0xf] }
 0x1d6   : > { %v2466_v0 = vshrl.u32 %v4327_v25, 16  ;;  %v4328_v59 = vpack.c.bf16 %v2311_v33, %v2311_v33  ;;  %v2469_v47 = vshll.u32 %v4327_v25, 16 }
 0x1d7   : > { %v2449_v14 = vshrl.u32 %v4325_v9, 16  ;;  %v4326_v15 = vpack.c.bf16 %v2309_v12, %v2309_v12  ;;  %v2452_v43 = vshll.u32 %v4325_v9, 16  ;;  %v2662_v9 = vld [vmem:[#allocation3 + $0x18] sm:$0xf] }
 0x1d8   : > { %v2468_v8 = vrot.slane %v2466_v0, 7  ;;  %v2474_v42 = vshrl.u32 %v4328_v59, 16  ;;  %v2477_v3 = vshll.u32 %v4328_v59, 16 }
 0x1d9   : > { %v2451_v51 = vrot.slane %v2449_v14, 7  ;;  %v2457_v44 = vshrl.u32 %v4326_v15, 16  ;;  %v2460_v26 = vshll.u32 %v4326_v15, 16  ;;  %v2673_v14 = vld [vmem:[#allocation3 + $0x2c] sm:$0x1] }
 0x1da   : > { %v2471_v50 = vor.u32 %v2469_v47, %v2468_v8  ;;  %v2476_v19 = vrot.slane %v2474_v42, 7  ;;  %v2472_v23 = vrot.slane %v2468_v8, 4 }
 0x1db   : > { %v2454_v20 = vor.u32 %v2452_v43, %v2451_v51  ;;  %v2459_v31 = vrot.slane %v2457_v44, 7  ;;  %v2455_v30 = vrot.slane %v2451_v51, 4  ;;  %v2666_v43 = vld [vmem:[#allocation3 + $0x20] sm:$0x1] }
 0x1dc   : > { %v2656_v28 = vsel %vm4896_vm7, %v2471_v50, %v2655_v6  ;;  %v2479_v7 = vor.u32 %v2477_v3, %v2476_v19  ;;  %v2481_v29 = vrot.slane %v2476_v19, 4 }
 0x1dd   : > { %2657 = vst [vmem:[#allocation3 + $0xc] sm:$0xf] %v2656_v28  ;;  %v2649_v39 = vsel %vm4896_vm7, %v2454_v20, %v2648_v16  ;;  %v2462_v62 = vor.u32 %v2460_v26, %v2459_v31  ;;  %v2464_v34 = vrot.slane %v2459_v31, 4 }
 0x1de   : > { %2650 = vst [vmem:[#allocation3] sm:$0xf] %v2649_v39  ;;  %v2480_v38 = vsel %vm4902_vm8, %v2472_v23, %v2479_v7  ;;  %v2660_v58 = vsel %vm4806_vm2, %v2481_v29, %v2659_v24 }
 0x1df   : > { %2658 = vst.msk [vmem:[#allocation3 + $0x10] sm:$0xf] %vm581_vm6, %v2480_v38  ;;  %2661 = vst [vmem:[#allocation3 + $0x14] sm:$0x1] %v2660_v58  ;;  %v2463_v40 = vsel %vm4902_vm8, %v2455_v30, %v2462_v62  ;;  %v2653_v21 = vsel %vm4806_vm2, %v2464_v34, %v2652_v48 }
 0x1e0   : > { %2651 = vst.msk [vmem:[#allocation3 + $0x4] sm:$0xf] %vm581_vm6, %v2463_v40  ;;  %2654 = vst [vmem:[#allocation3 + $0x8] sm:$0x1] %v2653_v21 }
 0x1e1   : > { %2721 = vst.msk [vmem:[#allocation3] sm:$0xf] (!%p4105_p11), %vm581_vm6, %v4728_v61  ;;  %2722 = vst.msk [vmem:[#allocation3 + $0x4] sm:$0xf] (!%p4105_p11), %vm581_vm6, %v4728_v61 }
 0x1e2   : > { %2724 = vst.msk [vmem:[#allocation3 + $0x8] sm:$0x1] (!%p4105_p11), %vm6081_vm4, %v4728_v61 }
 0x1ef   : > { %v4420_v41 = vpop.f32.mrb[4].mxu0 }
 0x1f0   : > { %v2254_v13 = vadd.f32 %v4420_v41, %v5549_v18  ;;  %v2245_v37 = vpop.f32.mrb[5].mxu0 }
 0x1f1   : > { %v2246_v36 = vadd.f32 %v5549_v18, %v2245_v37  ;;  %v4421_v52 = vpop.f32.mrb[6].mxu0 }
 0x1f2   : > { %v2314_v54 = vmax.f32 %v2254_v13, 0.0  ;;  %v2257_v32 = vadd.f32 %v4421_v52, %v5549_v18  ;;  %v2248_v46 = vpop.f32.mrb[7].mxu0 }
 0x1f3   : > { %v2312_v35 = vmax.f32 %v2246_v36, 0.0  ;;  %v2249_v60 = vadd.f32 %v5549_v18, %v2248_v46  ;;  %v2683_v46 = vld [vmem:[#allocation3 + $0x3c] sm:$0xf] }
 0x1f4   : > { %v4331_v17 = vpack.c.bf16 %v2314_v54, %v2314_v54  ;;  %v2315_v22 = vmax.f32 %v2257_v32, 0.0 }
 0x1f5   : > { %v4329_v2 = vpack.c.bf16 %v2312_v35, %v2312_v35  ;;  %v2313_v45 = vmax.f32 %v2249_v60, 0.0 }
 0x1f6   : > { %v2500_v55 = vshrl.u32 %v4331_v17, 16  ;;  %v4332_v63 = vpack.c.bf16 %v2315_v22, %v2315_v22  ;;  %v2503_v5 = vshll.u32 %v4331_v17, 16 }
 0x1f7   : > { %v2483_v27 = vshrl.u32 %v4329_v2, 16  ;;  %v4330_v49 = vpack.c.bf16 %v2313_v45, %v2313_v45  ;;  %v2486_v10 = vshll.u32 %v4329_v2, 16  ;;  %v2676_v2 = vld [vmem:[#allocation3 + $0x30] sm:$0xf] }
 0x1f8   : > { %v2502_v11 = vrot.slane %v2500_v55, 7  ;;  %v2508_v53 = vshrl.u32 %v4332_v63, 16  ;;  %v2511_v0 = vshll.u32 %v4332_v63, 16 }
 0x1f9   : > { %v2485_v57 = vrot.slane %v2483_v27, 7  ;;  %v2491_v25 = vshrl.u32 %v4330_v49, 16  ;;  %v2494_v8 = vshll.u32 %v4330_v49, 16  ;;  %v2687_v27 = vld [vmem:[#allocation3 + $0x44] sm:$0x1] }
 0x1fa   : > { %v2505_v33 = vor.u32 %v2503_v5, %v2502_v11  ;;  %v2510_v12 = vrot.slane %v2508_v53, 7  ;;  %v2506_v47 = vrot.slane %v2502_v11, 4 }
 0x1fb   : > { %v2488_v59 = vor.u32 %v2486_v10, %v2485_v57  ;;  %v2493_v15 = vrot.slane %v2491_v25, 7  ;;  %v2489_v44 = vrot.slane %v2485_v57, 4  ;;  %v2680_v10 = vld [vmem:[#allocation3 + $0x38] sm:$0x1] }
 0x1fc   : > { %v2670_v42 = vsel %vm4896_vm7, %v2505_v33, %v2669_v56  ;;  %v2513_v6 = vor.u32 %v2511_v0, %v2510_v12  ;;  %v2515_v51 = vrot.slane %v2510_v12, 4 }
 0x1fd   : > { %2671 = vst [vmem:[#allocation3 + $0x24] sm:$0xf] %v2670_v42  ;;  %v2663_v50 = vsel %vm4896_vm7, %v2488_v59, %v2662_v9  ;;  %v2496_v16 = vor.u32 %v2494_v8, %v2493_v15  ;;  %v2498_v19 = vrot.slane %v2493_v15, 4 }
 0x1fe   : > { %2664 = vst [vmem:[#allocation3 + $0x18] sm:$0xf] %v2663_v50  ;;  %v2514_v3 = vsel %vm4902_vm8, %v2506_v47, %v2513_v6  ;;  %v2674_v20 = vsel %vm4806_vm2, %v2515_v51, %v2673_v14 }
 0x1ff   : > { %2672 = vst.msk [vmem:[#allocation3 + $0x28] sm:$0xf] %vm581_vm6, %v2514_v3  ;;  %2675 = vst [vmem:[#allocation3 + $0x2c] sm:$0x1] %v2674_v20  ;;  %v2497_v24 = vsel %vm4902_vm8, %v2489_v44, %v2496_v16  ;;  %v2667_v31 = vsel %vm4806_vm2, %v2498_v19, %v2666_v43 }
 0x200   : > { %2665 = vst.msk [vmem:[#allocation3 + $0x1c] sm:$0xf] %vm581_vm6, %v2497_v24  ;;  %2668 = vst [vmem:[#allocation3 + $0x20] sm:$0x1] %v2667_v31 }
 0x20f   : > { %v4424_v26 = vpop.f32.mrb[8].mxu0 }
 0x210   : > { %v2270_v23 = vadd.f32 %v4424_v26, %v5549_v18  ;;  %v2261_v28 = vpop.f32.mrb[9].mxu0 }
 0x211   : > { %v2262_v7 = vadd.f32 %v5549_v18, %v2261_v28  ;;  %v4425_v29 = vpop.f32.mrb[10].mxu0 }
 0x212   : > { %v2318_v48 = vmax.f32 %v2270_v23, 0.0  ;;  %v2273_v30 = vadd.f32 %v4425_v29, %v5549_v18  ;;  %v2264_v39 = vpop.f32.mrb[11].mxu0 }
 0x213   : > { %v2316_v62 = vmax.f32 %v2262_v7, 0.0  ;;  %v2265_v34 = vadd.f32 %v5549_v18, %v2264_v39  ;;  %v2697_v39 = vld [vmem:[#allocation3 + $0x54] sm:$0xf] }
 0x214   : > { %v4335_v38 = vpack.c.bf16 %v2318_v48, %v2318_v48  ;;  %v2319_v58 = vmax.f32 %v2273_v30, 0.0 }
 0x215   : > { %v4333_v40 = vpack.c.bf16 %v2316_v62, %v2316_v62  ;;  %v2317_v21 = vmax.f32 %v2265_v34, 0.0 }
 0x216   : > { %v2534_v41 = vshrl.u32 %v4335_v38, 16  ;;  %v4336_v13 = vpack.c.bf16 %v2319_v58, %v2319_v58  ;;  %v2537_v54 = vshll.u32 %v4335_v38, 16 }
 0x217   : > { %v2517_v37 = vshrl.u32 %v4333_v40, 16  ;;  %v4334_v36 = vpack.c.bf16 %v2317_v21, %v2317_v21  ;;  %v2520_v60 = vshll.u32 %v4333_v40, 16  ;;  %v2690_v40 = vld [vmem:[#allocation3 + $0x48] sm:$0xf] }
 0x218   : > { %v2536_v52 = vrot.slane %v2534_v41, 7  ;;  %v2542_v32 = vshrl.u32 %v4336_v13, 16  ;;  %v2545_v55 = vshll.u32 %v4336_v13, 16 }
 0x219   : > { %v2519_v35 = vrot.slane %v2517_v37, 7  ;;  %v2525_v17 = vshrl.u32 %v4334_v36, 16  ;;  %v2528_v11 = vshll.u32 %v4334_v36, 16  ;;  %v2701_v37 = vld [vmem:[#allocation3 + $0x5c] sm:$0x1] }
 0x21a   : > { %v2539_v22 = vor.u32 %v2537_v54, %v2536_v52  ;;  %v2544_v45 = vrot.slane %v2542_v32, 7  ;;  %v2540_v5 = vrot.slane %v2536_v52, 4 }
 0x21b   : > { %v2522_v63 = vor.u32 %v2520_v60, %v2519_v35  ;;  %v2527_v49 = vrot.slane %v2525_v17, 7  ;;  %v2523_v25 = vrot.slane %v2519_v35, 4  ;;  %v2694_v60 = vld [vmem:[#allocation3 + $0x50] sm:$0x1] }
 0x21c   : > { %v2684_v53 = vsel %vm4896_vm7, %v2539_v22, %v2683_v46  ;;  %v2547_v56 = vor.u32 %v2545_v55, %v2544_v45  ;;  %v2549_v57 = vrot.slane %v2544_v45, 4 }
 0x21d   : > { %2685 = vst [vmem:[#allocation3 + $0x3c] sm:$0xf] %v2684_v53  ;;  %v2677_v33 = vsel %vm4896_vm7, %v2522_v63, %v2676_v2  ;;  %v2530_v9 = vor.u32 %v2528_v11, %v2527_v49  ;;  %v2532_v12 = vrot.slane %v2527_v49, 4 }
 0x21e   : > { %2678 = vst [vmem:[#allocation3 + $0x30] sm:$0xf] %v2677_v33  ;;  %v2548_v0 = vsel %vm4902_vm8, %v2540_v5, %v2547_v56  ;;  %v2688_v59 = vsel %vm4806_vm2, %v2549_v57, %v2687_v27 }
 0x21f   : > { %2686 = vst.msk [vmem:[#allocation3 + $0x40] sm:$0xf] %vm581_vm6, %v2548_v0  ;;  %2689 = vst [vmem:[#allocation3 + $0x44] sm:$0x1] %v2688_v59  ;;  %v2531_v14 = vsel %vm4902_vm8, %v2523_v25, %v2530_v9  ;;  %v2681_v15 = vsel %vm4806_vm2, %v2532_v12, %v2680_v10 }
 0x220   : > { %2679 = vst.msk [vmem:[#allocation3 + $0x34] sm:$0xf] %vm581_vm6, %v2531_v14  ;;  %2682 = vst [vmem:[#allocation3 + $0x38] sm:$0x1] %v2681_v15 }
 0x22f   : > { %v4428_v8 = vpop.f32.mrb[12].mxu0 }
 0x230   : > { %v2286_v47 = vadd.f32 %v4428_v8, %v5549_v18  ;;  %v2277_v42 = vpop.f32.mrb[13].mxu0 }
 0x231   : > { %v2278_v6 = vadd.f32 %v5549_v18, %v2277_v42  ;;  %v4429_v51 = vpop.f32.mrb[14].mxu0 }
 0x232   : > { %v2322_v43 = vmax.f32 %v2286_v47, 0.0  ;;  %v2289_v44 = vadd.f32 %v4429_v51, %v5549_v18  ;;  %v2280_v50 = vpop.f32.mrb[15].mxu0 }
 0x233   : > { %v2320_v16 = vmax.f32 %v2278_v6, 0.0  ;;  %v2281_v19 = vadd.f32 %v5549_v18, %v2280_v50  ;;  %v2711_v50 = vld [vmem:[#allocation3 + $0x6c] sm:$0xf] }
 0x234   : > { %v4339_v3 = vpack.c.bf16 %v2322_v43, %v2322_v43  ;;  %v2323_v20 = vmax.f32 %v2289_v44, 0.0 }
 0x235   : > { %v4337_v24 = vpack.c.bf16 %v2320_v16, %v2320_v16  ;;  %v2321_v31 = vmax.f32 %v2281_v19, 0.0 }
 0x236   : > { %v2568_v26 = vshrl.u32 %v4339_v3, 16  ;;  %v4340_v23 = vpack.c.bf16 %v2323_v20, %v2323_v20  ;;  %v2571_v48 = vshll.u32 %v4339_v3, 16 }
 0x237   : > { %v2551_v28 = vshrl.u32 %v4337_v24, 16  ;;  %v4338_v7 = vpack.c.bf16 %v2321_v31, %v2321_v31  ;;  %v2554_v34 = vshll.u32 %v4337_v24, 16  ;;  %v2704_v24 = vld [vmem:[#allocation3 + $0x60] sm:$0xf] }
 0x238   : > { %v2570_v29 = vrot.slane %v2568_v26, 7  ;;  %v2576_v30 = vshrl.u32 %v4340_v23, 16  ;;  %v2579_v41 = vshll.u32 %v4340_v23, 16  ;;  %v2715_v23 = vld [vmem:[#allocation3 + $0x74] sm:$0x1] }
 0x239   : > { %v2553_v62 = vrot.slane %v2551_v28, 7  ;;  %v2559_v38 = vshrl.u32 %v4338_v7, 16  ;;  %v2562_v52 = vshll.u32 %v4338_v7, 16 }
 0x23a   : > { %v2573_v58 = vor.u32 %v2571_v48, %v2570_v29  ;;  %v2578_v21 = vrot.slane %v2576_v30, 7  ;;  %v2574_v54 = vrot.slane %v2570_v29, 4 }
 0x23b   : > { %v2556_v13 = vor.u32 %v2554_v34, %v2553_v62  ;;  %v2561_v36 = vrot.slane %v2559_v38, 7  ;;  %v2557_v17 = vrot.slane %v2553_v62, 4  ;;  %v2708_v62 = vld [vmem:[#allocation3 + $0x68] sm:$0x1] }
 0x23c   : > { %v2698_v32 = vsel %vm4896_vm7, %v2573_v58, %v2697_v39  ;;  %v2581_v46 = vor.u32 %v2579_v41, %v2578_v21  ;;  %v2583_v35 = vrot.slane %v2578_v21, 4 }
 0x23d   : > { %2699 = vst [vmem:[#allocation3 + $0x54] sm:$0xf] %v2698_v32  ;;  %v2691_v22 = vsel %vm4896_vm7, %v2556_v13, %v2690_v40  ;;  %v2564_v2 = vor.u32 %v2562_v52, %v2561_v36  ;;  %v2566_v45 = vrot.slane %v2561_v36, 4 }
 0x23e   : > { %2692 = vst [vmem:[#allocation3 + $0x48] sm:$0xf] %v2691_v22  ;;  %v2582_v55 = vsel %vm4902_vm8, %v2574_v54, %v2581_v46  ;;  %v2702_v63 = vsel %vm4806_vm2, %v2583_v35, %v2701_v37 }
 0x23f   : > { %2700 = vst.msk [vmem:[#allocation3 + $0x58] sm:$0xf] %vm581_vm6, %v2582_v55  ;;  %2703 = vst [vmem:[#allocation3 + $0x5c] sm:$0x1] %v2702_v63  ;;  %v2565_v27 = vsel %vm4902_vm8, %v2557_v17, %v2564_v2  ;;  %v2695_v49 = vsel %vm4806_vm2, %v2566_v45, %v2694_v60 }
 0x240   : > { %2693 = vst.msk [vmem:[#allocation3 + $0x4c] sm:$0xf] %vm581_vm6, %v2565_v27  ;;  %2696 = vst [vmem:[#allocation3 + $0x50] sm:$0x1] %v2695_v49 }
 0x24c   : > { %v4432_v11 = vpop.f32.mrb[16].mxu0 }
 0x24d   : > { %v2302_v5 = vadd.f32 %v4432_v11, %v5549_v18  ;;  %v2293_v53 = vpop.f32.mrb[17].mxu0 }
 0x24e   : > { %v2294_v56 = vadd.f32 %v5549_v18, %v2293_v53  ;;  %v4433_v57 = vpop.f32.mrb[18].mxu0 }
 0x24f   : > { %v2326_v10 = vmax.f32 %v2302_v5, 0.0  ;;  %v2305_v25 = vadd.f32 %v4433_v57, %v5549_v18  ;;  %v2296_v33 = vpop.f32.mrb[19].mxu0 }
 0x250   : > { %v2324_v9 = vmax.f32 %v2294_v56, 0.0  ;;  %v2297_v12 = vadd.f32 %v5549_v18, %v2296_v33 }
 0x251   : > { %v4343_v0 = vpack.c.bf16 %v2326_v10, %v2326_v10  ;;  %v2327_v59 = vmax.f32 %v2305_v25, 0.0 }
 0x252   : > { %v4341_v14 = vpack.c.bf16 %v2324_v9, %v2324_v9  ;;  %v2325_v15 = vmax.f32 %v2297_v12, 0.0 }
 0x253   : > { %v2602_v8 = vshrl.u32 %v4343_v0, 16  ;;  %v4344_v47 = vpack.c.bf16 %v2327_v59, %v2327_v59  ;;  %v2605_v43 = vshll.u32 %v4343_v0, 16 }
 0x254   : > { %v2585_v42 = vshrl.u32 %v4341_v14, 16  ;;  %v4342_v6 = vpack.c.bf16 %v2325_v15, %v2325_v15  ;;  %v2588_v19 = vshll.u32 %v4341_v14, 16 }
 0x255   : > { %v2604_v51 = vrot.slane %v2602_v8, 7  ;;  %v2610_v44 = vshrl.u32 %v4344_v47, 16  ;;  %v2613_v26 = vshll.u32 %v4344_v47, 16 }
 0x256   : > { %v2587_v16 = vrot.slane %v2585_v42, 7  ;;  %v2593_v3 = vshrl.u32 %v4342_v6, 16  ;;  %v2596_v7 = vshll.u32 %v4342_v6, 16 }
 0x257   : > { %v2607_v20 = vor.u32 %v2605_v43, %v2604_v51  ;;  %v2612_v31 = vrot.slane %v2610_v44, 7  ;;  %v2608_v29 = vrot.slane %v2604_v51, 4  ;;  %2720 = sbr.rel (%p4105_p11) target bundleno = 606 (0x25e), region = 60 }
 0x258   : > { %v2590_v18 = vor.u32 %v2588_v19, %v2587_v16  ;;  %v2595_v28 = vrot.slane %v2593_v3, 7  ;;  %v2591_v34 = vrot.slane %v2587_v16, 4 }
 0x259   : > { %v2712_v48 = vsel %vm4896_vm7, %v2607_v20, %v2711_v50  ;;  %v2615_v30 = vor.u32 %v2613_v26, %v2612_v31  ;;  %v2617_v39 = vrot.slane %v2612_v31, 4 }
 0x25a   : > { %2713 = vst [vmem:[#allocation3 + $0x6c] sm:$0xf] %v2712_v48  ;;  %v2705_v38 = vsel %vm4896_vm7, %v2590_v18, %v2704_v24  ;;  %v2598_v58 = vor.u32 %v2596_v7, %v2595_v28  ;;  %v2600_v40 = vrot.slane %v2595_v28, 4 }
 0x25b   : > { %2706 = vst [vmem:[#allocation3 + $0x60] sm:$0xf] %v2705_v38  ;;  %v2616_v21 = vsel %vm4902_vm8, %v2608_v29, %v2615_v30  ;;  %v2716_v41 = vsel %vm4806_vm2, %v2617_v39, %v2715_v23 }
 0x25c   : > { %2714 = vst.msk [vmem:[#allocation3 + $0x70] sm:$0xf] %vm581_vm6, %v2616_v21  ;;  %2717 = vst [vmem:[#allocation3 + $0x74] sm:$0x1] %v2716_v41  ;;  %v2599_v13 = vsel %vm4902_vm8, %v2591_v34, %v2598_v58  ;;  %v2709_v37 = vsel %vm4806_vm2, %v2600_v40, %v2708_v62 }
 0x25d   : > { %2707 = vst.msk [vmem:[#allocation3 + $0x64] sm:$0xf] %vm581_vm6, %v2599_v13  ;;  %2710 = vst [vmem:[#allocation3 + $0x68] sm:$0x1] %v2709_v37 }
 0x25e PF: > { %2727 = sbr.rel (%p4106_p12) target bundleno = 613 (0x265), region = 64  ;;  %v4729_v4 = vmov (!%p4106_p12), 0   ;;  %vm6082_vm2 = vcmask (!%p4106_p12), 24576  }
 0x25f   : > { %2729 = vst.msk [vmem:[#allocation3 + $0x6c] sm:$0xf] (!%p4106_p12), %vm581_vm6, %v4729_v4  ;;  %2730 = vst.msk [vmem:[#allocation3 + $0x70] sm:$0xf] (!%p4106_p12), %vm581_vm6, %v4729_v4 }
 0x260   : > { %2732 = vst.msk [vmem:[#allocation3 + $0x74] sm:$0x1] (!%p4106_p12), %vm6082_vm2, %v4729_v4 }
 0x265 PF: > { %v2766_v1 = vld [vmem:[#allocation3 + $0xc] sm:$0xf]  ;;  %v5659_v36 = vld [vmem:[#allocation3 + $0x10] sm:$0xf]  ;;  %v2734_v52 = vld [vmem:[#allocation3 + $0x4] sm:$0xf] }
 0x266   : > { %v4257_v54 = vcombine.low %v2766_v1, %v5659_v36  ;;  %v2757_v32 = vld [vmem:[#allocation3] sm:$0xe]  ;;  %v4604_v35 = vld [vmem:[#allocation3 + $0x8] ss:$0 sps:$4 sm:$0x11]   ;;  %v4675_v61 = vld [vmem:[%s6067_s5] sm:$0xff]  }
 0x267   : > { %v2733_v46 = vld [vmem:[#allocation3] sm:$0xf]  ;;  %v4249_v60 = vcombine.low %v2757_v32, %v2734_v52  ;;  %v2735_v22 = vld [vmem:[#allocation3 + $0xc] sm:$0xf]  ;;  %v2736_v2 = vld [vmem:[#allocation3 + $0x10] sm:$0xf]  ;;  %4434 = vmatprep.subr.bf16.mxu1 %v4675_v61 }
 0x268   : > { %v5662_v17 = vcombine.low %v2733_v46, %v2734_v52  ;;  %3111 = vrot.lane.b32.xlu0 %v4257_v54, %s4720_s23  ;;  %v2758_v45 = vld [vmem:[#allocation3 + $0xc] sm:$0xe]  ;;  %v3032_v63 = vrot.slane %v4604_v35, 1  ;;  %v5665_v27 = vcombine.low %v2735_v22, %v2736_v2  ;;  %v4608_v49 = vld [vmem:[#allocation3 + $0x14] ss:$0 sps:$4 sm:$0x11]   ;;  %4435 = vmatpush3.bf16.msra.mxu1 %v4675_v61 }
 0x269   : > { %v3031_v55 = vrot.slane %v4249_v60, 1  ;;  %v4250_v11 = vcombine.low %v2758_v45, %v2736_v2  ;;  %v2903_v56 = vshll.u32 %v4604_v35, 16  ;;  %v2768_v57 = vld [vmem:[#allocation3 + $0x18] sm:$0xf]  ;;  %v3035_v33 = vrot.slane %v4608_v49, 1 }
 0x26a   : > { %v2896_v5 = vshrl.u32 %v5662_v17, 16  ;;  %v2898_v53 = vshll.u32 %v5662_v17, 16  ;;  %v2769_v9 = vld [vmem:[#allocation3 + $0x1c] sm:$0xf]  ;;  %v2908_v12 = vshrl.u32 %v5665_v27, 16  ;;  %v2910_v15 = vshll.u32 %v5665_v27, 16 }
 0x26b   : > { %v3033_v10 = vsel %vm1284_vm9, %v3031_v55, %v3032_v63  ;;  %v3034_v25 = vrot.slane %v4250_v11, 1  ;;  %v2905_v59 = vrot.slane %v2903_v56, 1  ;;  %v4258_v14 = vcombine.low %v2768_v57, %v2769_v9  ;;  %v4611_v42 = vld [vmem:[#allocation3 + $0x20] ss:$0 sps:$4 sm:$0x11]   ;;  %v4676_v56 = vld [vmem:[%s6067_s5 + $0x8] sm:$0xff]  }
 0x26c   : > { %3055 = vrot.lane.b32.xlu1 %v3033_v10, %s4721_s25  ;;  %v2900_v0 = vrot.slane %v2898_v53, 1  ;;  %v2915_v47 = vshll.u32 %v4608_v49, 16  ;;  %v2912_v51 = vrot.slane %v2910_v15, 1  ;;  %v4612_v50 = vld [vmem:[#allocation3 + $0x14] ss:$0 sps:$4 sm:$0x11]   ;;  %4436 = vmatprep.subr.bf16.mxu1 %v4676_v56 }
 0x26d   : > { %v3036_v8 = vsel %vm1284_vm9, %v3034_v25, %v3035_v33  ;;  %v3164_v43 = vshrl.u32 %v4258_v14, 16  ;;  %v3166_v44 = vshll.u32 %v4258_v14, 16  ;;  %v3171_v19 = vshll.u32 %v4611_v42, 16  ;;  %v2791_v24 = vld [vmem:[#allocation3 + $0x18] sm:$0xe]  ;;  %4437 = vmatpush3.bf16.msra.mxu1 %v4676_v56 }
 0x26e   : > { %v2901_v6 = vor.u32 %v2900_v0, %v2896_v5  ;;  %v2917_v16 = vrot.slane %v2915_v47, 1  ;;  %v3152_v3 = vshrl.u32 %v4257_v54, 16  ;;  %v3154_v20 = vshll.u32 %v4257_v54, 16  ;;  %v2790_v28 = vld [vmem:[#allocation3 + $0xc] sm:$0xe] }
 0x26f   : > { %v2913_v26 = vor.u32 %v2912_v51, %v2908_v12  ;;  %v3168_v18 = vrot.slane %v3166_v44, 1  ;;  %v3159_v23 = vshll.u32 %v4612_v50, 16  ;;  %v2801_v7 = vld [vmem:[#allocation3 + $0x24] sm:$0xf]  ;;  %v3173_v29 = vrot.slane %v3171_v19, 1 }
 0x270   : > { %3057 = vrot.lane.b32.xlu1 %v3036_v8, %s4721_s25  ;;  %v2906_v31 = vsel %vm1113_vm10, %v2901_v6, %v2905_v59  ;;  %v3156_v48 = vrot.slane %v3154_v20, 1  ;;  %v4274_v30 = vcombine.low %v2791_v24, %v2769_v9  ;;  %v5677_v39 = vld [vmem:[#allocation3 + $0x28] sm:$0xf]  ;;  %v2799_v62 = vld [vmem:[#allocation3 + $0x18] sm:$0xf]  ;;  %v4273_v40 = vcombine.low %v2790_v28, %v5659_v36 }
 0x271   : > { %2991 = vrot.lane.b32.xlu0 %v2906_v31, %s4722_s8  ;;  %v2918_v34 = vsel %vm1113_vm10, %v2913_v26, %v2917_v16  ;;  %v3169_v38 = vor.u32 %v3168_v18, %v3164_v43  ;;  %v3161_v58 = vrot.slane %v3159_v23, 1  ;;  %v5681_v21 = vld [vmem:[#allocation3 + $0x1c] sm:$0xf]  ;;  %v4282_v13 = vcombine.low %v2801_v7, %v5677_v39  ;;  %v5684_v37 = vld [vmem:[#allocation3 + $0x2c] ss:$0 sps:$4 sm:$0x11]  }
 0x272   : > { %v3157_v41 = vor.u32 %v3156_v48, %v3152_v3  ;;  %v3291_v4 = vrot.slane %v4611_v42, 1  ;;  %v4281_v1 = vcombine.low %v2799_v62, %v5681_v21  ;;  %v5691_v52 = vld [vmem:[#allocation3 + $0x20] ss:$0 sps:$4 sm:$0x11]   ;;  %v3290_v54 = vrot.slane %v4274_v30, 1 }
 0x273   : > { %v3174_v36 = vsel %vm1113_vm10, %v3169_v38, %v3173_v29  ;;  %v3288_v32 = vrot.slane %v4612_v50, 1  ;;  %v2737_v46 = vld [vmem:[#allocation3 + $0x18] sm:$0xf]  ;;  %v5695_v35 = vld [vmem:[#allocation3 + $0x1c] sm:$0xf]  ;;  %v3287_v22 = vrot.slane %v4273_v40, 1 }
 0x274   : > { %3113 = vrot.lane.b32.xlu1 %v4258_v14, %s4720_s23  ;;  %v3162_v60 = vsel %vm1113_vm10, %v3157_v41, %v3161_v58  ;;  %v3422_v2 = vshll.u32 %v4282_v13, 16  ;;  %v3410_v45 = vshll.u32 %v4281_v1, 16  ;;  %v5699_v55 = vcombine.low %v2737_v46, %v5695_v35  ;;  %v5701_v63 = vld [vmem:[#allocation3 + $0x20] ss:$0 sps:$4 sm:$0x11]  }
 0x275   : > { %2993 = vrot.lane.b32.xlu0 %v2918_v34, %s4722_s8  ;;  %v3420_v49 = vshrl.u32 %v4282_v13, 16  ;;  %v3427_v5 = vshll.u32 %v5684_v37, 16  ;;  %v2739_v53 = vld [vmem:[#allocation3 + $0x24] sm:$0xf]  ;;  %v3292_v57 = vsel %vm1284_vm9, %v3290_v54, %v3291_v4  ;;  %v2740_v25 = vld [vmem:[#allocation3 + $0x28] sm:$0xf]  ;;  %v3289_v33 = vsel %vm1284_vm9, %v3287_v22, %v3288_v32 }
 0x276   : > { %v3424_v11 = vrot.slane %v3422_v2, 1  ;;  %v2922_v10 = vshll.u32 %v5699_v55, 16  ;;  %v3408_v9 = vshrl.u32 %v4281_v1, 16  ;;  %v3412_v12 = vrot.slane %v3410_v45, 1  ;;  %v2823_v14 = vld [vmem:[#allocation3 + $0x18] sm:$0xe] }
 0x277   : > { %v3415_v0 = vshll.u32 %v5691_v52, 16  ;;  %v2927_v59 = vshll.u32 %v5701_v63, 16  ;;  %v5714_v15 = vcombine.low %v2739_v53, %v2740_v25  ;;  %v3429_v47 = vrot.slane %v3427_v5, 1  ;;  %v4623_v51 = vld [vmem:[#allocation3 + $0x2c] ss:$0 sps:$4 sm:$0x11]  }
 0x278   : > { %3249 = vrot.lane.b32.xlu1 %v3174_v36, %s4723_s13  ;;  %v3425_v8 = vor.u32 %v3424_v11, %v3420_v49  ;;  %v2920_v42 = vshrl.u32 %v5699_v55, 16  ;;  %v2924_v6 = vrot.slane %v2922_v10, 1  ;;  %v3413_v44 = vor.u32 %v3412_v12, %v3408_v9  ;;  %v2824_v3 = vld [vmem:[#allocation3 + $0x24] sm:$0xe]  ;;  %v2759_v28 = vld [vmem:[#allocation3 + $0x18] sm:$0xe] }
 0x279   : > { %3247 = vrot.lane.b32.xlu0 %v3162_v60, %s4723_s13  ;;  %v2934_v43 = vshll.u32 %v5714_v15, 16  ;;  %v3417_v50 = vrot.slane %v3415_v0, 1  ;;  %v4297_v16 = vcombine.low %v2823_v14, %v5681_v21  ;;  %v2929_v19 = vrot.slane %v2927_v59, 1  ;;  %v2760_v24 = vld [vmem:[#allocation3 + $0x24] sm:$0xe] }
 0x27a   : > { %v3430_v20 = vsel %vm1113_vm10, %v3425_v8, %v3429_v47  ;;  %v2925_v31 = vor.u32 %v2924_v6, %v2920_v42  ;;  %v2932_v26 = vshrl.u32 %v5714_v15, 16  ;;  %v2939_v23 = vshll.u32 %v4623_v51, 16  ;;  %v2772_v62 = vld [vmem:[#allocation3 + $0x30] sm:$0xf]  ;;  %v2773_v34 = vld [vmem:[#allocation3 + $0x34] sm:$0xf] }
 0x27b   : > { %v2936_v18 = vrot.slane %v2934_v43, 1  ;;  %v3418_v7 = vsel %vm1113_vm10, %v3413_v44, %v3417_v50  ;;  %v3543_v29 = vrot.slane %v4297_v16, 1  ;;  %v3544_v48 = vrot.slane %v5691_v52, 1  ;;  %v2770_v38 = vld [vmem:[#allocation3 + $0x24] sm:$0xf] }
 0x27c   : > { %3313 = vrot.lane.b32.xlu1 %v3292_v57, %s4724_s16  ;;  %v4298_v30 = vcombine.low %v2824_v3, %v5677_v39  ;;  %v5728_v58 = vld [vmem:[#allocation3 + $0x28] sm:$0xf]  ;;  %v4252_v40 = vcombine.low %v2760_v24, %v2740_v25  ;;  %v4251_v21 = vcombine.low %v2759_v28, %v5695_v35  ;;  %v2930_v41 = vsel %vm1113_vm10, %v2925_v31, %v2929_v19  ;;  %v4629_v22 = vld [vmem:[#allocation3 + $0x38] ss:$0 sps:$4 sm:$0x11]  }
 0x27d   : > { %3311 = vrot.lane.b32.xlu0 %v3289_v33, %s4724_s16  ;;  %v2941_v61 = vrot.slane %v2939_v23, 1  ;;  %v4260_v4 = vcombine.low %v2772_v62, %v2773_v34  ;;  %v3547_v52 = vrot.slane %v5684_v37, 1  ;;  %v4259_v36 = vcombine.low %v2770_v38, %v5728_v58  ;;  %v4630_v49 = vld [vmem:[#allocation3 + $0x2c] ss:$0 sps:$4 sm:$0x11]  }
 0x27e   : > { %v3546_v39 = vrot.slane %v4298_v30, 1  ;;  %v3041_v54 = vrot.slane %v4623_v51, 1  ;;  %v3038_v32 = vrot.slane %v5701_v63, 1  ;;  %v3040_v35 = vrot.slane %v4252_v40, 1  ;;  %v2793_v5 = vld [vmem:[#allocation3 + $0x30] sm:$0xe] }
 0x27f   : > { %v3037_v60 = vrot.slane %v4251_v21, 1  ;;  %v3190_v2 = vshll.u32 %v4260_v4, 16  ;;  %v3178_v11 = vshll.u32 %v4259_v36, 16  ;;  %v3188_v37 = vshrl.u32 %v4260_v4, 16  ;;  %v2805_v57 = vld [vmem:[#allocation3 + $0x3c] sm:$0xf] }
 0x280   : > { %3369 = vrot.lane.b32.xlu1 %v4282_v13, %s4725_s12  ;;  %v2937_v13 = vor.u32 %v2936_v18, %v2932_v26  ;;  %v3548_v45 = vsel %vm1284_vm9, %v3546_v39, %v3547_v52  ;;  %v3042_v63 = vsel %vm1284_vm9, %v3040_v35, %v3041_v54  ;;  %v3195_v56 = vshll.u32 %v4629_v22, 16  ;;  %v5745_v10 = vld [vmem:[#allocation3 + $0x40] sm:$0xf]  ;;  %v2792_v0 = vld [vmem:[#allocation3 + $0x24] sm:$0xe] }
 0x281   : > { %3367 = vrot.lane.b32.xlu0 %v4281_v1, %s4725_s12  ;;  %v3545_v1 = vsel %vm1284_vm9, %v3543_v29, %v3544_v48  ;;  %v3192_v53 = vrot.slane %v3190_v2, 1  ;;  %v3039_v25 = vsel %vm1284_vm9, %v3037_v60, %v3038_v32  ;;  %v3176_v33 = vshrl.u32 %v4259_v36, 16  ;;  %v2803_v59 = vld [vmem:[#allocation3 + $0x30] sm:$0xf]  ;;  %v2804_v14 = vld [vmem:[#allocation3 + $0x34] sm:$0xf] }
 0x282   : > { %v2942_v46 = vsel %vm1113_vm10, %v2937_v13, %v2941_v61  ;;  %v3180_v9 = vrot.slane %v3178_v11, 1  ;;  %v3183_v12 = vshll.u32 %v4630_v49, 16  ;;  %v4284_v8 = vcombine.low %v2805_v57, %v5745_v10  ;;  %v2741_v16 = vld [vmem:[#allocation3 + $0x30] sm:$0xf]  ;;  %v5752_v19 = vld [vmem:[#allocation3 + $0x34] sm:$0xf] }
 0x283   : > { %v3193_v47 = vor.u32 %v3192_v53, %v3188_v37  ;;  %v3197_v42 = vrot.slane %v3195_v56, 1  ;;  %v4276_v6 = vcombine.low %v2793_v5, %v2773_v34  ;;  %v4275_v44 = vcombine.low %v2792_v0, %v5728_v58  ;;  %v4636_v23 = vld [vmem:[#allocation3 + $0x38] ss:$0 sps:$4 sm:$0x11]   ;;  %v2743_v30 = vld [vmem:[#allocation3 + $0x3c] sm:$0xf] }
 0x284   : > { %3505 = vrot.lane.b32.xlu1 %v3430_v20, %s4726_s17  ;;  %v3181_v51 = vor.u32 %v3180_v9, %v3176_v33  ;;  %v3185_v43 = vrot.slane %v3183_v12, 1  ;;  %v4283_v50 = vcombine.low %v2803_v59, %v2804_v14  ;;  %v3297_v3 = vrot.slane %v4629_v22, 1  ;;  %v5755_v20 = vld [vmem:[#allocation3 + $0x44] ss:$0 sps:$4 sm:$0x11]  }
 0x285   : > { %3503 = vrot.lane.b32.xlu0 %v3418_v7, %s4726_s17  ;;  %v3446_v24 = vshll.u32 %v4284_v8, 16  ;;  %v3198_v31 = vsel %vm1113_vm10, %v3193_v47, %v3197_v42  ;;  %v3296_v26 = vrot.slane %v4276_v6, 1  ;;  %v3294_v18 = vrot.slane %v4630_v49, 1  ;;  %v5763_v62 = vld [vmem:[#allocation3 + $0x40] sm:$0xf] }
 0x286   : > { %v5760_v28 = vcombine.low %v2741_v16, %v5752_v19  ;;  %v3186_v7 = vsel %vm1113_vm10, %v3181_v51, %v3185_v43  ;;  %v3293_v29 = vrot.slane %v4275_v44, 1  ;;  %v3434_v48 = vshll.u32 %v4283_v50, 16  ;;  %v5767_v40 = vld [vmem:[#allocation3 + $0x38] ss:$0 sps:$4 sm:$0x11]  }
 0x287   : > { %v3444_v34 = vshrl.u32 %v4284_v8, 16  ;;  %v3448_v38 = vrot.slane %v3446_v24, 1  ;;  %v3451_v58 = vshll.u32 %v5755_v20, 16  ;;  %v3298_v21 = vsel %vm1284_vm9, %v3296_v26, %v3297_v3  ;;  %v2825_v13 = vld [vmem:[#allocation3 + $0x30] sm:$0xe] }
 0x288   : > { %2995 = vrot.lane.b32.xlu1 %v2930_v41, %s4722_s8  ;;  %v2946_v41 = vshll.u32 %v5760_v28, 16  ;;  %v5773_v61 = vcombine.low %v2743_v30, %v5763_v62  ;;  %v3436_v39 = vrot.slane %v3434_v48, 1  ;;  %v3439_v52 = vshll.u32 %v4636_v23, 16  ;;  %v4641_v22 = vld [vmem:[#allocation3 + $0x44] ss:$0 sps:$4 sm:$0x11]  }
 0x289   : > { %3567 = vrot.lane.b32.xlu0 %v3545_v1, %s4727_s10  ;;  %v3432_v1 = vshrl.u32 %v4283_v50, 16  ;;  %v3453_v54 = vrot.slane %v3451_v58, 1  ;;  %v2951_v32 = vshll.u32 %v5767_v40, 16  ;;  %v2944_v35 = vshrl.u32 %v5760_v28, 16  ;;  %v2826_v11 = vld [vmem:[#allocation3 + $0x3c] sm:$0xe] }
 0x28a   : > { %v2948_v60 = vrot.slane %v2946_v41, 1  ;;  %v2958_v2 = vshll.u32 %v5773_v61, 16  ;;  %v3441_v49 = vrot.slane %v3439_v52, 1  ;;  %v3550_v53 = vrot.slane %v4636_v23, 1  ;;  %v2762_v9 = vld [vmem:[#allocation3 + $0x3c] sm:$0xe] }
 0x28b   : > { %v2953_v5 = vrot.slane %v2951_v32, 1  ;;  %v2956_v57 = vshrl.u32 %v5773_v61, 16  ;;  %v2963_v33 = vshll.u32 %v4641_v22, 16  ;;  %v4300_v0 = vcombine.low %v2826_v11, %v5745_v10  ;;  %v2776_v59 = vld [vmem:[#allocation3 + $0x48] sm:$0xf] }
 0x28c   : > { %2997 = vrot.lane.b32.xlu1 %v2942_v46, %s4722_s8  ;;  %v4299_v46 = vcombine.low %v2825_v13, %v2804_v14  ;;  %v2949_v56 = vor.u32 %v2948_v60, %v2944_v35  ;;  %v5787_v14 = vld [vmem:[#allocation3 + $0x4c] sm:$0xf]  ;;  %v2774_v47 = vld [vmem:[#allocation3 + $0x3c] sm:$0xf]  ;;  %v5789_v42 = vld [vmem:[#allocation3 + $0x40] sm:$0xf]  ;;  %v4254_v51 = vcombine.low %v2762_v9, %v5763_v62 }
 0x28d   : > { %3569 = vrot.lane.b32.xlu0 %v3548_v45, %s4727_s10  ;;  %v3437_v45 = vor.u32 %v3436_v39, %v3432_v1  ;;  %v3553_v6 = vrot.slane %v5755_v20, 1  ;;  %v4262_v10 = vcombine.low %v2776_v59, %v5787_v14  ;;  %v3552_v3 = vrot.slane %v4300_v0, 1  ;;  %v5801_v20 = vld [vmem:[#allocation3 + $0x50] ss:$0 sps:$4 sm:$0x11]  }
 0x28e   : > { %v2954_v43 = vsel %vm1113_vm10, %v2949_v56, %v2953_v5  ;;  %v3047_v23 = vrot.slane %v4641_v22, 1  ;;  %v2795_v58 = vld [vmem:[#allocation3 + $0x48] sm:$0xe]  ;;  %v5814_v1 = vld [vmem:[#allocation3 + $0x58] sm:$0xf]  ;;  %vm6083_vm6 = vcmask 1041408  }
 0x28f   : > { %v3442_v12 = vsel %vm1113_vm10, %v3437_v45, %v3441_v49  ;;  %v3554_v48 = vsel %vm1284_vm9, %v3552_v3, %v3553_v6  ;;  %v5817_v32 = vld [vmem:[#allocation3 + $0x4c] sm:$0xf]  ;;  %v4677_v0 = vld [vmem:[%s6067_s5 + $0x10] ss:$0 sps:$4 sm:$0x33]   ;;  %vm6084_vm7 = vmmov %vm6083_vm6 }
 0x290   : > { %3061 = vrot.lane.b32.xlu1 %v3042_v63, %s4721_s25  ;;  %v3549_v63 = vrot.slane %v4299_v46, 1  ;;  %v5825_v5 = vld [vmem:[#allocation3 + $0x4c] sm:$0xf]  ;;  %4457 = vmatprep.subr.msk.bf16.mxu1 %vm6083_vm6, %v4677_v0  ;;  %v3755_v6 = vsel %vm6084_vm7, %v4677_v0, 0 }
 0x291   : > { %3059 = vrot.lane.b32.xlu0 %v3039_v25, %s4721_s25  ;;  %v2960_v25 = vrot.slane %v2958_v2, 1  ;;  %v4278_v2 = vcombine.low %v2795_v58, %v5787_v14  ;;  %4439 = vmatpush3.bf16.msra.mxu1 %v3755_v6 }
 0x292   : > { %v3551_v16 = vsel %vm1284_vm9, %v3549_v63, %v3550_v53  ;;  %v3303_v63 = vrot.slane %v5801_v20, 1  ;;  %v5828_v53 = vld [vmem:[#allocation3 + $0x5c] ss:$0 sps:$4 sm:$0x11]  }
 0x293   : > { %v2961_v44 = vor.u32 %v2960_v25, %v2956_v57  ;;  %v5832_v25 = vld [vmem:[#allocation3 + $0x50] ss:$0 sps:$4 sm:$0x11]   ;;  %v3302_v9 = vrot.slane %v4278_v2, 1  ;;  %v2763_v2 = vld [vmem:[#allocation3 + $0x48] sm:$0xe] }
 0x294   : > { %3117 = vrot.lane.b32.xlu1 %v4260_v4, %s4720_s23  ;;  %v3295_v4 = vsel %vm1284_vm9, %v3293_v29, %v3294_v18  ;;  %v3046_v18 = vrot.slane %v4254_v51, 1  ;;  %v5805_v29 = vld [vmem:[#allocation3 + $0x44] ss:$0 sps:$4 sm:$0x11]  }
 0x295   : > { %3115 = vrot.lane.b32.xlu0 %v4259_v36, %s4720_s23  ;;  %v3449_v36 = vor.u32 %v3448_v38, %v3444_v34  ;;  %v3212_v34 = vshrl.u32 %v4262_v10, 16  ;;  %v3219_v38 = vshll.u32 %v5801_v20, 16  ;;  %v3207_v13 = vshll.u32 %v5805_v29, 16 }
 0x296   : > { %v3300_v56 = vrot.slane %v5805_v29, 1 }
 0x297   : > { %v3454_v37 = vsel %vm1113_vm10, %v3449_v36, %v3453_v54  ;;  %v2794_v36 = vld [vmem:[#allocation3 + $0x3c] sm:$0xe]  ;;  %v2807_v54 = vld [vmem:[#allocation3 + $0x48] sm:$0xf]  ;;  %v3221_v60 = vrot.slane %v3219_v38, 1  ;;  %v3209_v22 = vrot.slane %v3207_v13, 1 }
 0x298   : > { %3253 = vrot.lane.b32.xlu1 %v3198_v31, %s4723_s13  ;;  %v4261_v31 = vcombine.low %v2774_v47, %v5789_v42  ;;  %v4277_v49 = vcombine.low %v2794_v36, %v5789_v42  ;;  %v4285_v11 = vcombine.low %v2807_v54, %v5817_v32  ;;  %v2747_v47 = vld [vmem:[#allocation3 + $0x54] sm:$0xf]  ;;  %v2748_v42 = vld [vmem:[#allocation3 + $0x58] sm:$0xf] }
 0x299   : > { %3251 = vrot.lane.b32.xlu0 %v3186_v7, %s4723_s13  ;;  %v3214_v7 = vshll.u32 %v4262_v10, 16  ;;  %v5852_v3 = vcombine.low %v2747_v47, %v2748_v42  ;;  %v2764_v36 = vld [vmem:[#allocation3 + $0x54] sm:$0xe] }
 0x29a   : > { %v3202_v62 = vshll.u32 %v4261_v31, 16  ;;  %v3299_v14 = vrot.slane %v4277_v49, 1  ;;  %v2779_v49 = vld [vmem:[#allocation3 + $0x58] sm:$0xf] }
 0x29b   : > { %v3216_v41 = vrot.slane %v3214_v7, 1 }
 0x29c   : > { %3317 = vrot.lane.b32.xlu1 %v3298_v21, %s4724_s16  ;;  %v3048_v21 = vsel %vm1284_vm9, %v3046_v18, %v3047_v23  ;;  %v3204_v52 = vrot.slane %v3202_v62, 1  ;;  %v2827_v18 = vld [vmem:[#allocation3 + $0x48] sm:$0xe]  ;;  %v2982_v62 = vshll.u32 %v5852_v3, 16 }
 0x29d   : > { %3315 = vrot.lane.b32.xlu0 %v3295_v4, %s4724_s16  ;;  %v2809_v4 = vld [vmem:[#allocation3 + $0x54] sm:$0xf]  ;;  %v3217_v35 = vor.u32 %v3216_v41, %v3212_v34  ;;  %v4301_v58 = vcombine.low %v2827_v18, %v5817_v32 }
 0x29e   : > { %v4286_v46 = vcombine.low %v2809_v4, %v5814_v1 }
 0x2a0   : > { %3373 = vrot.lane.b32.xlu1 %v4284_v8, %s4725_s12  ;;  %v2761_v8 = vld [vmem:[#allocation3 + $0x30] sm:$0xe]  ;;  %v3470_v57 = vshll.u32 %v4286_v46, 16  ;;  %v3468_v51 = vshrl.u32 %v4286_v46, 16 }
 0x2a1   : > { %3371 = vrot.lane.b32.xlu0 %v4283_v50, %s4725_s12  ;;  %v2965_v50 = vrot.slane %v2963_v33, 1  ;;  %v4253_v24 = vcombine.low %v2761_v8, %v5752_v19  ;;  %v3044_v19 = vrot.slane %v5767_v40, 1  ;;  %v3200_v40 = vshrl.u32 %v4261_v31, 16 }
 0x2a2   : > { %v3222_v33 = vsel %vm1113_vm10, %v3217_v35, %v3221_v60  ;;  %v3458_v8 = vshll.u32 %v4285_v11, 16  ;;  %v3555_v35 = vrot.slane %v4301_v58, 1  ;;  %v3556_v60 = vrot.slane %v5832_v25, 1 }
 0x2a3   : > { %v2966_v26 = vsel %vm1113_vm10, %v2961_v44, %v2965_v50  ;;  %v3043_v30 = vrot.slane %v4253_v24, 1  ;;  %v3205_v45 = vor.u32 %v3204_v52, %v3200_v40  ;;  %v3475_v44 = vshll.u32 %v5828_v53, 16  ;;  %v5847_v50 = vld [vmem:[#allocation3 + $0x50] ss:$0 sps:$4 sm:$0x11]  }
 0x2a4   : > { %3509 = vrot.lane.b32.xlu1 %v3454_v37, %s4726_s17  ;;  %v2745_v37 = vld [vmem:[#allocation3 + $0x48] sm:$0xf]  ;;  %v3301_v24 = vsel %vm1284_vm9, %v3299_v14, %v3300_v56  ;;  %v3460_v20 = vrot.slane %v3458_v8, 1  ;;  %v2975_v29 = vshll.u32 %v5847_v50, 16  ;;  %v2984_v40 = vrot.slane %v2982_v62, 1 }
 0x2a5   : > { %3507 = vrot.lane.b32.xlu0 %v3442_v12, %s4726_s17  ;;  %v3045_v39 = vsel %vm1284_vm9, %v3043_v30, %v3044_v19  ;;  %v5837_v12 = vcombine.low %v2745_v37, %v5825_v5  ;;  %v3210_v59 = vsel %vm1113_vm10, %v3205_v45, %v3209_v22  ;;  %v3477_v7 = vrot.slane %v3475_v44, 1  ;;  %v4659_v19 = vld [vmem:[#allocation3 + $0x5c] ss:$0 sps:$4 sm:$0x11]   ;;  %v2780_v22 = vld [vmem:[#allocation3 + $0x60] sm:$0xf] }
 0x2a6   : > { %v2977_v13 = vrot.slane %v2975_v29, 1  ;;  %v2987_v52 = vshll.u32 %v4659_v19, 16  ;;  %v2778_v45 = vld [vmem:[#allocation3 + $0x54] sm:$0xf]  ;;  %v4256_v37 = vcombine.low %v2764_v36, %v2748_v42  ;;  %v3053_v14 = vrot.slane %v4659_v19, 1 }
 0x2a7   : > { %v4263_v0 = vcombine.low %v2778_v45, %v2779_v49  ;;  %v4665_v8 = vld [vmem:[#allocation3 + $0x68] ss:$0 sps:$4 sm:$0x11]   ;;  %v2814_v29 = vld [vmem:[#allocation3 + $0x70] sm:$0xf] }
 0x2a8   : > { %2999 = vrot.lane.b32.xlu1 %v2954_v43, %s4722_s8  ;;  %v3472_v43 = vrot.slane %v3470_v57, 1  ;;  %v2989_v57 = vrot.slane %v2987_v52, 1  ;;  %v4671_v52 = vld [vmem:[#allocation3 + $0x74] ss:$0 sps:$4 sm:$0x11]  }
 0x2a9   : > { %3571 = vrot.lane.b32.xlu0 %v3551_v16, %s4727_s10  ;;  %v2970_v16 = vshll.u32 %v5837_v12, 16  ;;  %v3226_v44 = vshll.u32 %v4263_v0, 16 }
 0x2aa   : > { %v3473_v23 = vor.u32 %v3472_v43, %v3468_v51  ;;  %v3050_v51 = vrot.slane %v5847_v50, 1  ;;  %v4666_v43 = vld [vmem:[#allocation3 + $0x5c] ss:$0 sps:$4 sm:$0x11]   ;;  %v2796_v50 = vld [vmem:[#allocation3 + $0x54] sm:$0xe] }
 0x2ab   : > { %v2972_v30 = vrot.slane %v2970_v16, 1  ;;  %v3228_v18 = vrot.slane %v3226_v44, 1 }
 0x2ac   : > { %3001 = vrot.lane.b32.xlu1 %v2966_v26, %s4722_s8  ;;  %v3463_v26 = vshll.u32 %v5832_v25, 16  ;;  %v3478_v41 = vsel %vm1113_vm10, %v3473_v23, %v3477_v7  ;;  %v3557_v25 = vsel %vm1284_vm9, %v3555_v35, %v3556_v60  ;;  %v3231_v23 = vshll.u32 %v4666_v43, 16  ;;  %v2813_v7 = vld [vmem:[#allocation3 + $0x6c] sm:$0xf] }
 0x2ad   : > { %3573 = vrot.lane.b32.xlu0 %v3554_v48, %s4727_s10  ;;  %v2968_v48 = vshrl.u32 %v5837_v12, 16  ;;  %v3306_v60 = vrot.slane %v4666_v43, 1 }
 0x2ae   : > { %v3465_v38 = vrot.slane %v3463_v26, 1 }
 0x2af   : > { %v2973_v4 = vor.u32 %v2972_v30, %v2968_v48  ;;  %v2811_v48 = vld [vmem:[#allocation3 + $0x60] sm:$0xf]  ;;  %v2812_v30 = vld [vmem:[#allocation3 + $0x64] sm:$0xf] }
 0x2b0   : > { %3065 = vrot.lane.b32.xlu1 %v3048_v21, %s4721_s25  ;;  %v2828_v21 = vld [vmem:[#allocation3 + $0x54] sm:$0xe] }
 0x2b1   : > { %3063 = vrot.lane.b32.xlu0 %v3045_v39, %s4721_s25  ;;  %v2980_v39 = vshrl.u32 %v5852_v3, 16  ;;  %v4302_v32 = vcombine.low %v2828_v21, %v5814_v1  ;;  %v3233_v21 = vrot.slane %v3231_v23, 1 }
 0x2b3   : > { %v2985_v56 = vor.u32 %v2984_v40, %v2980_v39  ;;  %v3558_v1 = vrot.slane %v4302_v32, 1  ;;  %v3309_v40 = vrot.slane %v4665_v8, 1  ;;  %v4672_v32 = vld [vmem:[#allocation3 + $0x68] ss:$0 sps:$4 sm:$0x11]  }
 0x2b4   : > { %3121 = vrot.lane.b32.xlu1 %v4262_v10, %s4720_s23  ;;  %v3304_v10 = vsel %vm1284_vm9, %v3302_v9, %v3303_v63  ;;  %v2978_v63 = vsel %vm1113_vm10, %v2973_v4, %v2977_v13  ;;  %v4255_v9 = vcombine.low %v2763_v2, %v5825_v5  ;;  %v4287_v13 = vcombine.low %v2811_v48, %v2812_v30 }
 0x2b5   : > { %3119 = vrot.lane.b32.xlu0 %v4261_v31, %s4720_s23  ;;  %v3456_v31 = vshrl.u32 %v4285_v11, 16 }
 0x2b6   : > { %v3049_v6 = vrot.slane %v4255_v9, 1 }
 0x2b7   : > { %v3461_v34 = vor.u32 %v3460_v20, %v3456_v31  ;;  %v3224_v31 = vshrl.u32 %v4263_v0, 16  ;;  %v2797_v20 = vld [vmem:[#allocation3 + $0x60] sm:$0xe] }
 0x2b8   : > { %3257 = vrot.lane.b32.xlu1 %v3222_v33, %s4723_s13  ;;  %v3051_v26 = vsel %vm1284_vm9, %v3049_v6, %v3050_v51  ;;  %v3565_v6 = vrot.slane %v4671_v52, 1 }
 0x2b9   : > { %3255 = vrot.lane.b32.xlu0 %v3210_v59, %s4723_s13  ;;  %v3466_v54 = vsel %vm1113_vm10, %v3461_v34, %v3465_v38  ;;  %v3052_v59 = vrot.slane %v4256_v37, 1  ;;  %v4288_v38 = vcombine.low %v2813_v7, %v2814_v29  ;;  %v3229_v58 = vor.u32 %v3228_v18, %v3224_v31 }
 0x2ba   : > { %v3480_v37 = vshrl.u32 %v4287_v13, 16 }
 0x2bb   : > { %v3054_v5 = vsel %vm1284_vm9, %v3052_v59, %v3053_v14  ;;  %v3494_v36 = vshll.u32 %v4288_v38, 16  ;;  %v3492_v2 = vshrl.u32 %v4288_v38, 16 }
 0x2bc   : > { %3321 = vrot.lane.b32.xlu1 %v3304_v10, %s4724_s16 }
 0x2bd   : > { %3319 = vrot.lane.b32.xlu0 %v3301_v24, %s4724_s16  ;;  %v3243_v24 = vshll.u32 %v4665_v8, 16  ;;  %v3496_v45 = vrot.slane %v3494_v36, 1 }
 0x2bf   : > { %v3245_v62 = vrot.slane %v3243_v24, 1 }
 0x2c0   : > { %3377 = vrot.lane.b32.xlu1 %v4286_v46, %s4725_s12  ;;  %v2781_v46 = vld [vmem:[#allocation3 + $0x64] sm:$0xf] }
 0x2c1   : > { %3375 = vrot.lane.b32.xlu0 %v4285_v11, %s4725_s12  ;;  %v3559_v11 = vrot.slane %v5828_v53, 1  ;;  %v4264_v33 = vcombine.low %v2780_v22, %v2781_v46  ;;  %v2990_v53 = vsel %vm1113_vm10, %v2985_v56, %v2989_v57  ;;  %v4280_v34 = vcombine.low %v2797_v20, %v2781_v46  ;;  %v2830_v57 = vld [vmem:[#allocation3 + $0x6c] sm:$0xe] }
 0x2c2   : > { %v3482_v22 = vshll.u32 %v4287_v13, 16  ;;  %v3487_v56 = vshll.u32 %v4672_v32, 16 }
 0x2c3   : > { %v3238_v47 = vshll.u32 %v4264_v33, 16  ;;  %v3560_v42 = vsel %vm1284_vm9, %v3558_v1, %v3559_v11  ;;  %v3236_v10 = vshrl.u32 %v4264_v33, 16  ;;  %v3308_v39 = vrot.slane %v4280_v34, 1 }
 0x2c4   : > { %3513 = vrot.lane.b32.xlu1 %v3478_v41, %s4726_s17  ;;  %v4279_v41 = vcombine.low %v2796_v50, %v2779_v49  ;;  %v3499_v49 = vshll.u32 %v4671_v52, 16  ;;  %v3497_v1 = vor.u32 %v3496_v45, %v3492_v2 }
 0x2c5   : > { %3511 = vrot.lane.b32.xlu0 %v3466_v54, %s4726_s17  ;;  %v3240_v16 = vrot.slane %v3238_v47, 1  ;;  %v3234_v54 = vsel %vm1113_vm10, %v3229_v58, %v3233_v21  ;;  %v3310_v46 = vsel %vm1284_vm9, %v3308_v39, %v3309_v40 }
 0x2c6   : > { %v3305_v35 = vrot.slane %v4279_v41, 1  ;;  %v3501_v9 = vrot.slane %v3499_v49, 1 }
 0x2c7   : > { %v3241_v19 = vor.u32 %v3240_v16, %v3236_v10 }
 0x2c8   : > { %3003 = vrot.lane.b32.xlu1 %v2978_v63, %s4722_s8  ;;  %v3307_v11 = vsel %vm1284_vm9, %v3305_v35, %v3306_v60  ;;  %v3484_v63 = vrot.slane %v3482_v22, 1  ;;  %v3502_v47 = vsel %vm1113_vm10, %v3497_v1, %v3501_v9 }
 0x2c9   : > { %3575 = vrot.lane.b32.xlu0 %v3557_v25, %s4727_s10  ;;  %v3246_v4 = vsel %vm1113_vm10, %v3241_v19, %v3245_v62 }
 0x2ca   : > { %v3485_v14 = vor.u32 %v3484_v63, %v3480_v37 }
 0x2cc   : > { %3005 = vrot.lane.b32.xlu1 %v2990_v53, %s4722_s8  ;;  %v3489_v53 = vrot.slane %v3487_v56, 1 }
 0x2cd   : > { %3577 = vrot.lane.b32.xlu0 %v3560_v42, %s4727_s10 }
 0x2ce   : > { %v3490_v43 = vsel %vm1113_vm10, %v3485_v14, %v3489_v53 }
 0x2d0   : > { %3069 = vrot.lane.b32.xlu1 %v3054_v5, %s4721_s25  ;;  %v3562_v5 = vrot.slane %v4672_v32, 1 }
 0x2d1   : > { %3067 = vrot.lane.b32.xlu0 %v3051_v26, %s4721_s25 }
 0x2d4   : > { %3125 = vrot.lane.b32.xlu1 %v4264_v33, %s4720_s23  ;;  %v2829_v33 = vld [vmem:[#allocation3 + $0x60] sm:$0xe] }
 0x2d5   : > { %3123 = vrot.lane.b32.xlu0 %v4263_v0, %s4720_s23  ;;  %v4304_v0 = vcombine.low %v2830_v57, %v2814_v29  ;;  %v4303_v8 = vcombine.low %v2829_v33, %v2812_v30 }
 0x2d7   : > { %v3564_v42 = vrot.slane %v4304_v0, 1  ;;  %v3561_v44 = vrot.slane %v4303_v8, 1 }
 0x2d8   : > { %3261 = vrot.lane.b32.xlu1 %v3246_v4, %s4723_s13 }
 0x2d9   : > { %3259 = vrot.lane.b32.xlu0 %v3234_v54, %s4723_s13  ;;  %v3566_v16 = vsel %vm1284_vm9, %v3564_v42, %v3565_v6  ;;  %v3563_v31 = vsel %vm1284_vm9, %v3561_v44, %v3562_v5 }
 0x2da   : > { %v3112_v25 = vpop.permute.xlu0 %3111 }
 0x2dc   : > { %3325 = vrot.lane.b32.xlu1 %v3310_v46, %s4724_s16 }
 0x2dd   : > { %3323 = vrot.lane.b32.xlu0 %v3307_v11, %s4724_s16 }
 0x2de   : > { %v3056_v59 = vpop.permute.xlu1 %3055 }
 0x2e0   : > { %3381 = vrot.lane.b32.xlu1 %v4288_v38, %s4725_s12 }
 0x2e1   : > { %3379 = vrot.lane.b32.xlu0 %v4287_v13, %s4725_s12 }
 0x2e2   : > { %v3058_v51 = vpop.permute.xlu1 %3057 }
 0x2e3   : > { %v2992_v10 = vpop.permute.xlu0 %2991 }
 0x2e4   : > { %3517 = vrot.lane.b32.xlu1 %v3502_v47, %s4726_s17  ;;  %v3584_v29 = vsel %vm1975_vm12, %v5662_v17, %v2992_v10 }
 0x2e5   : > { %3515 = vrot.lane.b32.xlu0 %v3490_v43, %s4726_s17  ;;  %v3600_v19 = vsel %vm1996_vm13, %v3584_v29, %v3056_v59 }
 0x2e6   : > { %v3114_v24 = vpop.permute.xlu1 %3113  ;;  %v3616_v38 = vsel %vm2017_vm14, %v3600_v19, %v3112_v25 }
 0x2e7   : > { %v2994_v20 = vpop.permute.xlu0 %2993 }
 0x2e8   : > { %3581 = vrot.lane.b32.xlu1 %v3566_v16, %s4727_s10  ;;  %v3586_v48 = vsel %vm1975_vm12, %v5665_v27, %v2994_v20 }
 0x2e9   : > { %3579 = vrot.lane.b32.xlu0 %v3563_v31, %s4727_s10  ;;  %v3602_v62 = vsel %vm1996_vm13, %v3586_v48, %v3058_v51 }
 0x2ea   : > { %v3250_v26 = vpop.permute.xlu1 %3249  ;;  %v3618_v41 = vsel %vm2017_vm14, %v3602_v62, %v3114_v24 }
 0x2eb   : > { %v3248_v18 = vpop.permute.xlu0 %3247  ;;  %v3634_v40 = vsel %vm2038_vm15, %v3618_v41, %v3250_v26 }
 0x2ec   : > { %v3632_v21 = vsel %vm2038_vm15, %v3616_v38, %v3248_v18 }
 0x2ee   : > { %v3314_v23 = vpop.permute.xlu1 %3313 }
 0x2ef   : > { %v3312_v7 = vpop.permute.xlu0 %3311  ;;  %v3650_v36 = vsel %vm2059_vm1, %v3634_v40, %v3314_v23 }
 0x2f0   : > { %v3648_v13 = vsel %vm2059_vm1, %v3632_v21, %v3312_v7 }
 0x2f2   : > { %v3370_v50 = vpop.permute.xlu1 %3369 }
 0x2f3   : > { %v3368_v30 = vpop.permute.xlu0 %3367  ;;  %v3666_v54 = vsel %vm2080_vm3, %v3650_v36, %v3370_v50 }
 0x2f4   : > { %v3664_v17 = vsel %vm2080_vm3, %v3648_v13, %v3368_v30 }
 0x2f6   : > { %v3506_v34 = vpop.permute.xlu1 %3505 }
 0x2f7   : > { %v3504_v58 = vpop.permute.xlu0 %3503  ;;  %v3682_v60 = vsel %vm2101_vm5, %v3666_v54, %v3506_v34 }
 0x2f8   : > { %v3680_v27 = vsel %vm2101_vm5, %v3664_v17, %v3504_v58 }
 0x2fa   : > { %v2996_v4 = vpop.permute.xlu1 %2995 }
 0x2fb   : > { %v3568_v39 = vpop.permute.xlu0 %3567  ;;  %v3588_v25 = vsel %vm1975_vm12, %v5699_v55, %v2996_v4 }
 0x2fc   : > { %v3696_v52 = vsel %vm2122_vm11, %v3680_v27, %v3568_v39 }
 0x2fd   : > { %4440 = vmatprep.mubr.msk.bf16.mxu1 %vm2170_vm0, %v3696_v52 }
 0x2fe   : > { %v2998_v35 = vpop.permute.xlu1 %2997 }
 0x2ff   : > { %v3570_v32 = vpop.permute.xlu0 %3569  ;;  %v3590_v53 = vsel %vm1975_vm12, %v5714_v15, %v2998_v35 }
 0x300   : > { %v3698_v22 = vsel %vm2122_vm11, %v3682_v60, %v3570_v32 }
 0x301   : > { %4441 = vmatmul.mubr.msk.bf16.vlgmr.msra.gmra.mrb[0].mxu1 %vm2170_vm0, %v3698_v22 }
 0x302   : > { %v3062_v46 = vpop.permute.xlu1 %3061 }
 0x303   : > { %v3060_v2 = vpop.permute.xlu0 %3059  ;;  %v3606_v47 = vsel %vm1996_vm13, %v3590_v53, %v3062_v46 }
 0x304   : > { %v3604_v1 = vsel %vm1996_vm13, %v3588_v25, %v3060_v2 }
 0x306   : > { %v3118_v45 = vpop.permute.xlu1 %3117 }
 0x307   : > { %v3116_v49 = vpop.permute.xlu0 %3115  ;;  %v3622_v55 = vsel %vm2017_vm14, %v3606_v47, %v3118_v45 }
 0x308   : > { %v3620_v0 = vsel %vm2017_vm14, %v3604_v1, %v3116_v49 }
 0x30a   : > { %v3254_v11 = vpop.permute.xlu1 %3253 }
 0x30b   : > { %v3252_v37 = vpop.permute.xlu0 %3251  ;;  %v3638_v44 = vsel %vm2038_vm15, %v3622_v55, %v3254_v11 }
 0x30c   : > { %v3636_v14 = vsel %vm2038_vm15, %v3620_v0, %v3252_v37 }
 0x30e   : > { %v3318_v63 = vpop.permute.xlu1 %3317 }
 0x30f   : > { %v3316_v56 = vpop.permute.xlu0 %3315  ;;  %v3654_v10 = vsel %vm2059_vm1, %v3638_v44, %v3318_v63 }
 0x310   : > { %v3652_v8 = vsel %vm2059_vm1, %v3636_v14, %v3316_v56 }
 0x312   : > { %v3374_v57 = vpop.permute.xlu1 %3373 }
 0x313   : > { %v3372_v33 = vpop.permute.xlu0 %3371  ;;  %v3670_v15 = vsel %vm2080_vm3, %v3654_v10, %v3374_v57 }
 0x314   : > { %v3668_v42 = vsel %vm2080_vm3, %v3652_v8, %v3372_v33 }
 0x316   : > { %v3510_v9 = vpop.permute.xlu1 %3509 }
 0x317   : > { %v3508_v59 = vpop.permute.xlu0 %3507  ;;  %v3686_v24 = vsel %vm2101_vm5, %v3670_v15, %v3510_v9 }
 0x318   : > { %v3684_v51 = vsel %vm2101_vm5, %v3668_v42, %v3508_v59 }
 0x31a   : > { %v3000_v6 = vpop.permute.xlu1 %2999 }
 0x31b   : > { %v3572_v43 = vpop.permute.xlu0 %3571  ;;  %v3592_v34 = vsel %vm1975_vm12, %v5760_v28, %v3000_v6 }
 0x31c   : > { %v3700_v5 = vsel %vm2122_vm11, %v3684_v51, %v3572_v43 }
 0x31d   : > { %4444 = vmatprep.mubr.msk.bf16.mxu1 %vm2170_vm0, %v3700_v5 }
 0x31e   : > { %v3002_v16 = vpop.permute.xlu1 %3001 }
 0x31f   : > { %v3574_v31 = vpop.permute.xlu0 %3573  ;;  %v3594_v17 = vsel %vm1975_vm12, %v5773_v61, %v3002_v16 }
 0x320   : > { %v3702_v20 = vsel %vm2122_vm11, %v3686_v24, %v3574_v31  ;;  %v4377_v31 = vld [vmem:[%s4883_s19 + $0x8] sm:$0xff]  }
 0x321   : > { %4445 = vmatmul.mubr.msk.bf16.gmra.mrb[4].mxu1 %vm2170_vm0, %v3702_v20  ;;  %v4346_v20 = vld [vmem:[%s4883_s19] sm:$0xff]  }
 0x322   : > { %v3066_v26 = vpop.permute.xlu1 %3065 }
 0x323   : > { %v3064_v18 = vpop.permute.xlu0 %3063  ;;  %v3610_v27 = vsel %vm1996_vm13, %v3594_v17, %v3066_v26  ;;  %v5991_v26 = vld [vmem:[%s6068_s6] ss:$0 sm:$0xff] }
 0x324   : > { %v3608_v38 = vsel %vm1996_vm13, %v3592_v34, %v3064_v18  ;;  %v4351_v18 = vunpack.c.l.bf16 %v4377_v31 }
 0x326   : > { %v3122_v23 = vpop.permute.xlu1 %3121 }
 0x327   : > { %v3120_v7 = vpop.permute.xlu0 %3119  ;;  %v3626_v28 = vsel %vm2017_vm14, %v3610_v27, %v3122_v23 }
 0x328   : > { %v3624_v21 = vsel %vm2017_vm14, %v3608_v38, %v3120_v7  ;;  %v4347_v7 = vunpack.c.l.bf16 %v4346_v20 }
 0x32a   : > { %v3258_v29 = vpop.permute.xlu1 %3257 }
 0x32b   : > { %v3256_v50 = vpop.permute.xlu0 %3255  ;;  %v3642_v54 = vsel %vm2038_vm15, %v3626_v28, %v3258_v29  ;;  %v4379_v28 = vld [vmem:[%s4883_s19 + $0x18] sm:$0xff]  }
 0x32c   : > { %v3640_v13 = vsel %vm2038_vm15, %v3624_v21, %v3256_v50 }
 0x32e   : > { %v3322_v48 = vpop.permute.xlu1 %3321 }
 0x32f   : > { %v3320_v30 = vpop.permute.xlu0 %3319  ;;  %v3658_v60 = vsel %vm2059_vm1, %v3642_v54, %v3322_v48  ;;  %v4352_v48 = vunpack.c.h.bf16 %v4377_v31 }
 0x330   : > { %v3656_v4 = vsel %vm2059_vm1, %v3640_v13, %v3320_v30 }
 0x332   : > { %v3378_v19 = vpop.permute.xlu1 %3377 }
 0x333   : > { %v3376_v62 = vpop.permute.xlu0 %3375  ;;  %v3674_v61 = vsel %vm2080_vm3, %v3658_v60, %v3378_v19 }
 0x334   : > { %v3672_v39 = vsel %vm2080_vm3, %v3656_v4, %v3376_v62  ;;  %v4348_v62 = vunpack.c.h.bf16 %v4346_v20 }
 0x336   : > { %v3514_v58 = vpop.permute.xlu1 %3513 }
 0x337   : > { %v3512_v41 = vpop.permute.xlu0 %3511  ;;  %v3690_v22 = vsel %vm2101_vm5, %v3674_v61, %v3514_v58 }
 0x338   : > { %v3688_v52 = vsel %vm2101_vm5, %v3672_v39, %v3512_v41 }
 0x33a   : > { %v3004_v40 = vpop.permute.xlu1 %3003 }
 0x33b   : > { %v3576_v36 = vpop.permute.xlu0 %3575  ;;  %v3596_v0 = vsel %vm1975_vm12, %v5837_v12, %v3004_v40 }
 0x33c   : > { %v3704_v35 = vsel %vm2122_vm11, %v3688_v52, %v3576_v36  ;;  %v4378_v52 = vld [vmem:[%s4883_s19 + $0x10] sm:$0xff]   ;;  %v4359_v36 = vunpack.c.l.bf16 %v4379_v28 }
 0x33d   : > { %4448 = vmatprep.mubr.msk.bf16.mxu1 %vm2170_vm0, %v3704_v35  ;;  %v4355_v35 = vunpack.c.l.bf16 %v4378_v52 }
 0x33e   : > { %v3006_v32 = vpop.permute.xlu1 %3005 }
 0x33f   : > { %v3578_v46 = vpop.permute.xlu0 %3577  ;;  %v3598_v9 = vsel %vm1975_vm12, %v5852_v3, %v3006_v32  ;;  %v4360_v32 = vunpack.c.h.bf16 %v4379_v28 }
 0x340   : > { %v3706_v2 = vsel %vm2122_vm11, %v3690_v22, %v3578_v46 }
 0x341   : > { %4449 = vmatmul.mubr.msk.bf16.gmra.mrb[8].mxu1 %vm2170_vm0, %v3706_v2  ;;  %v4356_v2 = vunpack.c.h.bf16 %v4378_v52 }
 0x342   : > { %v3070_v45 = vpop.permute.xlu1 %3069 }
 0x343   : > { %v3068_v49 = vpop.permute.xlu0 %3067  ;;  %v3614_v59 = vsel %vm1996_vm13, %v3598_v9, %v3070_v45 }
 0x344   : > { %v3612_v14 = vsel %vm1996_vm13, %v3596_v0, %v3068_v49  ;;  %v4381_v0 = vld [vmem:[%s4883_s19 + $0x28] sm:$0xff]  }
 0x346   : > { %v3126_v11 = vpop.permute.xlu1 %3125 }
 0x347   : > { %v3124_v37 = vpop.permute.xlu0 %3123  ;;  %v3630_v53 = vsel %vm2017_vm14, %v3614_v59, %v3126_v11  ;;  %v4380_v59 = vld [vmem:[%s4883_s19 + $0x20] sm:$0xff]  }
 0x348   : > { %v3628_v47 = vsel %vm2017_vm14, %v3612_v14, %v3124_v37  ;;  %v4367_v14 = vunpack.c.l.bf16 %v4381_v0 }
 0x34a   : > { %v3262_v63 = vpop.permute.xlu1 %3261 }
 0x34b   : > { %v3260_v56 = vpop.permute.xlu0 %3259  ;;  %v3646_v42 = vsel %vm2038_vm15, %v3630_v53, %v3262_v63 }
 0x34c   : > { %v3644_v55 = vsel %vm2038_vm15, %v3628_v47, %v3260_v56 }
 0x34e   : > { %v3326_v57 = vpop.permute.xlu1 %3325 }
 0x34f   : > { %v3324_v33 = vpop.permute.xlu0 %3323  ;;  %v3662_v3 = vsel %vm2059_vm1, %v3646_v42, %v3326_v57 }
 0x350   : > { %v3660_v12 = vsel %vm2059_vm1, %v3644_v55, %v3324_v33 }
 0x352   : > { %v3382_v25 = vpop.permute.xlu1 %3381 }
 0x353   : > { %v3380_v1 = vpop.permute.xlu0 %3379  ;;  %v3678_v51 = vsel %vm2080_vm3, %v3662_v3, %v3382_v25 }
 0x354   : > { %v3676_v43 = vsel %vm2080_vm3, %v3660_v12, %v3380_v1  ;;  %v4364_v12 = vunpack.c.h.bf16 %v4380_v59 }
 0x356   : > { %v3518_v8 = vpop.permute.xlu1 %3517 }
 0x357   : > { %v3516_v6 = vpop.permute.xlu0 %3515  ;;  %v3694_v44 = vsel %vm2101_vm5, %v3678_v51, %v3518_v8  ;;  %v4363_v8 = vunpack.c.l.bf16 %v4380_v59 }
 0x358   : > { %v3692_v10 = vsel %vm2101_vm5, %v3676_v43, %v3516_v6  ;;  %v4368_v6 = vunpack.c.h.bf16 %v4381_v0 }
 0x35a   : > { %v3582_v5 = vpop.permute.xlu1 %3581 }
 0x35b   : > { %v3710_v15 = vsel %vm2122_vm11, %v3694_v44, %v3582_v5  ;;  %v3580_v16 = vpop.permute.xlu0 %3579 }
 0x35c   : > { %v3708_v24 = vsel %vm2122_vm11, %v3692_v10, %v3580_v16 }
 0x35d   : > { %4452 = vmatprep.mubr.msk.bf16.mxu1 %vm2170_vm0, %v3708_v24 }
 0x35e   : > { %4453 = vmatmul.mubr.msk.bf16.gmra.mrb[12].mxu1 %vm2170_vm0, %v3710_v15 }
 0x3d4   : > { %v4442_v23 = vpop.f32.mrb[0].mxu1 }
 0x3d5   : > { %v3800_v29 = vadd.f32 %v4442_v23, %v5991_v26  ;;  %v3791_v50 = vpop.f32.mrb[1].mxu1  ;;  %v4383_v23 = vld [vmem:[%s4883_s19 + $0x38] sm:$0xff]  }
 0x3d6   : > { %v3792_v30 = vadd.f32 %v5991_v26, %v3791_v50  ;;  %v4443_v19 = vpop.f32.mrb[2].mxu1 }
 0x3d7   : > { %v3888_v34 = vadd.f32 %v4351_v18, %v3800_v29  ;;  %v3803_v38 = vadd.f32 %v4443_v19, %v5991_v26  ;;  %v3794_v58 = vpop.f32.mrb[3].mxu1  ;;  %v4375_v29 = vunpack.c.l.bf16 %v4383_v23 }
 0x3d8   : > { %v3886_v21 = vadd.f32 %v4347_v7, %v3792_v30  ;;  %v3795_v41 = vadd.f32 %v5991_v26, %v3794_v58  ;;  %v4382_v7 = vld [vmem:[%s4883_s19 + $0x30] sm:$0xff]  }
 0x3d9   : > { %v3904_v13 = vmax.f32 %v3888_v34, 0.0  ;;  %v3889_v17 = vadd.f32 %v4352_v48, %v3803_v38  ;;  %v4371_v48 = vunpack.c.l.bf16 %v4382_v7  ;;  %v4372_v58 = vunpack.c.h.bf16 %v4382_v7 }
 0x3da   : > { %v3902_v4 = vmax.f32 %v3886_v21, 0.0  ;;  %v3887_v27 = vadd.f32 %v4348_v62, %v3795_v41  ;;  %v4376_v62 = vunpack.c.h.bf16 %v4383_v23 }
 0x3db   : > { %3920 = vst.msk [vmem:[%s4888_s22 + $0x10] sm:$0xff] %vm1975_vm12, %v3904_v13  ;;  %v3905_v39 = vmax.f32 %v3889_v17, 0.0 }
 0x3dc   : > { %3918 = vst.msk [vmem:[%s4888_s22] sm:$0xff] %vm1975_vm12, %v3902_v4  ;;  %v3903_v40 = vmax.f32 %v3887_v27, 0.0 }
 0x3dd   : > { %3921 = vst.msk [vmem:[%s4888_s22 + $0x18] sm:$0xff] %vm1975_vm12, %v3905_v39 }
 0x3de   : > { %3919 = vst.msk [vmem:[%s4888_s22 + $0x8] sm:$0xff] %vm1975_vm12, %v3903_v40 }
 0x3f4   : > { %v4446_v54 = vpop.f32.mrb[4].mxu1 }
 0x3f5   : > { %v3816_v60 = vadd.f32 %v4446_v54, %v5991_v26  ;;  %v3807_v61 = vpop.f32.mrb[5].mxu1 }
 0x3f6   : > { %v3808_v22 = vadd.f32 %v5991_v26, %v3807_v61  ;;  %v4447_v46 = vpop.f32.mrb[6].mxu1 }
 0x3f7   : > { %v3892_v45 = vadd.f32 %v4359_v36, %v3816_v60  ;;  %v3819_v49 = vadd.f32 %v4447_v46, %v5991_v26  ;;  %v3810_v11 = vpop.f32.mrb[7].mxu1 }
 0x3f8   : > { %v3890_v37 = vadd.f32 %v4355_v35, %v3808_v22  ;;  %v3811_v63 = vadd.f32 %v5991_v26, %v3810_v11 }
 0x3f9   : > { %v3908_v56 = vmax.f32 %v3892_v45, 0.0  ;;  %v3893_v57 = vadd.f32 %v4360_v32, %v3819_v49 }
 0x3fa   : > { %v3906_v33 = vmax.f32 %v3890_v37, 0.0  ;;  %v3891_v25 = vadd.f32 %v4356_v2, %v3811_v63 }
 0x3fb   : > { %3924 = vst.msk [vmem:[%s4888_s22 + $0x30] sm:$0xff] %vm1975_vm12, %v3908_v56  ;;  %v3909_v1 = vmax.f32 %v3893_v57, 0.0 }
 0x3fc   : > { %3922 = vst.msk [vmem:[%s4888_s22 + $0x20] sm:$0xff] %vm1975_vm12, %v3906_v33  ;;  %v3907_v9 = vmax.f32 %v3891_v25, 0.0 }
 0x3fd   : > { %3925 = vst.msk [vmem:[%s4888_s22 + $0x38] sm:$0xff] %vm1975_vm12, %v3909_v1 }
 0x3fe   : > { %3923 = vst.msk [vmem:[%s4888_s22 + $0x28] sm:$0xff] %vm1975_vm12, %v3907_v9 }
 0x414   : > { %v4450_v53 = vpop.f32.mrb[8].mxu1 }
 0x415   : > { %v3832_v47 = vadd.f32 %v4450_v53, %v5991_v26  ;;  %v3823_v42 = vpop.f32.mrb[9].mxu1 }
 0x416   : > { %v3824_v55 = vadd.f32 %v5991_v26, %v3823_v42  ;;  %v4451_v3 = vpop.f32.mrb[10].mxu1 }
 0x417   : > { %v3896_v51 = vadd.f32 %v4367_v14, %v3832_v47  ;;  %v3835_v43 = vadd.f32 %v4451_v3, %v5991_v26  ;;  %v3826_v44 = vpop.f32.mrb[11].mxu1 }
 0x418   : > { %v3894_v5 = vadd.f32 %v4363_v8, %v3824_v55  ;;  %v3827_v10 = vadd.f32 %v5991_v26, %v3826_v44 }
 0x419   : > { %v3912_v15 = vmax.f32 %v3896_v51, 0.0  ;;  %v3897_v16 = vadd.f32 %v4368_v6, %v3835_v43 }
 0x41a   : > { %v3910_v24 = vmax.f32 %v3894_v5, 0.0  ;;  %v3895_v31 = vadd.f32 %v4364_v12, %v3827_v10 }
 0x41b   : > { %3928 = vst.msk [vmem:[%s4888_s22 + $0x50] sm:$0xff] %vm1975_vm12, %v3912_v15  ;;  %v3913_v20 = vmax.f32 %v3897_v16, 0.0 }
 0x41c   : > { %3926 = vst.msk [vmem:[%s4888_s22 + $0x40] sm:$0xff] %vm1975_vm12, %v3910_v24  ;;  %v3911_v18 = vmax.f32 %v3895_v31, 0.0 }
 0x41d   : > { %3929 = vst.msk [vmem:[%s4888_s22 + $0x58] sm:$0xff] %vm1975_vm12, %v3913_v20 }
 0x41e   : > { %3927 = vst.msk [vmem:[%s4888_s22 + $0x48] sm:$0xff] %vm1975_vm12, %v3911_v18 }
 0x431   : > { %v4454_v50 = vpop.f32.mrb[12].mxu1 }
 0x432   : > { %v3848_v30 = vadd.f32 %v4454_v50, %v5991_v26  ;;  %v3839_v19 = vpop.f32.mrb[13].mxu1 }
 0x433   : > { %v3840_v34 = vadd.f32 %v5991_v26, %v3839_v19  ;;  %v4455_v38 = vpop.f32.mrb[14].mxu1 }
 0x434   : > { %v3900_v21 = vadd.f32 %v4375_v29, %v3848_v30  ;;  %v3851_v41 = vadd.f32 %v4455_v38, %v5991_v26  ;;  %v3842_v13 = vpop.f32.mrb[15].mxu1 }
 0x435   : > { %v3898_v17 = vadd.f32 %v4371_v48, %v3840_v34  ;;  %v3843_v4 = vadd.f32 %v5991_v26, %v3842_v13 }
 0x436   : > { %v3916_v27 = vmax.f32 %v3900_v21, 0.0  ;;  %v3901_v39 = vadd.f32 %v4376_v62, %v3851_v41 }
 0x437   : > { %v3914_v40 = vmax.f32 %v3898_v17, 0.0  ;;  %v3899_v28 = vadd.f32 %v4372_v58, %v3843_v4 }
 0x438   : > { %3932 = vst.msk [vmem:[%s4888_s22 + $0x70] sm:$0xff] %vm1975_vm12, %v3916_v27  ;;  %v3917_v52 = vmax.f32 %v3901_v39, 0.0 }
 0x439   : > { %3930 = vst.msk [vmem:[%s4888_s22 + $0x60] sm:$0xff] %vm1975_vm12, %v3914_v40  ;;  %v3915_v36 = vmax.f32 %v3899_v28, 0.0 }
 0x43a   : > { %3933 = vst.msk [vmem:[%s4888_s22 + $0x78] sm:$0xff] %vm1975_vm12, %v3917_v52 }
 0x43b   : > { %3931 = vst.msk [vmem:[%s4888_s22 + $0x68] sm:$0xff] %vm1975_vm12, %v3915_v36 }
 0x43c PF: > { %s17_s28 = sadd.s32 1, %s4716_s28   ;;  %s6085_s24 = smov %s4708_s26 }
 0x43d   : > { %p14_p13 = scmp.ge.s32.totalorder %s17_s28, 6   ;;  %s6086_s25 = smov %s4712_s27 }
 0x43e   : > { %s6087_s26 = smov %s6090_s29  ;;  %s6088_s27 = smov %s6094_s30 }
 0x43f   :  { %16 = sbr.rel (!%p14_p13) target bundleno = 3 (0x3), region = 106 }

</bundles_post_ra>
